<compile_context>
chip_gen: v6e
topology: v6e:2x2x1
jax: 0.10.0
libtpu: 0.0.40
codegen_flags: <defaults>
</compile_context>

<pallas_src>
import functools

import jax
import jax.numpy as jnp
from jax.experimental import pallas as pl
from jax.experimental.pallas import tpu as pltpu


def _round_up(n, m):
    return ((n + m - 1) // m) * m


def _vmem():
    # whole array resident in VMEM (everything here is KB..MB scale)
    return pl.BlockSpec(memory_space=pltpu.MemorySpace.VMEM)


# ------------------------------ fused kernel ------------------------------- #

def _mlp_fused_kernel(bn_eps, S, B,
                      x_ref, w1_ref, gb_ref, w2_ref, wms_ref, eps_ref, wd0c_ref,
                      wd1_hbm_ref, wd2_hbm_ref,
                      ms_ref, cls_ref, dec_ref,
                      wd1_vmem, wd2_vmem, dma_sem):
    # Stream the decoder tail weights (largest arrays) HBM -> VMEM, overlapping encoder compute.
    cp1 = pltpu.make_async_copy(wd1_hbm_ref, wd1_vmem, dma_sem.at[0])
    cp2 = pltpu.make_async_copy(wd2_hbm_ref, wd2_vmem, dma_sem.at[1])
    cp1.start()
    cp2.start()

    def mm(a, w):
        # bf16 x bf16 matmul with f32 accumulation on the MXU
        return jnp.dot(a.astype(jnp.bfloat16), w, preferred_element_type=jnp.float32)

    def bn_relu(h, g, b):
        # training-mode BatchNorm1d (biased batch variance), fused scale/shift, then ReLU
        mean = jnp.mean(h, axis=0, keepdims=True)
        var = jnp.mean(jnp.square(h - mean), axis=0, keepdims=True)   # >= 0, no cancellation
        scale = g * jax.lax.rsqrt(var + bn_eps)                       # rsqrt -> EUP slot
        shift = b - mean * scale
        return jnp.maximum(h * scale + shift, 0.0)

    def bn_relu_grouped(h, g, b):
        # per-sample BN statistics: normalize each static row group of B rows independently
        parts = [bn_relu(h[s * B:(s + 1) * B, :], g, b) for s in range(S)]
        return parts[0] if S == 1 else jnp.concatenate(parts, axis=0)

    hid_p = w2_ref.shape[0]
    lat_p = wms_ref.shape[1] // 2

    gb = gb_ref[...]                         # (8, hid_p) packed gamma/beta
    g1, b1 = gb[0:1, :], gb[1:2, :]
    g2, b2 = gb[2:3, :], gb[3:4, :]
    gd0, bd0 = gb[4:5, :], gb[5:6, :]
    gd1, bd1 = gb[6:7, :], gb[7:8, :]

    # ---------------- encoder ----------------
    h = mm(x_ref[...], w1_ref[...])
    h = bn_relu(h, g1, b1)
    h = mm(h, w2_ref[...])
    h = bn_relu(h, g2, b2)

    # ------------- fused mu / std head -------------
    ms = mm(h, wms_ref[...])                 # (B, 2*lat_p): mu in [0:lat_p), std in [lat_p:)
    ms_ref[...] = ms
    mu = ms[:, :lat_p]
    std = ms[:, lat_p:]

    # ----- batched reparameterization: all samples as one (S*B, lat_p) LHS -----
    mu_all = jnp.concatenate([mu] * S, axis=0)
    std_all = jnp.concatenate([std] * S, axis=0)
    z_all = eps_ref[...] * std_all + mu_all                 # eps.mul(std).add(mu), all samples

    # ----- fused decoder_layer0 + classifier matmul (classifier lanes [hid_p:hid_p+128)) -----
    dc = mm(z_all, wd0c_ref[...])                           # (S*B, hid_p + 128)
    cls_ref[...] = dc[:, hid_p:]
    d = bn_relu_grouped(dc[:, :hid_p], gd0, bd0)

    cp1.wait()
    d = mm(d, wd1_vmem[...])
    d = bn_relu_grouped(d, gd1, bd1)

    cp2.wait()
    dec_ref[...] = mm(d, wd2_vmem[...])                     # (S*B, dec_p), lane-dense


# --------------------------- parameter padding ------------------------------ #

def pad_params(params, in_dim, hidden, latent_dim, dec_out, num_classes):
    """Zero-pad weights to lane-aligned shapes and cast to bf16; pack gamma/beta into one array."""
    in_p = _round_up(in_dim, 128)
    hid_p = _round_up(hidden, 128)
    lat_p = _round_up(latent_dim, 128)
    cls_p = _round_up(num_classes, 128)
    dec_p = _round_up(dec_out, 128)

    def pad_w(w, rows, cols):
        out = jnp.zeros((rows, cols), jnp.float32)
        out = out.at[: w.shape[0], : w.shape[1]].set(w)
        return out.astype(jnp.bfloat16)

    # fused mu / std head: mu in lanes [0:lat_p), std in lanes [lat_p:2*lat_p)
    wms = jnp.zeros((hid_p, 2 * lat_p), jnp.float32)
    wms = wms.at[:hidden, :latent_dim].set(params["mu_w"])
    wms = wms.at[:hidden, lat_p:lat_p + latent_dim].set(params["std_w"])
    wms = wms.astype(jnp.bfloat16)

    # fused decoder_layer0 + classifier: decoder in lanes [0:hid_p), classifier in [hid_p:hid_p+cls_p)
    wd0c = jnp.zeros((lat_p, hid_p + cls_p), jnp.float32)
    wd0c = wd0c.at[:latent_dim, :hidden].set(params["dec0_w"])
    wd0c = wd0c.at[:latent_dim, hid_p:hid_p + num_classes].set(params["cls_w"])
    wd0c = wd0c.astype(jnp.bfloat16)

    # pack the 8 gamma/beta vectors into one (8, hid_p) f32 array
    def padv(v, fill):
        v = jnp.asarray(v, jnp.float32).reshape(1, -1)
        return jnp.pad(v, ((0, 0), (0, hid_p - v.shape[1])), constant_values=fill)

    gb = jnp.concatenate([
        padv(params["enc1_g"], 1.0), padv(params["enc1_b"], 0.0),
        padv(params["enc2_g"], 1.0), padv(params["enc2_b"], 0.0),
        padv(params["dec0_g"], 1.0), padv(params["dec0_b"], 0.0),
        padv(params["dec1_g"], 1.0), padv(params["dec1_b"], 0.0),
    ], axis=0)

    return {
        "w1": pad_w(params["enc1_w"], in_p, hid_p),
        "w2": pad_w(params["enc2_w"], hid_p, hid_p),
        "wms": wms,
        "gb": gb,
        "wd0c": wd0c,
        "wd1": pad_w(params["dec1_w"], hid_p, hid_p),
        "wd2": pad_w(params["dec2_w"], hid_p, dec_p),
    }


# ------------------------------- MLP forward -------------------------------- #

@functools.partial(jax.jit,
                   static_argnames=("bn_eps", "latent_dim", "num_classes",
                                    "out_channels", "patch_size"))
def mlp_forward(x, eps_noise, pp, *, bn_eps, latent_dim, num_classes,
                out_channels, patch_size):
    """Reproduces MLP.forward: returns (classification_samples, output_samples, z_mean, z_std)."""
    B = x.shape[0]
    S = eps_noise.shape[0]
    in_p = pp["w1"].shape[0]
    hid_p = pp["w2"].shape[0]
    lat_p = pp["wd0c"].shape[0]
    cls_p = pp["wd0c"].shape[1] - hid_p
    dec_p = pp["wd2"].shape[1]
    dec_out = out_channels * patch_size * patch_size

    xf = x.reshape(B, -1)                                     # == x.view(x.size(0), -1)
    xp = jnp.pad(xf, ((0, 0), (0, in_p - xf.shape[1])))
    eps_p = jnp.pad(eps_noise, ((0, 0), (0, 0), (0, lat_p - eps_noise.shape[2])))
    eps_flat = eps_p.reshape(S * B, lat_p)                    # row s*B + b == sample s, item b

    out_shapes = (
        jax.ShapeDtypeStruct((B, 2 * lat_p), jnp.float32),    # mu/std slab
        jax.ShapeDtypeStruct((S * B, cls_p), jnp.float32),    # classifier slab (lane-dense)
        jax.ShapeDtypeStruct((S * B, dec_p), jnp.float32),    # decoder slab (lane-dense)
    )

    ms, cls, dec = pl.pallas_call(
        functools.partial(_mlp_fused_kernel, bn_eps, S, B),
        out_shape=out_shapes,
        in_specs=[_vmem(), _vmem(), _vmem(), _vmem(), _vmem(), _vmem(), _vmem(),
                  pl.BlockSpec(memory_space=pl.ANY),          # wd1: streamed manually
                  pl.BlockSpec(memory_space=pl.ANY)],         # wd2: streamed manually
        out_specs=(_vmem(), _vmem(), _vmem()),
        scratch_shapes=[
            pltpu.VMEM((hid_p, hid_p), jnp.bfloat16),
            pltpu.VMEM((hid_p, dec_p), jnp.bfloat16),
            pltpu.SemaphoreType.DMA((2,)),
        ],
    )(xp, pp["w1"], pp["gb"], pp["w2"], pp["wms"], eps_flat, pp["wd0c"],
      pp["wd1"], pp["wd2"])

    z_mean = ms[:, :latent_dim]
    z_std = ms[:, lat_p:lat_p + latent_dim]
    cls_samples = cls[:, :num_classes].reshape(S, B, num_classes)
    out_samples = dec[:, :dec_out].reshape(S, B, out_channels, patch_size, patch_size)
    return cls_samples, out_samples, z_mean, z_std


# ----------------------------------- main ----------------------------------- #

if __name__ == "__main__":
    # small deterministic configuration consistent with the module's __init__
    B = 4                 # args.batch_size
    num_colors = 3
    patch_size = 8        # args.patch_size
    out_channels = 3      # args.out_channels
    num_classes = 10
    latent_dim = 32       # args.var_latent_dim
    num_samples = 2       # args.var_samples
    bn_eps = 1e-5         # args.batch_norm
    hidden = 400          # architecture-fixed
    in_dim = num_colors * patch_size ** 2
    dec_out = out_channels * patch_size ** 2

    key = jax.random.PRNGKey(0)
    keys = jax.random.split(key, 11)

    def init_linear(k, fan_in, fan_out):
        # PyTorch nn.Linear default init ~ U(-1/sqrt(fan_in), 1/sqrt(fan_in)),
        # stored transposed as (fan_in, fan_out) for x @ W (bias=False in the reference).
        bound = 1.0 / (fan_in ** 0.5)
        return jax.random.uniform(k, (fan_in, fan_out), jnp.float32, -bound, bound)

    ones = jnp.ones((1, hidden), jnp.float32)
    zeros = jnp.zeros((1, hidden), jnp.float32)

    params = {
        "enc1_w": init_linear(keys[0], in_dim, hidden), "enc1_g": ones, "enc1_b": zeros,
        "enc2_w": init_linear(keys[1], hidden, hidden), "enc2_g": ones, "enc2_b": zeros,
        "mu_w":   init_linear(keys[2], hidden, latent_dim),
        "std_w":  init_linear(keys[3], hidden, latent_dim),
        "cls_w":  init_linear(keys[4], latent_dim, num_classes),
        "dec0_w": init_linear(keys[5], latent_dim, hidden), "dec0_g": ones, "dec0_b": zeros,
        "dec1_w": init_linear(keys[6], hidden, hidden),     "dec1_g": ones, "dec1_b": zeros,
        "dec2_w": init_linear(keys[7], hidden, dec_out),
    }

    # one-time padding / bf16 cast of parameters to lane-aligned VMEM-resident shapes
    pp = pad_params(params, in_dim, hidden, latent_dim, dec_out, num_classes)

    x = jax.random.normal(keys[8], (B, num_colors, patch_size, patch_size), jnp.float32)
    # reparameterization noise (eps = std.data.new(std.size()).normal_() per sample)
    # TODO(synk): the torch module draws eps internally; here it is passed in deterministically.
    eps_noise = jax.random.normal(keys[9], (num_samples, B, latent_dim), jnp.float32)

    cls_samples, out_samples, z_mean, z_std = mlp_forward(
        x, eps_noise, pp,
        bn_eps=bn_eps, latent_dim=latent_dim, num_classes=num_classes,
        out_channels=out_channels, patch_size=patch_size)

    jax.block_until_ready((cls_samples, out_samples, z_mean, z_std))

    assert cls_samples.shape == (num_samples, B, num_classes)
    assert out_samples.shape == (num_samples, B, out_channels, patch_size, patch_size)
    assert z_mean.shape == (B, latent_dim) and z_std.shape == (B, latent_dim)
    assert jnp.all(jnp.isfinite(cls_samples)) and jnp.all(jnp.isfinite(out_samples))
    assert jnp.all(jnp.isfinite(z_mean)) and jnp.all(jnp.isfinite(z_std))
    print("KERNEL_OK")
</pallas_src>

<mosaic_0001>
module attributes {stable_mosaic.version = 11 : i64} {
  func.func @_mlp_fused_kernel(%arg0: memref<4x256xf32, #tpu.memory_space<vmem>>, %arg1: memref<256x512xbf16, #tpu.memory_space<vmem>>, %arg2: memref<8x512xf32, #tpu.memory_space<vmem>>, %arg3: memref<512x512xbf16, #tpu.memory_space<vmem>>, %arg4: memref<512x256xbf16, #tpu.memory_space<vmem>>, %arg5: memref<8x128xf32, #tpu.memory_space<vmem>>, %arg6: memref<128x640xbf16, #tpu.memory_space<vmem>>, %arg7: memref<512x512xbf16, #tpu.memory_space<any>>, %arg8: memref<512x256xbf16, #tpu.memory_space<any>>, %arg9: memref<4x256xf32, #tpu.memory_space<vmem>>, %arg10: memref<8x128xf32, #tpu.memory_space<vmem>>, %arg11: memref<8x256xf32, #tpu.memory_space<vmem>>, %arg12: memref<512x512xbf16, #tpu.memory_space<vmem>>, %arg13: memref<512x256xbf16, #tpu.memory_space<vmem>>, %arg14: memref<2x!tpu.dma_semaphore, #tpu.memory_space<semaphore_mem>>) attributes {dimension_semantics = [], scalar_prefetch = 0 : i64, scratch_operands = 3 : i64, tpu.core_type = #tpu.core_type<tc>} {
    %c0_i32 = arith.constant 0 : i32
    %0 = tpu.memref_slice %arg14[%c0_i32] : memref<2x!tpu.dma_semaphore, #tpu.memory_space<semaphore_mem>> -> memref<1x!tpu.dma_semaphore, #tpu.memory_space<semaphore_mem>>
    %1 = tpu.memref_squeeze %0 : memref<1x!tpu.dma_semaphore, #tpu.memory_space<semaphore_mem>> -> memref<!tpu.dma_semaphore, #tpu.memory_space<semaphore_mem>>
    tpu.enqueue_dma source(%arg7 : memref<512x512xbf16, #tpu.memory_space<any>>) target(%arg12 : memref<512x512xbf16, #tpu.memory_space<vmem>>) target_semaphore(%1 : memref<!tpu.dma_semaphore, #tpu.memory_space<semaphore_mem>>)
    %c1_i32 = arith.constant 1 : i32
    %2 = tpu.memref_slice %arg14[%c1_i32] : memref<2x!tpu.dma_semaphore, #tpu.memory_space<semaphore_mem>> -> memref<1x!tpu.dma_semaphore, #tpu.memory_space<semaphore_mem>>
    %3 = tpu.memref_squeeze %2 : memref<1x!tpu.dma_semaphore, #tpu.memory_space<semaphore_mem>> -> memref<!tpu.dma_semaphore, #tpu.memory_space<semaphore_mem>>
    tpu.enqueue_dma source(%arg8 : memref<512x256xbf16, #tpu.memory_space<any>>) target(%arg13 : memref<512x256xbf16, #tpu.memory_space<vmem>>) target_semaphore(%3 : memref<!tpu.dma_semaphore, #tpu.memory_space<semaphore_mem>>)
    %c0 = arith.constant 0 : index
    %c0_0 = arith.constant 0 : index
    %4 = vector.load %arg2[%c0, %c0_0] : memref<8x512xf32, #tpu.memory_space<vmem>>, vector<8x512xf32>
    %5 = vector.extract_strided_slice %4 {offsets = [0, 0], sizes = [1, 512], strides = [1, 1]} : vector<8x512xf32> to vector<1x512xf32>
    %6 = vector.extract_strided_slice %4 {offsets = [1, 0], sizes = [1, 512], strides = [1, 1]} : vector<8x512xf32> to vector<1x512xf32>
    %7 = vector.extract_strided_slice %4 {offsets = [2, 0], sizes = [1, 512], strides = [1, 1]} : vector<8x512xf32> to vector<1x512xf32>
    %8 = vector.extract_strided_slice %4 {offsets = [3, 0], sizes = [1, 512], strides = [1, 1]} : vector<8x512xf32> to vector<1x512xf32>
    %9 = vector.extract_strided_slice %4 {offsets = [4, 0], sizes = [1, 512], strides = [1, 1]} : vector<8x512xf32> to vector<1x512xf32>
    %10 = vector.extract_strided_slice %4 {offsets = [5, 0], sizes = [1, 512], strides = [1, 1]} : vector<8x512xf32> to vector<1x512xf32>
    %11 = vector.extract_strided_slice %4 {offsets = [6, 0], sizes = [1, 512], strides = [1, 1]} : vector<8x512xf32> to vector<1x512xf32>
    %12 = vector.extract_strided_slice %4 {offsets = [7, 0], sizes = [1, 512], strides = [1, 1]} : vector<8x512xf32> to vector<1x512xf32>
    %c0_1 = arith.constant 0 : index
    %c0_2 = arith.constant 0 : index
    %13 = vector.load %arg0[%c0_1, %c0_2] : memref<4x256xf32, #tpu.memory_space<vmem>>, vector<4x256xf32>
    %c0_3 = arith.constant 0 : index
    %c0_4 = arith.constant 0 : index
    %14 = vector.load %arg1[%c0_3, %c0_4] : memref<256x512xbf16, #tpu.memory_space<vmem>>, vector<256x512xbf16>
    %15 = arith.truncf %13 : vector<4x256xf32> to vector<4x256xbf16>
    %cst = arith.constant dense<0.000000e+00> : vector<4x512xf32>
    %16 = tpu.matmul %15, %14, %cst {dimension_numbers = #tpu.dot_dimension_numbers<[1], [0], [0], [1], [0, 0, 1, 1], [], []>} : vector<4x256xbf16>, vector<256x512xbf16>, vector<4x512xf32> -> vector<4x512xf32>
    %cst_5 = arith.constant dense<0.000000e+00> : vector<512xf32>
    %17 = vector.multi_reduction <add>, %16, %cst_5 [0] : vector<4x512xf32> to vector<512xf32>
    %18 = vector.shape_cast %17 : vector<512xf32> to vector<1x512xf32>
    %cst_6 = arith.constant 4.000000e+00 : f32
    %19 = vector.broadcast %cst_6 : f32 to vector<1x512xf32>
    %20 = arith.divf %18, %19 : vector<1x512xf32>
    %21 = vector.broadcast %20 : vector<1x512xf32> to vector<4x512xf32>
    %22 = arith.subf %16, %21 : vector<4x512xf32>
    %23 = arith.mulf %22, %22 : vector<4x512xf32>
    %cst_7 = arith.constant dense<0.000000e+00> : vector<512xf32>
    %24 = vector.multi_reduction <add>, %23, %cst_7 [0] : vector<4x512xf32> to vector<512xf32>
    %25 = vector.shape_cast %24 : vector<512xf32> to vector<1x512xf32>
    %cst_8 = arith.constant 4.000000e+00 : f32
    %26 = vector.broadcast %cst_8 : f32 to vector<1x512xf32>
    %27 = arith.divf %25, %26 : vector<1x512xf32>
    %cst_9 = arith.constant 9.99999974E-6 : f32
    %28 = vector.broadcast %cst_9 : f32 to vector<1x512xf32>
    %29 = arith.addf %27, %28 : vector<1x512xf32>
    %30 = math.rsqrt %29 : vector<1x512xf32>
    %31 = arith.mulf %5, %30 : vector<1x512xf32>
    %32 = arith.mulf %20, %31 : vector<1x512xf32>
    %33 = arith.subf %6, %32 : vector<1x512xf32>
    %34 = vector.broadcast %31 : vector<1x512xf32> to vector<4x512xf32>
    %35 = arith.mulf %16, %34 : vector<4x512xf32>
    %36 = vector.broadcast %33 : vector<1x512xf32> to vector<4x512xf32>
    %37 = arith.addf %35, %36 : vector<4x512xf32>
    %cst_10 = arith.constant 0.000000e+00 : f32
    %38 = vector.broadcast %cst_10 : f32 to vector<4x512xf32>
    %39 = arith.maximumf %37, %38 : vector<4x512xf32>
    %c0_11 = arith.constant 0 : index
    %c0_12 = arith.constant 0 : index
    %40 = vector.load %arg3[%c0_11, %c0_12] : memref<512x512xbf16, #tpu.memory_space<vmem>>, vector<512x512xbf16>
    %41 = arith.truncf %39 : vector<4x512xf32> to vector<4x512xbf16>
    %cst_13 = arith.constant dense<0.000000e+00> : vector<4x512xf32>
    %42 = tpu.matmul %41, %40, %cst_13 {dimension_numbers = #tpu.dot_dimension_numbers<[1], [0], [0], [1], [0, 0, 1, 1], [], []>} : vector<4x512xbf16>, vector<512x512xbf16>, vector<4x512xf32> -> vector<4x512xf32>
    %cst_14 = arith.constant dense<0.000000e+00> : vector<512xf32>
    %43 = vector.multi_reduction <add>, %42, %cst_14 [0] : vector<4x512xf32> to vector<512xf32>
    %44 = vector.shape_cast %43 : vector<512xf32> to vector<1x512xf32>
    %cst_15 = arith.constant 4.000000e+00 : f32
    %45 = vector.broadcast %cst_15 : f32 to vector<1x512xf32>
    %46 = arith.divf %44, %45 : vector<1x512xf32>
    %47 = vector.broadcast %46 : vector<1x512xf32> to vector<4x512xf32>
    %48 = arith.subf %42, %47 : vector<4x512xf32>
    %49 = arith.mulf %48, %48 : vector<4x512xf32>
    %cst_16 = arith.constant dense<0.000000e+00> : vector<512xf32>
    %50 = vector.multi_reduction <add>, %49, %cst_16 [0] : vector<4x512xf32> to vector<512xf32>
    %51 = vector.shape_cast %50 : vector<512xf32> to vector<1x512xf32>
    %cst_17 = arith.constant 4.000000e+00 : f32
    %52 = vector.broadcast %cst_17 : f32 to vector<1x512xf32>
    %53 = arith.divf %51, %52 : vector<1x512xf32>
    %cst_18 = arith.constant 9.99999974E-6 : f32
    %54 = vector.broadcast %cst_18 : f32 to vector<1x512xf32>
    %55 = arith.addf %53, %54 : vector<1x512xf32>
    %56 = math.rsqrt %55 : vector<1x512xf32>
    %57 = arith.mulf %7, %56 : vector<1x512xf32>
    %58 = arith.mulf %46, %57 : vector<1x512xf32>
    %59 = arith.subf %8, %58 : vector<1x512xf32>
    %60 = vector.broadcast %57 : vector<1x512xf32> to vector<4x512xf32>
    %61 = arith.mulf %42, %60 : vector<4x512xf32>
    %62 = vector.broadcast %59 : vector<1x512xf32> to vector<4x512xf32>
    %63 = arith.addf %61, %62 : vector<4x512xf32>
    %cst_19 = arith.constant 0.000000e+00 : f32
    %64 = vector.broadcast %cst_19 : f32 to vector<4x512xf32>
    %65 = arith.maximumf %63, %64 : vector<4x512xf32>
    %c0_20 = arith.constant 0 : index
    %c0_21 = arith.constant 0 : index
    %66 = vector.load %arg4[%c0_20, %c0_21] : memref<512x256xbf16, #tpu.memory_space<vmem>>, vector<512x256xbf16>
    %67 = arith.truncf %65 : vector<4x512xf32> to vector<4x512xbf16>
    %cst_22 = arith.constant dense<0.000000e+00> : vector<4x256xf32>
    %68 = tpu.matmul %67, %66, %cst_22 {dimension_numbers = #tpu.dot_dimension_numbers<[1], [0], [0], [1], [0, 0, 1, 1], [], []>} : vector<4x512xbf16>, vector<512x256xbf16>, vector<4x256xf32> -> vector<4x256xf32>
    %c0_23 = arith.constant 0 : index
    %c0_24 = arith.constant 0 : index
    %69 = vector.load %arg9[%c0_23, %c0_24] : memref<4x256xf32, #tpu.memory_space<vmem>>, vector<4x256xf32>
    tpu.vector_store %arg9[%c0_23, %c0_24], %68 {strides = array<i32>} : memref<4x256xf32, #tpu.memory_space<vmem>>, vector<4x256xf32>,
    %70 = vector.extract_strided_slice %68 {offsets = [0, 0], sizes = [4, 128], strides = [1, 1]} : vector<4x256xf32> to vector<4x128xf32>
    %71 = vector.extract_strided_slice %68 {offsets = [0, 128], sizes = [4, 128], strides = [1, 1]} : vector<4x256xf32> to vector<4x128xf32>
    %72 = tpu.concatenate %70, %70 in 0 : vector<4x128xf32>, vector<4x128xf32> -> vector<8x128xf32>
    %73 = tpu.concatenate %71, %71 in 0 : vector<4x128xf32>, vector<4x128xf32> -> vector<8x128xf32>
    %c0_25 = arith.constant 0 : index
    %c0_26 = arith.constant 0 : index
    %74 = vector.load %arg5[%c0_25, %c0_26] : memref<8x128xf32, #tpu.memory_space<vmem>>, vector<8x128xf32>
    %75 = arith.mulf %74, %73 : vector<8x128xf32>
    %76 = arith.addf %75, %72 : vector<8x128xf32>
    %c0_27 = arith.constant 0 : index
    %c0_28 = arith.constant 0 : index
    %77 = vector.load %arg6[%c0_27, %c0_28] : memref<128x640xbf16, #tpu.memory_space<vmem>>, vector<128x640xbf16>
    %78 = arith.truncf %76 : vector<8x128xf32> to vector<8x128xbf16>
    %cst_29 = arith.constant dense<0.000000e+00> : vector<8x640xf32>
    %79 = tpu.matmul %78, %77, %cst_29 {dimension_numbers = #tpu.dot_dimension_numbers<[1], [0], [0], [1], [0, 0, 1, 1], [], []>} : vector<8x128xbf16>, vector<128x640xbf16>, vector<8x640xf32> -> vector<8x640xf32>
    %80 = vector.extract_strided_slice %79 {offsets = [0, 512], sizes = [8, 128], strides = [1, 1]} : vector<8x640xf32> to vector<8x128xf32>
    %c0_30 = arith.constant 0 : index
    %c0_31 = arith.constant 0 : index
    %81 = vector.load %arg10[%c0_30, %c0_31] : memref<8x128xf32, #tpu.memory_space<vmem>>, vector<8x128xf32>
    tpu.vector_store %arg10[%c0_30, %c0_31], %80 {strides = array<i32>} : memref<8x128xf32, #tpu.memory_space<vmem>>, vector<8x128xf32>,
    %82 = vector.extract_strided_slice %79 {offsets = [0, 0], sizes = [8, 512], strides = [1, 1]} : vector<8x640xf32> to vector<8x512xf32>
    %83 = vector.extract_strided_slice %82 {offsets = [0, 0], sizes = [4, 512], strides = [1, 1]} : vector<8x512xf32> to vector<4x512xf32>
    %cst_32 = arith.constant dense<0.000000e+00> : vector<512xf32>
    %84 = vector.multi_reduction <add>, %83, %cst_32 [0] : vector<4x512xf32> to vector<512xf32>
    %85 = vector.shape_cast %84 : vector<512xf32> to vector<1x512xf32>
    %cst_33 = arith.constant 4.000000e+00 : f32
    %86 = vector.broadcast %cst_33 : f32 to vector<1x512xf32>
    %87 = arith.divf %85, %86 : vector<1x512xf32>
    %88 = vector.broadcast %87 : vector<1x512xf32> to vector<4x512xf32>
    %89 = arith.subf %83, %88 : vector<4x512xf32>
    %90 = arith.mulf %89, %89 : vector<4x512xf32>
    %cst_34 = arith.constant dense<0.000000e+00> : vector<512xf32>
    %91 = vector.multi_reduction <add>, %90, %cst_34 [0] : vector<4x512xf32> to vector<512xf32>
    %92 = vector.shape_cast %91 : vector<512xf32> to vector<1x512xf32>
    %cst_35 = arith.constant 4.000000e+00 : f32
    %93 = vector.broadcast %cst_35 : f32 to vector<1x512xf32>
    %94 = arith.divf %92, %93 : vector<1x512xf32>
    %cst_36 = arith.constant 9.99999974E-6 : f32
    %95 = vector.broadcast %cst_36 : f32 to vector<1x512xf32>
    %96 = arith.addf %94, %95 : vector<1x512xf32>
    %97 = math.rsqrt %96 : vector<1x512xf32>
    %98 = arith.mulf %9, %97 : vector<1x512xf32>
    %99 = arith.mulf %87, %98 : vector<1x512xf32>
    %100 = arith.subf %10, %99 : vector<1x512xf32>
    %101 = vector.broadcast %98 : vector<1x512xf32> to vector<4x512xf32>
    %102 = arith.mulf %83, %101 : vector<4x512xf32>
    %103 = vector.broadcast %100 : vector<1x512xf32> to vector<4x512xf32>
    %104 = arith.addf %102, %103 : vector<4x512xf32>
    %cst_37 = arith.constant 0.000000e+00 : f32
    %105 = vector.broadcast %cst_37 : f32 to vector<4x512xf32>
    %106 = arith.maximumf %104, %105 : vector<4x512xf32>
    %107 = vector.extract_strided_slice %82 {offsets = [4, 0], sizes = [4, 512], strides = [1, 1]} : vector<8x512xf32> to vector<4x512xf32>
    %cst_38 = arith.constant dense<0.000000e+00> : vector<512xf32>
    %108 = vector.multi_reduction <add>, %107, %cst_38 [0] : vector<4x512xf32> to vector<512xf32>
    %109 = vector.shape_cast %108 : vector<512xf32> to vector<1x512xf32>
    %cst_39 = arith.constant 4.000000e+00 : f32
    %110 = vector.broadcast %cst_39 : f32 to vector<1x512xf32>
    %111 = arith.divf %109, %110 : vector<1x512xf32>
    %112 = vector.broadcast %111 : vector<1x512xf32> to vector<4x512xf32>
    %113 = arith.subf %107, %112 : vector<4x512xf32>
    %114 = arith.mulf %113, %113 : vector<4x512xf32>
    %cst_40 = arith.constant dense<0.000000e+00> : vector<512xf32>
    %115 = vector.multi_reduction <add>, %114, %cst_40 [0] : vector<4x512xf32> to vector<512xf32>
    %116 = vector.shape_cast %115 : vector<512xf32> to vector<1x512xf32>
    %cst_41 = arith.constant 4.000000e+00 : f32
    %117 = vector.broadcast %cst_41 : f32 to vector<1x512xf32>
    %118 = arith.divf %116, %117 : vector<1x512xf32>
    %cst_42 = arith.constant 9.99999974E-6 : f32
    %119 = vector.broadcast %cst_42 : f32 to vector<1x512xf32>
    %120 = arith.addf %118, %119 : vector<1x512xf32>
    %121 = math.rsqrt %120 : vector<1x512xf32>
    %122 = arith.mulf %9, %121 : vector<1x512xf32>
    %123 = arith.mulf %111, %122 : vector<1x512xf32>
    %124 = arith.subf %10, %123 : vector<1x512xf32>
    %125 = vector.broadcast %122 : vector<1x512xf32> to vector<4x512xf32>
    %126 = arith.mulf %107, %125 : vector<4x512xf32>
    %127 = vector.broadcast %124 : vector<1x512xf32> to vector<4x512xf32>
    %128 = arith.addf %126, %127 : vector<4x512xf32>
    %cst_43 = arith.constant 0.000000e+00 : f32
    %129 = vector.broadcast %cst_43 : f32 to vector<4x512xf32>
    %130 = arith.maximumf %128, %129 : vector<4x512xf32>
    %131 = tpu.concatenate %106, %130 in 0 : vector<4x512xf32>, vector<4x512xf32> -> vector<8x512xf32>
    %c0_i32_44 = arith.constant 0 : i32
    %132 = tpu.memref_slice %arg14[%c0_i32_44] : memref<2x!tpu.dma_semaphore, #tpu.memory_space<semaphore_mem>> -> memref<1x!tpu.dma_semaphore, #tpu.memory_space<semaphore_mem>>
    %133 = tpu.memref_squeeze %132 : memref<1x!tpu.dma_semaphore, #tpu.memory_space<semaphore_mem>> -> memref<!tpu.dma_semaphore, #tpu.memory_space<semaphore_mem>>
    tpu.wait_dma2 semaphore(%133 : memref<!tpu.dma_semaphore, #tpu.memory_space<semaphore_mem>>) src(%arg7 : memref<512x512xbf16, #tpu.memory_space<any>>) dst(%arg12 : memref<512x512xbf16, #tpu.memory_space<vmem>>)
    %c0_45 = arith.constant 0 : index
    %c0_46 = arith.constant 0 : index
    %134 = vector.load %arg12[%c0_45, %c0_46] : memref<512x512xbf16, #tpu.memory_space<vmem>>, vector<512x512xbf16>
    %135 = arith.truncf %131 : vector<8x512xf32> to vector<8x512xbf16>
    %cst_47 = arith.constant dense<0.000000e+00> : vector<8x512xf32>
    %136 = tpu.matmul %135, %134, %cst_47 {dimension_numbers = #tpu.dot_dimension_numbers<[1], [0], [0], [1], [0, 0, 1, 1], [], []>} : vector<8x512xbf16>, vector<512x512xbf16>, vector<8x512xf32> -> vector<8x512xf32>
    %137 = vector.extract_strided_slice %136 {offsets = [0, 0], sizes = [4, 512], strides = [1, 1]} : vector<8x512xf32> to vector<4x512xf32>
    %cst_48 = arith.constant dense<0.000000e+00> : vector<512xf32>
    %138 = vector.multi_reduction <add>, %137, %cst_48 [0] : vector<4x512xf32> to vector<512xf32>
    %139 = vector.shape_cast %138 : vector<512xf32> to vector<1x512xf32>
    %cst_49 = arith.constant 4.000000e+00 : f32
    %140 = vector.broadcast %cst_49 : f32 to vector<1x512xf32>
    %141 = arith.divf %139, %140 : vector<1x512xf32>
    %142 = vector.broadcast %141 : vector<1x512xf32> to vector<4x512xf32>
    %143 = arith.subf %137, %142 : vector<4x512xf32>
    %144 = arith.mulf %143, %143 : vector<4x512xf32>
    %cst_50 = arith.constant dense<0.000000e+00> : vector<512xf32>
    %145 = vector.multi_reduction <add>, %144, %cst_50 [0] : vector<4x512xf32> to vector<512xf32>
    %146 = vector.shape_cast %145 : vector<512xf32> to vector<1x512xf32>
    %cst_51 = arith.constant 4.000000e+00 : f32
    %147 = vector.broadcast %cst_51 : f32 to vector<1x512xf32>
    %148 = arith.divf %146, %147 : vector<1x512xf32>
    %cst_52 = arith.constant 9.99999974E-6 : f32
    %149 = vector.broadcast %cst_52 : f32 to vector<1x512xf32>
    %150 = arith.addf %148, %149 : vector<1x512xf32>
    %151 = math.rsqrt %150 : vector<1x512xf32>
    %152 = arith.mulf %11, %151 : vector<1x512xf32>
    %153 = arith.mulf %141, %152 : vector<1x512xf32>
    %154 = arith.subf %12, %153 : vector<1x512xf32>
    %155 = vector.broadcast %152 : vector<1x512xf32> to vector<4x512xf32>
    %156 = arith.mulf %137, %155 : vector<4x512xf32>
    %157 = vector.broadcast %154 : vector<1x512xf32> to vector<4x512xf32>
    %158 = arith.addf %156, %157 : vector<4x512xf32>
    %cst_53 = arith.constant 0.000000e+00 : f32
    %159 = vector.broadcast %cst_53 : f32 to vector<4x512xf32>
    %160 = arith.maximumf %158, %159 : vector<4x512xf32>
    %161 = vector.extract_strided_slice %136 {offsets = [4, 0], sizes = [4, 512], strides = [1, 1]} : vector<8x512xf32> to vector<4x512xf32>
    %cst_54 = arith.constant dense<0.000000e+00> : vector<512xf32>
    %162 = vector.multi_reduction <add>, %161, %cst_54 [0] : vector<4x512xf32> to vector<512xf32>
    %163 = vector.shape_cast %162 : vector<512xf32> to vector<1x512xf32>
    %cst_55 = arith.constant 4.000000e+00 : f32
    %164 = vector.broadcast %cst_55 : f32 to vector<1x512xf32>
    %165 = arith.divf %163, %164 : vector<1x512xf32>
    %166 = vector.broadcast %165 : vector<1x512xf32> to vector<4x512xf32>
    %167 = arith.subf %161, %166 : vector<4x512xf32>
    %168 = arith.mulf %167, %167 : vector<4x512xf32>
    %cst_56 = arith.constant dense<0.000000e+00> : vector<512xf32>
    %169 = vector.multi_reduction <add>, %168, %cst_56 [0] : vector<4x512xf32> to vector<512xf32>
    %170 = vector.shape_cast %169 : vector<512xf32> to vector<1x512xf32>
    %cst_57 = arith.constant 4.000000e+00 : f32
    %171 = vector.broadcast %cst_57 : f32 to vector<1x512xf32>
    %172 = arith.divf %170, %171 : vector<1x512xf32>
    %cst_58 = arith.constant 9.99999974E-6 : f32
    %173 = vector.broadcast %cst_58 : f32 to vector<1x512xf32>
    %174 = arith.addf %172, %173 : vector<1x512xf32>
    %175 = math.rsqrt %174 : vector<1x512xf32>
    %176 = arith.mulf %11, %175 : vector<1x512xf32>
    %177 = arith.mulf %165, %176 : vector<1x512xf32>
    %178 = arith.subf %12, %177 : vector<1x512xf32>
    %179 = vector.broadcast %176 : vector<1x512xf32> to vector<4x512xf32>
    %180 = arith.mulf %161, %179 : vector<4x512xf32>
    %181 = vector.broadcast %178 : vector<1x512xf32> to vector<4x512xf32>
    %182 = arith.addf %180, %181 : vector<4x512xf32>
    %cst_59 = arith.constant 0.000000e+00 : f32
    %183 = vector.broadcast %cst_59 : f32 to vector<4x512xf32>
    %184 = arith.maximumf %182, %183 : vector<4x512xf32>
    %185 = tpu.concatenate %160, %184 in 0 : vector<4x512xf32>, vector<4x512xf32> -> vector<8x512xf32>
    %c1_i32_60 = arith.constant 1 : i32
    %186 = tpu.memref_slice %arg14[%c1_i32_60] : memref<2x!tpu.dma_semaphore, #tpu.memory_space<semaphore_mem>> -> memref<1x!tpu.dma_semaphore, #tpu.memory_space<semaphore_mem>>
    %187 = tpu.memref_squeeze %186 : memref<1x!tpu.dma_semaphore, #tpu.memory_space<semaphore_mem>> -> memref<!tpu.dma_semaphore, #tpu.memory_space<semaphore_mem>>
    tpu.wait_dma2 semaphore(%187 : memref<!tpu.dma_semaphore, #tpu.memory_space<semaphore_mem>>) src(%arg8 : memref<512x256xbf16, #tpu.memory_space<any>>) dst(%arg13 : memref<512x256xbf16, #tpu.memory_space<vmem>>)
    %c0_61 = arith.constant 0 : index
    %c0_62 = arith.constant 0 : index
    %188 = vector.load %arg13[%c0_61, %c0_62] : memref<512x256xbf16, #tpu.memory_space<vmem>>, vector<512x256xbf16>
    %189 = arith.truncf %185 : vector<8x512xf32> to vector<8x512xbf16>
    %cst_63 = arith.constant dense<0.000000e+00> : vector<8x256xf32>
    %190 = tpu.matmul %189, %188, %cst_63 {dimension_numbers = #tpu.dot_dimension_numbers<[1], [0], [0], [1], [0, 0, 1, 1], [], []>} : vector<8x512xbf16>, vector<512x256xbf16>, vector<8x256xf32> -> vector<8x256xf32>
    %c0_64 = arith.constant 0 : index
    %c0_65 = arith.constant 0 : index
    %191 = vector.load %arg11[%c0_64, %c0_65] : memref<8x256xf32, #tpu.memory_space<vmem>>, vector<8x256xf32>
    tpu.vector_store %arg11[%c0_64, %c0_65], %190 {strides = array<i32>} : memref<8x256xf32, #tpu.memory_space<vmem>>, vector<8x256xf32>,
    return
  }
}

</mosaic_0001>

<bundles_post_ra>
// kernel: mlp_forward.1
= control target key start
LH: loop header
LB: loop body
LE: loop exit
PB: predicated region body
PF: predicated region fallthrough
CT: control target
= control target key end

     0   :  { %17 = vsyncpa [#allocation6], 0  ;;  %s6762_s0 = inlined_call_operand.vmem [shape: f32[4,256], index: 0, kind: input, shape index: {}]   ;;  %s6763_s1 = inlined_call_operand.hbm [shape: bf16[256,512], index: 1, kind: input, shape index: {}]   ;;  %s6764_s2 = inlined_call_operand.vmem [shape: f32[8,512], index: 2, kind: input, shape index: {}]   ;;  %s6765_s3 = inlined_call_operand.hbm [shape: bf16[512,512], index: 3, kind: input, shape index: {}]   ;;  %s6766_s4 = inlined_call_operand.hbm [shape: bf16[512,256], index: 4, kind: input, shape index: {}]   ;;  %s6767_s5 = inlined_call_operand.vmem [shape: f32[8,128], index: 5, kind: input, shape index: {}]   ;;  %s6768_s6 = inlined_call_operand.hbm [shape: bf16[128,640], index: 6, kind: input, shape index: {}]   ;;  %s6769_s7 = inlined_call_operand.hbm [shape: bf16[512,512], index: 7, kind: input, shape index: {}]   ;;  %s6770_s8 = inlined_call_operand.hbm [shape: bf16[512,256], index: 8, kind: input, shape index: {}]   ;;  %s6771_s9 = inlined_call_operand.vmem [shape: f32[4,256], index: 9, kind: output, shape index: {0}]   ;;  %s6772_s10 = inlined_call_operand.hbm [shape: f32[8,128], index: 10, kind: output, shape index: {1}]   ;;  %s6773_s11 = inlined_call_operand.vmem [shape: f32[8,256], index: 11, kind: output, shape index: {2}]  }
   0x1   :  { %18 = vsyncpa [#allocation9], 0 }
   0x2   :  { %19 = vsyncpa [#allocation12], 0 }
   0x3   :  { %20 = vsyncpa [#allocation7], 0  ;;  %s6254_s17 = smov [#allocation8]   ;;  %s6255_s19 = smov [#allocation5]  }
   0x4   :  { %s42_s18 = sshll.u32 %s6254_s17, 4  ;;  %s28_s20 = sshll.u32 %s6255_s19, 4  ;;  %s43_s18 = int_to_ptr.vmem [resolvable:$true] %s42_s18  ;;  %s29_s20 = int_to_ptr.vmem [resolvable:$true] %s28_s20 }
   0x5   :  { %s6110_s21 = scalar_lea.vmem %s43_s18, 16384  ;;  %p6115_p1 = scmp.lt.s32.totalorder %s43_s18, %s43_s18 }
   0x6   :  { %p6111_p0 = scmp.ne.s32.totalorder %s43_s18, %s6110_s21  ;;  %p6116_p2 = scmp.lt.s32.totalorder %s6110_s21, %s6110_s21 }
   0x8   :  { %p6117_p3 = por %p6116_p2, %p6115_p1 }
   0xa   :  { %p6118_p4 = pnand %p6117_p3, %p6111_p0 }
   0xc   :  { %6121 = shalt.err (!%p6118_p4)
}
   0xd   :  { %s6256_s22 = smov 256   ;;  %s6257_s23 = smov 16  }
   0xe   :  { %48 = dma.hbm_to_vmem [thread:$0]  %s6765_s3, 16384, %s43_s18, [#allocation9], %s6256_s22, %s6256_s22, %s6257_s23  }
   0xf   :  { %s6130_s26 = scalar_lea.vmem %s29_s20, 8192  ;;  %p6135_p6 = scmp.lt.s32.totalorder %s29_s20, %s29_s20 }
  0x10   :  { %p6131_p5 = scmp.ne.s32.totalorder %s29_s20, %s6130_s26  ;;  %p6136_p7 = scmp.lt.s32.totalorder %s6130_s26, %s6130_s26 }
  0x12   :  { %p6137_p8 = por %p6136_p7, %p6135_p6 }
  0x14   :  { %p6138_p9 = pnand %p6137_p8, %p6131_p5 }
  0x16   :  { %6141 = shalt.err (!%p6138_p9)
}
  0x17   :  { %34 = dma.hbm_to_vmem [thread:$0]  %s6763_s1, 8192, %s29_s20, [#allocation6], %s6256_s22, %s6256_s22, %s6257_s23  }
  0x18   :  { %s6258_s29 = smov [#allocation10]  }
  0x19   :  { %s54_s30 = sshll.u32 %s6258_s29, 4  ;;  %s55_s30 = int_to_ptr.vmem [resolvable:$true] %s54_s30 }
  0x1a   :  { %s6150_s12 = scalar_lea.vmem %s55_s30, 8192  ;;  %p6155_p11 = scmp.lt.s32.totalorder %s55_s30, %s55_s30 }
  0x1b   :  { %p6151_p10 = scmp.ne.s32.totalorder %s55_s30, %s6150_s12  ;;  %p6156_p12 = scmp.lt.s32.totalorder %s6150_s12, %s6150_s12 }
  0x1d   :  { %p6157_p13 = por %p6156_p12, %p6155_p11 }
  0x1f   :  { %p6158_p0 = pnand %p6157_p13, %p6151_p10 }
  0x21   :  { %6161 = shalt.err (!%p6158_p0)
}
  0x22   :  { %s6259_s3 = smov 128   ;;  %s6260_s13 = smov 8  }
  0x23   :  { %60 = dma.hbm_to_vmem [thread:$0]  %s6766_s4, 8192, %s55_s30, [#allocation9], %s6259_s3, %s6259_s3, %s6260_s13  }
  0x24   :  { %s6261_s16 = smov [#allocation11]  }
  0x25   :  { %s68_s17 = sshll.u32 %s6261_s16, 4  ;;  %s69_s17 = int_to_ptr.vmem [resolvable:$true] %s68_s17 }
  0x26   :  { %s6170_s1 = scalar_lea.vmem %s69_s17, 5120  ;;  %p6175_p2 = scmp.lt.s32.totalorder %s69_s17, %s69_s17 }
  0x27   :  { %p6171_p1 = scmp.ne.s32.totalorder %s69_s17, %s6170_s1  ;;  %p6176_p3 = scmp.lt.s32.totalorder %s6170_s1, %s6170_s1 }
  0x29   :  { %p6177_p4 = por %p6176_p3, %p6175_p2 }
  0x2b   :  { %p6178_p5 = pnand %p6177_p4, %p6171_p1 }
  0x2d   :  { %6181 = shalt.err (!%p6178_p5)
}
  0x2e   :  { %s6262_s18 = smov 320   ;;  %s6263_s19 = smov 20  }
  0x2f   :  { %74 = dma.hbm_to_vmem [thread:$0]  %s6768_s6, 5120, %s69_s17, [#allocation12], %s6262_s18, %s6262_s18, %s6263_s19  }
  0x30   :  { %6242 = dma.done.wait [#allocation6], 8192  }
  0x31   :  { %6243 = vsyncadd [#allocation6], 4294959104 }
  0x32   :  { %6244 = dma.done.wait [#allocation9], 24576  }
  0x33   :  { %6245 = vsyncadd [#allocation9], 4294942720 }
  0x34   :  { %6246 = dma.done.wait [#allocation12], 5120  }
  0x35   :  { %6247 = vsyncadd [#allocation12], 4294962176  ;;  %v5321_v0 = vld [vmem:[#allocation5 + $0xe4] ss:$16 sps:$4 sm:$0xff]   ;;  %v5323_v1 = vld [vmem:[#allocation5 + $0xec] ss:$16 sps:$4 sm:$0xff]  }
  0x36   :  { %505 = vmatprep.subr.bf16.mxu0 %v5321_v0  ;;  %v5325_v2 = vld [vmem:[#allocation5 + $0xe0] ss:$16 sps:$4 sm:$0xff]   ;;  %v5326_v3 = vld [vmem:[#allocation5 + $0xe8] ss:$16 sps:$4 sm:$0xff]   ;;  %546 = vmatprep.subr.bf16.mxu1 %v5323_v1  ;;  %v5327_v4 = vld [vmem:[#allocation5 + $0xc4] ss:$16 sps:$4 sm:$0xff]  }
  0x37   :  { %506 = vmatpush1.bf16.msra.mxu0 %v5325_v2  ;;  %547 = vmatpush1.bf16.msra.mxu1 %v5326_v3  ;;  %v5329_v5 = vld [vmem:[#allocation5 + $0xcc] ss:$16 sps:$4 sm:$0xff]   ;;  %v5331_v6 = vld [vmem:[#allocation5 + $0xc0] ss:$16 sps:$4 sm:$0xff]   ;;  %v5332_v7 = vld [vmem:[#allocation5 + $0xc8] ss:$16 sps:$4 sm:$0xff]  }
  0x38   :  { %507 = vmatprep.subr.bf16.mxu0 %v5327_v4  ;;  %548 = vmatprep.subr.bf16.mxu1 %v5329_v5  ;;  %v5333_v8 = vld [vmem:[#allocation5 + $0xa4] ss:$16 sps:$4 sm:$0xff]   ;;  %v5335_v9 = vld [vmem:[#allocation5 + $0xac] ss:$16 sps:$4 sm:$0xff]   ;;  %v5337_v10 = vld [vmem:[#allocation5 + $0xa0] ss:$16 sps:$4 sm:$0xff]  }
  0x39   :  { %v5338_v11 = vld [vmem:[#allocation5 + $0xa8] ss:$16 sps:$4 sm:$0xff]   ;;  %v5339_v12 = vld [vmem:[#allocation5 + $0x84] ss:$16 sps:$4 sm:$0xff]   ;;  %v5341_v13 = vld [vmem:[#allocation5 + $0x8c] ss:$16 sps:$4 sm:$0xff]  }
  0x3a   :  { %v5343_v14 = vld [vmem:[#allocation5 + $0x80] ss:$16 sps:$4 sm:$0xff]   ;;  %v5344_v15 = vld [vmem:[#allocation5 + $0x88] ss:$16 sps:$4 sm:$0xff]   ;;  %v5345_v16 = vld [vmem:[#allocation5 + $0x64] ss:$16 sps:$4 sm:$0xff]  }
  0x3b   :  { %508 = vmatpush1.bf16.msra.mxu0 %v5331_v6  ;;  %549 = vmatpush1.bf16.msra.mxu1 %v5332_v7  ;;  %v5347_v17 = vld [vmem:[#allocation5 + $0x6c] ss:$16 sps:$4 sm:$0xff]   ;;  %v5349_v18 = vld [vmem:[#allocation5 + $0x60] ss:$16 sps:$4 sm:$0xff]   ;;  %v5350_v19 = vld [vmem:[#allocation5 + $0x68] ss:$16 sps:$4 sm:$0xff]  }
  0x3c   :  { %509 = vmatprep.subr.bf16.mxu0 %v5333_v8  ;;  %550 = vmatprep.subr.bf16.mxu1 %v5335_v9  ;;  %v5351_v20 = vld [vmem:[#allocation5 + $0x44] ss:$16 sps:$4 sm:$0xff]   ;;  %v5353_v21 = vld [vmem:[#allocation5 + $0x4c] ss:$16 sps:$4 sm:$0xff]   ;;  %v5355_v22 = vld [vmem:[#allocation5 + $0x40] ss:$16 sps:$4 sm:$0xff]  }
  0x3d   :  { %v5356_v23 = vld [vmem:[#allocation5 + $0x48] ss:$16 sps:$4 sm:$0xff]   ;;  %v5357_v24 = vld [vmem:[#allocation5 + $0x24] ss:$16 sps:$4 sm:$0xff]   ;;  %v5359_v25 = vld [vmem:[#allocation5 + $0x2c] ss:$16 sps:$4 sm:$0xff]  }
  0x3e   :  { %v5361_v26 = vld [vmem:[#allocation5 + $0x20] ss:$16 sps:$4 sm:$0xff]   ;;  %v5362_v27 = vld [vmem:[#allocation5 + $0x28] ss:$16 sps:$4 sm:$0xff]   ;;  %v5363_v28 = vld [vmem:[#allocation5 + $0x4] ss:$16 sps:$4 sm:$0xff]  }
  0x3f   :  { %510 = vmatpush1.bf16.msra.mxu0 %v5337_v10  ;;  %551 = vmatpush1.bf16.msra.mxu1 %v5338_v11  ;;  %v5365_v29 = vld [vmem:[#allocation5 + $0xc] ss:$16 sps:$4 sm:$0xff]   ;;  %v5367_v30 = vld [vmem:[#allocation5] ss:$16 sps:$4 sm:$0xff]   ;;  %v5368_v31 = vld [vmem:[#allocation5 + $0x8] ss:$16 sps:$4 sm:$0xff]  }
  0x40   :  { %511 = vmatprep.subr.bf16.mxu0 %v5339_v12  ;;  %552 = vmatprep.subr.bf16.mxu1 %v5341_v13  ;;  %v5369_v32 = vld [vmem:[#allocation5 + $0x1e4] ss:$16 sps:$4 sm:$0xff]   ;;  %v5371_v33 = vld [vmem:[#allocation5 + $0x1ec] ss:$16 sps:$4 sm:$0xff]   ;;  %v5373_v34 = vld [vmem:[#allocation5 + $0x1e0] ss:$16 sps:$4 sm:$0xff]  }
  0x41   :  { %v5374_v35 = vld [vmem:[#allocation5 + $0x1e8] ss:$16 sps:$4 sm:$0xff]   ;;  %v5375_v36 = vld [vmem:[#allocation5 + $0x1c4] ss:$16 sps:$4 sm:$0xff]   ;;  %v5377_v37 = vld [vmem:[#allocation5 + $0x1cc] ss:$16 sps:$4 sm:$0xff]  }
  0x42   :  { %v5379_v38 = vld [vmem:[#allocation5 + $0x1c0] ss:$16 sps:$4 sm:$0xff]   ;;  %v5380_v39 = vld [vmem:[#allocation5 + $0x1c8] ss:$16 sps:$4 sm:$0xff]   ;;  %v5381_v40 = vld [vmem:[#allocation5 + $0x1a4] ss:$16 sps:$4 sm:$0xff]  }
  0x43   :  { %512 = vmatpush1.bf16.msra.mxu0 %v5343_v14  ;;  %553 = vmatpush1.bf16.msra.mxu1 %v5344_v15  ;;  %v5383_v41 = vld [vmem:[#allocation5 + $0x1ac] ss:$16 sps:$4 sm:$0xff]   ;;  %v5385_v42 = vld [vmem:[#allocation5 + $0x1a0] ss:$16 sps:$4 sm:$0xff]   ;;  %v5386_v43 = vld [vmem:[#allocation5 + $0x1a8] ss:$16 sps:$4 sm:$0xff]  }
  0x44   :  { %513 = vmatprep.subr.bf16.mxu0 %v5345_v16  ;;  %554 = vmatprep.subr.bf16.mxu1 %v5347_v17  ;;  %v5387_v44 = vld [vmem:[#allocation5 + $0x184] ss:$16 sps:$4 sm:$0xff]   ;;  %v5389_v45 = vld [vmem:[#allocation5 + $0x18c] ss:$16 sps:$4 sm:$0xff]   ;;  %v5391_v46 = vld [vmem:[#allocation5 + $0x180] ss:$16 sps:$4 sm:$0xff]  }
  0x45   :  { %v5392_v47 = vld [vmem:[#allocation5 + $0x188] ss:$16 sps:$4 sm:$0xff]   ;;  %v115_v48 = vld [vmem:[%s6762_s0] sm:$0xff]  ;;  %v5395_v50 = vld [vmem:[#allocation5 + $0x16c] ss:$16 sps:$4 sm:$0xff]   ;;  %vm587_vm0 = vcmask 1043456  }
  0x46   :  { %v5393_v49 = vld [vmem:[#allocation5 + $0x164] ss:$16 sps:$4 sm:$0xff]   ;;  %v181_v51 = vcombine.high %v115_v48, %v115_v48  ;;  %v5397_v53 = vld [vmem:[#allocation5 + $0x160] ss:$16 sps:$4 sm:$0xff]   ;;  %v5398_v54 = vld [vmem:[#allocation5 + $0x168] ss:$16 sps:$4 sm:$0xff]   ;;  %v183_v3 = vpack.c.bf16 %v115_v48, %v115_v48 }
  0x47   :  { %514 = vmatpush1.bf16.msra.mxu0 %v5349_v18  ;;  %555 = vmatpush1.bf16.msra.mxu1 %v5350_v19  ;;  %v5399_v55 = vld [vmem:[#allocation5 + $0x144] ss:$16 sps:$4 sm:$0xff]   ;;  %v5401_v56 = vld [vmem:[#allocation5 + $0x14c] ss:$16 sps:$4 sm:$0xff]   ;;  %v5403_v57 = vld [vmem:[#allocation5 + $0x140] ss:$16 sps:$4 sm:$0xff]  }
  0x48   :  { %515 = vmatprep.subr.bf16.mxu0 %v5351_v20  ;;  %556 = vmatprep.subr.bf16.mxu1 %v5353_v21  ;;  %v184_v52 = vpack.c.bf16 %v181_v51, %v181_v51  ;;  %v5404_v58 = vld [vmem:[#allocation5 + $0x148] ss:$16 sps:$4 sm:$0xff]   ;;  %v5405_v59 = vld [vmem:[#allocation5 + $0x124] ss:$16 sps:$4 sm:$0xff]   ;;  %v5407_v60 = vld [vmem:[#allocation5 + $0x12c] ss:$16 sps:$4 sm:$0xff]  }
  0x49   :  { %v5409_v61 = vld [vmem:[#allocation5 + $0x120] ss:$16 sps:$4 sm:$0xff]   ;;  %v5410_v62 = vld [vmem:[#allocation5 + $0x128] ss:$16 sps:$4 sm:$0xff]   ;;  %v5411_v63 = vld [vmem:[#allocation5 + $0x104] ss:$16 sps:$4 sm:$0xff]  }
  0x4a   :  { %537 = vmatprep.mubr.bf16.mxu0 %v184_v52  ;;  %578 = vmatprep.mubr.bf16.mxu1 %v184_v52  ;;  %v5413_v0 = vld [vmem:[#allocation5 + $0x10c] ss:$16 sps:$4 sm:$0xff]   ;;  %v5415_v1 = vld [vmem:[#allocation5 + $0x100] ss:$16 sps:$4 sm:$0xff]   ;;  %v5416_v2 = vld [vmem:[#allocation5 + $0x108] ss:$16 sps:$4 sm:$0xff]  }
  0x4b   :  { %516 = vmatpush1.bf16.msra.mxu0 %v5355_v22  ;;  %557 = vmatpush1.bf16.msra.mxu1 %v5356_v23  ;;  %v5420_v4 = vld [vmem:[#allocation8 + $0xe4] ss:$16 sps:$4 sm:$0xff]   ;;  %v5418_v6 = vld [vmem:[#allocation8 + $0xe0] ss:$16 sps:$4 sm:$0xff]   ;;  %vm6266_vm1 = vmmov 0   ;;  %s6268_s13 = smov [#allocation3]  }
  0x4c   :  { %517 = vmatprep.subr.bf16.mxu0 %v5357_v24  ;;  %558 = vmatprep.subr.bf16.mxu1 %v5359_v25  ;;  %v5423_v5 = vld [vmem:[#allocation8 + $0x2e4] ss:$16 sps:$4 sm:$0xff]   ;;  %v5421_v7 = vld [vmem:[#allocation8 + $0x2e0] ss:$16 sps:$4 sm:$0xff]   ;;  %s107_s14 = sshll.u32 %s6268_s13, 4  ;;  %s108_s14 = int_to_ptr.vmem [resolvable:$true] %s107_s14 }
  0x4d   :  { %v5426_v8 = vld [vmem:[#allocation8 + $0xc4] ss:$16 sps:$4 sm:$0xff]   ;;  %v5424_v10 = vld [vmem:[#allocation8 + $0xc0] ss:$16 sps:$4 sm:$0xff]  }
  0x4e   :  { %v5429_v9 = vld [vmem:[#allocation8 + $0x2c4] ss:$16 sps:$4 sm:$0xff]   ;;  %v5427_v11 = vld [vmem:[#allocation8 + $0x2c0] ss:$16 sps:$4 sm:$0xff]  }
  0x4f   :  { %518 = vmatpush1.bf16.msra.mxu0 %v5361_v26  ;;  %559 = vmatpush1.bf16.msra.mxu1 %v5362_v27  ;;  %v5432_v12 = vld [vmem:[#allocation8 + $0xa4] ss:$16 sps:$4 sm:$0xff]   ;;  %v5430_v14 = vld [vmem:[#allocation8 + $0xa0] ss:$16 sps:$4 sm:$0xff]  }
  0x50   :  { %519 = vmatprep.subr.bf16.mxu0 %v5363_v28  ;;  %560 = vmatprep.subr.bf16.mxu1 %v5365_v29  ;;  %v5435_v13 = vld [vmem:[#allocation8 + $0x2a4] ss:$16 sps:$4 sm:$0xff]   ;;  %v5433_v15 = vld [vmem:[#allocation8 + $0x2a0] ss:$16 sps:$4 sm:$0xff]  }
  0x51   :  { %v5438_v16 = vld [vmem:[#allocation8 + $0x84] ss:$16 sps:$4 sm:$0xff]   ;;  %v5436_v18 = vld [vmem:[#allocation8 + $0x80] ss:$16 sps:$4 sm:$0xff]  }
  0x52   :  { %v5441_v17 = vld [vmem:[#allocation8 + $0x284] ss:$16 sps:$4 sm:$0xff]   ;;  %v5439_v19 = vld [vmem:[#allocation8 + $0x280] ss:$16 sps:$4 sm:$0xff]  }
  0x53   :  { %520 = vmatpush1.bf16.msra.mxu0 %v5367_v30  ;;  %561 = vmatpush1.bf16.msra.mxu1 %v5368_v31  ;;  %v5444_v20 = vld [vmem:[#allocation8 + $0x64] ss:$16 sps:$4 sm:$0xff]   ;;  %v5442_v22 = vld [vmem:[#allocation8 + $0x60] ss:$16 sps:$4 sm:$0xff]  }
  0x54   :  { %521 = vmatprep.subr.bf16.mxu0 %v5369_v32  ;;  %562 = vmatprep.subr.bf16.mxu1 %v5371_v33  ;;  %v5447_v21 = vld [vmem:[#allocation8 + $0x264] ss:$16 sps:$4 sm:$0xff]   ;;  %v5445_v23 = vld [vmem:[#allocation8 + $0x260] ss:$16 sps:$4 sm:$0xff]  }
  0x55   :  { %v5450_v24 = vld [vmem:[#allocation8 + $0x44] ss:$16 sps:$4 sm:$0xff]   ;;  %v5448_v26 = vld [vmem:[#allocation8 + $0x40] ss:$16 sps:$4 sm:$0xff]  }
  0x56   :  { %v5453_v25 = vld [vmem:[#allocation8 + $0x244] ss:$16 sps:$4 sm:$0xff]   ;;  %v5451_v27 = vld [vmem:[#allocation8 + $0x240] ss:$16 sps:$4 sm:$0xff]  }
  0x57   :  { %522 = vmatpush2.bf16.msra.mxu0 %v5373_v34  ;;  %563 = vmatpush2.bf16.msra.mxu1 %v5374_v35  ;;  %v5456_v28 = vld [vmem:[#allocation8 + $0x24] ss:$16 sps:$4 sm:$0xff]   ;;  %v5454_v30 = vld [vmem:[#allocation8 + $0x20] ss:$16 sps:$4 sm:$0xff]  }
  0x58   :  { %523 = vmatprep.subr.bf16.mxu0 %v5375_v36  ;;  %564 = vmatprep.subr.bf16.mxu1 %v5377_v37  ;;  %v5459_v29 = vld [vmem:[#allocation8 + $0x224] ss:$16 sps:$4 sm:$0xff]   ;;  %v5457_v31 = vld [vmem:[#allocation8 + $0x220] ss:$16 sps:$4 sm:$0xff]  }
  0x59   :  { %v5462_v32 = vld [vmem:[#allocation8 + $0x4] ss:$16 sps:$4 sm:$0xff]   ;;  %v5460_v34 = vld [vmem:[#allocation8] ss:$16 sps:$4 sm:$0xff]  }
  0x5a   :  { %v5465_v33 = vld [vmem:[#allocation8 + $0x204] ss:$16 sps:$4 sm:$0xff]   ;;  %v5463_v35 = vld [vmem:[#allocation8 + $0x200] ss:$16 sps:$4 sm:$0xff]  }
  0x5b   :  { %524 = vmatpush2.bf16.msra.mxu0 %v5379_v38  ;;  %565 = vmatpush2.bf16.msra.mxu1 %v5380_v39  ;;  %v5468_v36 = vld [vmem:[#allocation8 + $0x1e4] ss:$16 sps:$4 sm:$0xff]   ;;  %v5466_v38 = vld [vmem:[#allocation8 + $0x1e0] ss:$16 sps:$4 sm:$0xff]  }
  0x5c   :  { %525 = vmatprep.subr.bf16.mxu0 %v5381_v40  ;;  %566 = vmatprep.subr.bf16.mxu1 %v5383_v41  ;;  %v5471_v37 = vld [vmem:[#allocation8 + $0x3e4] ss:$16 sps:$4 sm:$0xff]   ;;  %v5469_v39 = vld [vmem:[#allocation8 + $0x3e0] ss:$16 sps:$4 sm:$0xff]  }
  0x5d   :  { %v5474_v40 = vld [vmem:[#allocation8 + $0x1c4] ss:$16 sps:$4 sm:$0xff]   ;;  %v5487_v51 = vld [vmem:[#allocation8 + $0x380] ss:$16 sps:$4 sm:$0xff]  }
  0x5e   :  { %v5477_v41 = vld [vmem:[#allocation8 + $0x3c4] ss:$16 sps:$4 sm:$0xff]  }
  0x5f   :  { %526 = vmatpush2.bf16.msra.mxu0 %v5385_v42  ;;  %567 = vmatpush2.bf16.msra.mxu1 %v5386_v43  ;;  %v5472_v42 = vld [vmem:[#allocation8 + $0x1c0] ss:$16 sps:$4 sm:$0xff]   ;;  %v5486_v48 = vld [vmem:[#allocation8 + $0x184] ss:$16 sps:$4 sm:$0xff]  }
  0x60   :  { %527 = vmatprep.subr.bf16.mxu0 %v5387_v44  ;;  %568 = vmatprep.subr.bf16.mxu1 %v5389_v45  ;;  %v5475_v43 = vld [vmem:[#allocation8 + $0x3c0] ss:$16 sps:$4 sm:$0xff]   ;;  %v5480_v44 = vld [vmem:[#allocation8 + $0x1a4] ss:$16 sps:$4 sm:$0xff]  }
  0x61   :  { %v5483_v45 = vld [vmem:[#allocation8 + $0x3a4] ss:$16 sps:$4 sm:$0xff]  }
  0x62   :  { %v5492_v52 = vld [vmem:[#allocation8 + $0x164] ss:$16 sps:$4 sm:$0xff]  }
  0x63   :  { %528 = vmatpush2.bf16.msra.mxu0 %v5391_v46  ;;  %569 = vmatpush2.bf16.msra.mxu1 %v5392_v47  ;;  %v5478_v46 = vld [vmem:[#allocation8 + $0x1a0] ss:$16 sps:$4 sm:$0xff]  }
  0x64   :  { %529 = vmatprep.subr.bf16.mxu0 %v5393_v49  ;;  %570 = vmatprep.subr.bf16.mxu1 %v5395_v50  ;;  %v5481_v47 = vld [vmem:[#allocation8 + $0x3a0] ss:$16 sps:$4 sm:$0xff]   ;;  %v5489_v49 = vld [vmem:[#allocation8 + $0x384] ss:$16 sps:$4 sm:$0xff]  }
  0x65   :  { %v5484_v50 = vld [vmem:[#allocation8 + $0x180] ss:$16 sps:$4 sm:$0xff]  }
  0x67   :  { %530 = vmatpush2.bf16.msra.mxu0 %v5397_v53  ;;  %571 = vmatpush2.bf16.msra.mxu1 %v5398_v54  ;;  %v5495_v53 = vld [vmem:[#allocation8 + $0x364] ss:$16 sps:$4 sm:$0xff]   ;;  %v5490_v54 = vld [vmem:[#allocation8 + $0x160] ss:$16 sps:$4 sm:$0xff]  }
  0x68   :  { %531 = vmatprep.subr.bf16.mxu0 %v5399_v55  ;;  %572 = vmatprep.subr.bf16.mxu1 %v5401_v56  ;;  %v5493_v55 = vld [vmem:[#allocation8 + $0x360] ss:$16 sps:$4 sm:$0xff]   ;;  %v5498_v56 = vld [vmem:[#allocation8 + $0x144] ss:$16 sps:$4 sm:$0xff]  }
  0x6b   :  { %532 = vmatpush2.bf16.msra.mxu0 %v5403_v57  ;;  %573 = vmatpush2.bf16.msra.mxu1 %v5404_v58  ;;  %v5501_v57 = vld [vmem:[#allocation8 + $0x344] ss:$16 sps:$4 sm:$0xff]   ;;  %v5496_v58 = vld [vmem:[#allocation8 + $0x140] ss:$16 sps:$4 sm:$0xff]  }
  0x6c   :  { %533 = vmatprep.subr.bf16.mxu0 %v5405_v59  ;;  %574 = vmatprep.subr.bf16.mxu1 %v5407_v60  ;;  %v5499_v59 = vld [vmem:[#allocation8 + $0x340] ss:$16 sps:$4 sm:$0xff]   ;;  %v5504_v60 = vld [vmem:[#allocation8 + $0x124] ss:$16 sps:$4 sm:$0xff]  }
  0x6f   :  { %534 = vmatpush2.bf16.msra.mxu0 %v5409_v61  ;;  %575 = vmatpush2.bf16.msra.mxu1 %v5410_v62  ;;  %v5507_v61 = vld [vmem:[#allocation8 + $0x324] ss:$16 sps:$4 sm:$0xff]   ;;  %v5502_v62 = vld [vmem:[#allocation8 + $0x120] ss:$16 sps:$4 sm:$0xff]  }
  0x70   :  { %535 = vmatprep.subr.bf16.mxu0 %v5411_v63  ;;  %576 = vmatprep.subr.bf16.mxu1 %v5413_v0  ;;  %v5505_v63 = vld [vmem:[#allocation8 + $0x320] ss:$16 sps:$4 sm:$0xff]   ;;  %v5510_v0 = vld [vmem:[#allocation8 + $0x104] ss:$16 sps:$4 sm:$0xff]  }
  0x73   :  { %536 = vmatpush2.bf16.msra.mxu0 %v5415_v1  ;;  %577 = vmatpush2.bf16.msra.mxu1 %v5416_v2  ;;  %v5513_v1 = vld [vmem:[#allocation8 + $0x304] ss:$16 sps:$4 sm:$0xff]   ;;  %v5508_v2 = vld [vmem:[#allocation8 + $0x100] ss:$16 sps:$4 sm:$0xff]  }
  0x74   :  { %1509 = vmatprep.subr.bf16.mxu0 %v5420_v4  ;;  %1550 = vmatprep.subr.bf16.mxu1 %v5423_v5  ;;  %v5516_v4 = vld [vmem:[#allocation8 + $0xec] ss:$16 sps:$4 sm:$0xff]  }
  0x75   :  { %v5519_v5 = vld [vmem:[#allocation8 + $0x2ec] ss:$16 sps:$4 sm:$0xff]  }
  0x76   :  { %538 = vmatmul.mubr.bf16.vlgmr.msra.gmra.mxu0 %v183_v3  ;;  %579 = vmatmul.mubr.bf16.vlgmr.msra.gmra.mxu1 %v183_v3  ;;  %v5511_v3 = vld [vmem:[#allocation8 + $0x300] ss:$16 sps:$4 sm:$0xff]  }
  0x77   :  { %1510 = vmatpush1.bf16.msra.mxu0 %v5418_v6  ;;  %1551 = vmatpush1.bf16.msra.mxu1 %v5421_v7 }
  0x78   :  { %1511 = vmatprep.subr.bf16.mxu0 %v5426_v8  ;;  %1552 = vmatprep.subr.bf16.mxu1 %v5429_v9 }
  0x7b   :  { %1512 = vmatpush1.bf16.msra.mxu0 %v5424_v10  ;;  %1553 = vmatpush1.bf16.msra.mxu1 %v5427_v11 }
  0x7c   :  { %1513 = vmatprep.subr.bf16.mxu0 %v5432_v12  ;;  %1554 = vmatprep.subr.bf16.mxu1 %v5435_v13 }
  0x7f   :  { %1514 = vmatpush1.bf16.msra.mxu0 %v5430_v14  ;;  %1555 = vmatpush1.bf16.msra.mxu1 %v5433_v15 }
  0x80   :  { %1515 = vmatprep.subr.bf16.mxu0 %v5438_v16  ;;  %1556 = vmatprep.subr.bf16.mxu1 %v5441_v17 }
  0x83   :  { %1516 = vmatpush1.bf16.msra.mxu0 %v5436_v18  ;;  %1557 = vmatpush1.bf16.msra.mxu1 %v5439_v19 }
  0x84   :  { %1517 = vmatprep.subr.bf16.mxu0 %v5444_v20  ;;  %1558 = vmatprep.subr.bf16.mxu1 %v5447_v21 }
  0x87   :  { %1518 = vmatpush1.bf16.msra.mxu0 %v5442_v22  ;;  %1559 = vmatpush1.bf16.msra.mxu1 %v5445_v23 }
  0x88   :  { %1519 = vmatprep.subr.bf16.mxu0 %v5450_v24  ;;  %1560 = vmatprep.subr.bf16.mxu1 %v5453_v25 }
  0x8b   :  { %1520 = vmatpush1.bf16.msra.mxu0 %v5448_v26  ;;  %1561 = vmatpush1.bf16.msra.mxu1 %v5451_v27 }
  0x8c   :  { %1521 = vmatprep.subr.bf16.mxu0 %v5456_v28  ;;  %1562 = vmatprep.subr.bf16.mxu1 %v5459_v29 }
  0x8f   :  { %1522 = vmatpush1.bf16.msra.mxu0 %v5454_v30  ;;  %1563 = vmatpush1.bf16.msra.mxu1 %v5457_v31 }
  0x90   :  { %1523 = vmatprep.subr.bf16.mxu0 %v5462_v32  ;;  %1564 = vmatprep.subr.bf16.mxu1 %v5465_v33 }
  0x93   :  { %1524 = vmatpush1.bf16.msra.mxu0 %v5460_v34  ;;  %1565 = vmatpush1.bf16.msra.mxu1 %v5463_v35 }
  0x94   :  { %1525 = vmatprep.subr.bf16.mxu0 %v5468_v36  ;;  %1566 = vmatprep.subr.bf16.mxu1 %v5471_v37 }
  0x97   :  { %1526 = vmatpush2.bf16.msra.mxu0 %v5466_v38  ;;  %1567 = vmatpush2.bf16.msra.mxu1 %v5469_v39 }
  0x98   :  { %1527 = vmatprep.subr.bf16.mxu0 %v5474_v40  ;;  %1568 = vmatprep.subr.bf16.mxu1 %v5477_v41 }
  0x9b   :  { %1528 = vmatpush2.bf16.msra.mxu0 %v5472_v42  ;;  %1569 = vmatpush2.bf16.msra.mxu1 %v5475_v43 }
  0x9c   :  { %1529 = vmatprep.subr.bf16.mxu0 %v5480_v44  ;;  %1570 = vmatprep.subr.bf16.mxu1 %v5483_v45 }
  0x9f   :  { %1530 = vmatpush2.bf16.msra.mxu0 %v5478_v46  ;;  %1571 = vmatpush2.bf16.msra.mxu1 %v5481_v47 }
  0xa0   :  { %1531 = vmatprep.subr.bf16.mxu0 %v5486_v48  ;;  %1572 = vmatprep.subr.bf16.mxu1 %v5489_v49 }
  0xa3   :  { %1532 = vmatpush2.bf16.msra.mxu0 %v5484_v50  ;;  %1573 = vmatpush2.bf16.msra.mxu1 %v5487_v51 }
  0xa4   :  { %1533 = vmatprep.subr.bf16.mxu0 %v5492_v52  ;;  %1574 = vmatprep.subr.bf16.mxu1 %v5495_v53 }
  0xa7   :  { %1534 = vmatpush2.bf16.msra.mxu0 %v5490_v54  ;;  %1575 = vmatpush2.bf16.msra.mxu1 %v5493_v55 }
  0xa8   :  { %1535 = vmatprep.subr.bf16.mxu0 %v5498_v56  ;;  %1576 = vmatprep.subr.bf16.mxu1 %v5501_v57 }
  0xab   :  { %1536 = vmatpush2.bf16.msra.mxu0 %v5496_v58  ;;  %1577 = vmatpush2.bf16.msra.mxu1 %v5499_v59 }
  0xac   :  { %1537 = vmatprep.subr.bf16.mxu0 %v5504_v60  ;;  %1578 = vmatprep.subr.bf16.mxu1 %v5507_v61 }
  0xaf   :  { %1538 = vmatpush2.bf16.msra.mxu0 %v5502_v62  ;;  %1579 = vmatpush2.bf16.msra.mxu1 %v5505_v63 }
  0xb0   :  { %1539 = vmatprep.subr.bf16.mxu0 %v5510_v0  ;;  %1580 = vmatprep.subr.bf16.mxu1 %v5513_v1 }
  0xb3   :  { %1540 = vmatpush2.bf16.msra.mxu0 %v5508_v2  ;;  %1581 = vmatpush2.bf16.msra.mxu1 %v5511_v3 }
  0xb4   :  { %1591 = vmatprep.subr.bf16.mxu0 %v5516_v4  ;;  %1632 = vmatprep.subr.bf16.mxu1 %v5519_v5 }
 0x136   :  { %v6345_v6 = vpop.f32.mrf.mxu0  ;;  %v6347_v7 = vpop.f32.mrf.mxu1 }
 0x137   :  { %v588_v8 = vsel %vm587_vm0, %v6345_v6, 0.0  ;;  %v602_v9 = vsel %vm587_vm0, %v6347_v7, 0.0 }
 0x138   :  { %v589_v10 = vrot.slane %v588_v8, 4  ;;  %v603_v11 = vrot.slane %v602_v9, 4  ;;  %v6353_v12 = vpop.f32.mrf.mxu0  ;;  %v6355_v13 = vpop.f32.mrf.mxu1 }
 0x139   :  { %v595_v14 = vsel %vm587_vm0, %v6353_v12, 0.0  ;;  %v609_v15 = vsel %vm587_vm0, %v6355_v13, 0.0 }
 0x13a   :  { %v590_v16 = vadd.f32 %v589_v10, %v588_v8  ;;  %v604_v17 = vadd.f32 %v603_v11, %v602_v9  ;;  %v596_v18 = vrot.slane %v595_v14, 4  ;;  %v610_v19 = vrot.slane %v609_v15, 4  ;;  %v543_v20 = vpop.f32.mrf.mxu0  ;;  %v584_v21 = vpop.f32.mrf.mxu1 }
 0x13c   :  { %v591_v22 = vrot.slane %v590_v16, 2  ;;  %v605_v23 = vrot.slane %v604_v17, 2  ;;  %v597_v24 = vadd.f32 %v596_v18, %v595_v14  ;;  %v611_v25 = vadd.f32 %v610_v19, %v609_v15  ;;  %v544_v26 = vpop.f32.mrf.mxu0  ;;  %v585_v27 = vpop.f32.mrf.mxu1 }
 0x13e   :  { %v592_v28 = vadd.f32 %v591_v22, %v590_v16  ;;  %v606_v29 = vadd.f32 %v605_v23, %v604_v17  ;;  %v598_v30 = vrot.slane %v597_v24, 2  ;;  %v612_v31 = vrot.slane %v611_v25, 2 }
 0x140   :  { %v593_v32 = vrot.slane %v592_v28, 1  ;;  %v607_v33 = vrot.slane %v606_v29, 1  ;;  %v599_v34 = vadd.f32 %v598_v30, %v597_v24  ;;  %v613_v35 = vadd.f32 %v612_v31, %v611_v25 }
 0x141   :  { %v693_v30 = vlaneseq }
 0x142   :  { %v594_v36 = vadd.f32 %v593_v32, %v592_v28  ;;  %v608_v37 = vadd.f32 %v607_v33, %v606_v29  ;;  %v600_v38 = vrot.slane %v599_v34, 1  ;;  %v614_v39 = vrot.slane %v613_v35, 1  ;;  %v6386_v32 = vld [vmem:[%s6764_s2] sm:$0xff]  ;;  %v6391_v33 = vld [vmem:[%s6764_s2 + $0x10] sm:$0xff] }
 0x143   :  { %v6381_v31 = vshrl.u32 %v693_v30, 7  ;;  %v5532_v30 = vld [vmem:[#allocation8 + $0x88] ss:$16 sps:$4 sm:$0xff]  }
 0x144   :  { %v6361_v40 = vmul.f32 0.25, %v594_v36  ;;  %v6363_v41 = vmul.f32 0.25, %v608_v37  ;;  %v601_v42 = vadd.f32 %v600_v38, %v599_v34  ;;  %v615_v43 = vadd.f32 %v614_v39, %v613_v35  ;;  %v6396_v35 = vld [vmem:[%s6764_s2 + $0x8] sm:$0xff]  ;;  %v6403_v39 = vld [vmem:[%s6764_s2 + $0x18] sm:$0xff] }
 0x145   :  { %v695_v38 = vsub.s32 0, %v6381_v31 }
 0x146   :  { %v621_v44 = vsub.f32 %v6345_v6, %v6361_v40  ;;  %v623_v45 = vsub.f32 %v6347_v7, %v6363_v41  ;;  %v6369_v46 = vmul.f32 0.25, %v601_v42  ;;  %v6371_v47 = vmul.f32 0.25, %v615_v43 }
 0x148   :  { %v625_v48 = vmul.f32 %v621_v44, %v621_v44  ;;  %v627_v49 = vmul.f32 %v623_v45, %v623_v45  ;;  %v622_v50 = vsub.f32 %v6353_v12, %v6369_v46  ;;  %v624_v51 = vsub.f32 %v6355_v13, %v6371_v47 }
 0x14a   :  { %v629_v52 = vsel %vm587_vm0, %v625_v48, 0.0  ;;  %v643_v53 = vsel %vm587_vm0, %v627_v49, 0.0  ;;  %v626_v54 = vmul.f32 %v622_v50, %v622_v50  ;;  %v628_v55 = vmul.f32 %v624_v51, %v624_v51 }
 0x14b   :  { %v630_v56 = vrot.slane %v629_v52, 4  ;;  %v644_v57 = vrot.slane %v643_v53, 4 }
 0x14c   :  { %v636_v58 = vsel %vm587_vm0, %v626_v54, 0.0  ;;  %v650_v59 = vsel %vm587_vm0, %v628_v55, 0.0 }
 0x14d   :  { %v631_v60 = vadd.f32 %v630_v56, %v629_v52  ;;  %v645_v61 = vadd.f32 %v644_v57, %v643_v53  ;;  %v637_v62 = vrot.slane %v636_v58, 4  ;;  %v651_v63 = vrot.slane %v650_v59, 4 }
 0x14e   :  { %v715_v53 = vsub.s32 1, %v6381_v31 }
 0x14f   :  { %v632_v0 = vrot.slane %v631_v60, 2  ;;  %v646_v1 = vrot.slane %v645_v61, 2  ;;  %v638_v2 = vadd.f32 %v637_v62, %v636_v58  ;;  %v652_v3 = vadd.f32 %v651_v63, %v650_v59 }
 0x151   :  { %v633_v4 = vadd.f32 %v632_v0, %v631_v60  ;;  %v647_v5 = vadd.f32 %v646_v1, %v645_v61  ;;  %v639_v8 = vrot.slane %v638_v2, 2  ;;  %v653_v9 = vrot.slane %v652_v3, 2 }
 0x153   :  { %v634_v10 = vrot.slane %v633_v4, 1  ;;  %v648_v11 = vrot.slane %v647_v5, 1  ;;  %v640_v14 = vadd.f32 %v639_v8, %v638_v2  ;;  %v654_v15 = vadd.f32 %v653_v9, %v652_v3 }
 0x155   :  { %v635_v16 = vadd.f32 %v634_v10, %v633_v4  ;;  %v649_v17 = vadd.f32 %v648_v11, %v647_v5  ;;  %v641_v18 = vrot.slane %v640_v14, 1  ;;  %v655_v19 = vrot.slane %v654_v15, 1 }
 0x157   :  { %v657_v20 = vmul.f32 0.25, %v635_v16  ;;  %v659_v21 = vmul.f32 0.25, %v649_v17  ;;  %v642_v22 = vadd.f32 %v641_v18, %v640_v14  ;;  %v656_v23 = vadd.f32 %v655_v19, %v654_v15  ;;  %v5514_v18 = vld [vmem:[#allocation8 + $0xe8] ss:$16 sps:$4 sm:$0xff]  }
 0x159   :  { %v661_v24 = vadd.f32 1e-05, %v657_v20  ;;  %v663_v25 = vadd.f32 1e-05, %v659_v21  ;;  %v658_v26 = vmul.f32 0.25, %v642_v22  ;;  %v660_v27 = vmul.f32 0.25, %v656_v23 }
 0x15a   :  { %v5517_v20 = vld [vmem:[#allocation8 + $0x2e8] ss:$16 sps:$4 sm:$0xff]  }
 0x15b   :  { %5762 = vrsqrt.f32 %v661_v24  ;;  %v662_v28 = vadd.f32 1e-05, %v658_v26  ;;  %v664_v29 = vadd.f32 1e-05, %v660_v27  ;;  %v5520_v22 = vld [vmem:[#allocation8 + $0xc8] ss:$16 sps:$4 sm:$0xff]  }
 0x15c   :  { %5764 = vrsqrt.f32 %v663_v25  ;;  %v5523_v23 = vld [vmem:[#allocation8 + $0x2c8] ss:$16 sps:$4 sm:$0xff]   ;;  %v5528_v24 = vld [vmem:[#allocation8 + $0xac] ss:$16 sps:$4 sm:$0xff]  }
 0x15d   :  { %5766 = vrsqrt.f32 %v662_v28  ;;  %v5531_v25 = vld [vmem:[#allocation8 + $0x2ac] ss:$16 sps:$4 sm:$0xff]   ;;  %v5526_v26 = vld [vmem:[#allocation8 + $0xa8] ss:$16 sps:$4 sm:$0xff]  }
 0x15e   :  { %5768 = vrsqrt.f32 %v664_v29  ;;  %v5529_v27 = vld [vmem:[#allocation8 + $0x2a8] ss:$16 sps:$4 sm:$0xff]   ;;  %v5534_v28 = vld [vmem:[#allocation8 + $0x8c] ss:$16 sps:$4 sm:$0xff]  }
 0x15f   :  { %v5537_v29 = vld [vmem:[#allocation8 + $0x28c] ss:$16 sps:$4 sm:$0xff]  }
 0x168   :  { %v5763_v34 = vpop.eup %5762 }
 0x169   :  { %v5765_v36 = vpop.eup %5764  ;;  %v669_v37 = vmul.f32 %v5763_v34, %v6386_v32  ;;  %v5535_v34 = vld [vmem:[#allocation8 + $0x288] ss:$16 sps:$4 sm:$0xff]  }
 0x16a   :  { %v5767_v42 = vpop.eup %5766  ;;  %v671_v43 = vmul.f32 %v5765_v36, %v6391_v33  ;;  %v5540_v36 = vld [vmem:[#allocation8 + $0x6c] ss:$16 sps:$4 sm:$0xff]  }
 0x16b   :  { %v5769_v44 = vpop.eup %5768  ;;  %v673_v45 = vmul.f32 %v669_v37, %v6361_v40  ;;  %v670_v48 = vmul.f32 %v5767_v42, %v6396_v35  ;;  %v696_v52 = vrot.slane %v669_v37, %v695_v38  ;;  %v5543_v37 = vld [vmem:[#allocation8 + $0x26c] ss:$16 sps:$4 sm:$0xff]   ;;  %v5541_v42 = vld [vmem:[#allocation8 + $0x268] ss:$16 sps:$4 sm:$0xff]  }
 0x16c   :  { %v675_v49 = vmul.f32 %v671_v43, %v6363_v41  ;;  %v672_v50 = vmul.f32 %v5769_v44, %v6403_v39  ;;  %v704_v56 = vrot.slane %v671_v43, %v695_v38  ;;  %v5546_v43 = vld [vmem:[#allocation8 + $0x4c] ss:$16 sps:$4 sm:$0xff]  }
 0x16d   :  { %v681_v51 = vrot.slane %v673_v45, 7  ;;  %v674_v54 = vmul.f32 %v670_v48, %v6369_v46  ;;  %v700_v40 = vrot.slane %v670_v48, %v695_v38  ;;  %v709_v62 = vmul.f32 %v696_v52, %v6345_v6  ;;  %v5549_v44 = vld [vmem:[#allocation8 + $0x24c] ss:$16 sps:$4 sm:$0xff]   ;;  %v5544_v45 = vld [vmem:[#allocation8 + $0x48] ss:$16 sps:$4 sm:$0xff]  }
 0x16e   :  { %v683_v55 = vrot.slane %v675_v49, 7  ;;  %v676_v57 = vmul.f32 %v672_v50, %v6371_v47  ;;  %v708_v41 = vrot.slane %v672_v50, %v695_v38  ;;  %v711_v1 = vmul.f32 %v704_v56, %v6347_v7  ;;  %v5538_v38 = vld [vmem:[#allocation8 + $0x68] ss:$16 sps:$4 sm:$0xff]   ;;  %v5552_v49 = vld [vmem:[#allocation8 + $0x2c] ss:$16 sps:$4 sm:$0xff]  }
 0x16f   :  { %v689_v58 = vsub.f32 %v6386_v32, %v681_v51  ;;  %v682_v59 = vrot.slane %v674_v54, 7  ;;  %v710_v47 = vmul.f32 %v700_v40, %v6353_v12  ;;  %v5522_v12 = vld [vmem:[#allocation8 + $0xcc] ss:$16 sps:$4 sm:$0xff]   ;;  %v5547_v48 = vld [vmem:[#allocation8 + $0x248] ss:$16 sps:$4 sm:$0xff]  }
 0x170   :  { %v691_v60 = vsub.f32 %v6391_v33, %v683_v55  ;;  %v684_v61 = vrot.slane %v676_v57, 7  ;;  %v712_v8 = vmul.f32 %v708_v41, %v6355_v13  ;;  %v5525_v13 = vld [vmem:[#allocation8 + $0x2cc] ss:$16 sps:$4 sm:$0xff]   ;;  %v5550_v51 = vld [vmem:[#allocation8 + $0x28] ss:$16 sps:$4 sm:$0xff]  }
 0x171   :  { %v716_v63 = vrot.slane %v689_v58, %v715_v53  ;;  %v690_v0 = vsub.f32 %v6396_v35, %v682_v59  ;;  %v5555_v50 = vld [vmem:[#allocation8 + $0x22c] ss:$16 sps:$4 sm:$0xff]   ;;  %v5553_v52 = vld [vmem:[#allocation8 + $0x228] ss:$16 sps:$4 sm:$0xff]  }
 0x172   :  { %v724_v46 = vrot.slane %v691_v60, %v715_v53  ;;  %v692_v2 = vsub.f32 %v6403_v39, %v684_v61  ;;  %v5561_v54 = vld [vmem:[#allocation8 + $0x20c] ss:$16 sps:$4 sm:$0xff]   ;;  %v5556_v55 = vld [vmem:[#allocation8 + $0x8] ss:$16 sps:$4 sm:$0xff]  }
 0x173   :  { %v729_v3 = vadd.f32 %v716_v63, %v709_v62  ;;  %v720_v4 = vrot.slane %v690_v0, %v715_v53  ;;  %v5559_v56 = vld [vmem:[#allocation8 + $0x208] ss:$16 sps:$4 sm:$0xff]   ;;  %v5564_v57 = vld [vmem:[#allocation8 + $0x1ec] ss:$16 sps:$4 sm:$0xff]  }
 0x174   :  { %v731_v5 = vadd.f32 %v724_v46, %v711_v1  ;;  %v728_v9 = vrot.slane %v692_v2, %v715_v53  ;;  %v5558_v53 = vld [vmem:[#allocation8 + $0xc] ss:$16 sps:$4 sm:$0xff]   ;;  %v5562_v59 = vld [vmem:[#allocation8 + $0x1e8] ss:$16 sps:$4 sm:$0xff]  }
 0x175   :  { %v730_v10 = vadd.f32 %v720_v4, %v710_v47  ;;  %v733_v11 = vmax.f32 %v729_v3, 0.0  ;;  %v5567_v58 = vld [vmem:[#allocation8 + $0x3ec] ss:$16 sps:$4 sm:$0xff]   ;;  %v5565_v40 = vld [vmem:[#allocation8 + $0x3e8] ss:$16 sps:$4 sm:$0xff]  }
 0x176   :  { %v732_v14 = vadd.f32 %v728_v9, %v712_v8  ;;  %v735_v6 = vmax.f32 %v731_v5, 0.0  ;;  %v5570_v60 = vld [vmem:[#allocation8 + $0x1cc] ss:$16 sps:$4 sm:$0xff]   ;;  %v5568_v41 = vld [vmem:[#allocation8 + $0x1c8] ss:$16 sps:$4 sm:$0xff]  }
 0x177   :  { %v734_v15 = vmax.f32 %v730_v10, 0.0  ;;  %v6421_v7 = vpack.c.bf16 %v733_v11, %v733_v11  ;;  %v5573_v61 = vld [vmem:[#allocation8 + $0x3cc] ss:$16 sps:$4 sm:$0xff]   ;;  %v5571_v62 = vld [vmem:[#allocation8 + $0x3c8] ss:$16 sps:$4 sm:$0xff]  }
 0x178   :  { %v736_v16 = vmax.f32 %v732_v14, 0.0  ;;  %v6423_v21 = vpack.c.bf16 %v735_v6, %v735_v6  ;;  %v5576_v63 = vld [vmem:[#allocation8 + $0x1ac] ss:$16 sps:$4 sm:$0xff]   ;;  %v5574_v1 = vld [vmem:[#allocation8 + $0x1a8] ss:$16 sps:$4 sm:$0xff]  }
 0x179   :  { %v866_v17 = vpack.c.bf16 %v734_v15, %v734_v15  ;;  %v5579_v0 = vld [vmem:[#allocation8 + $0x3ac] ss:$16 sps:$4 sm:$0xff]   ;;  %v5577_v46 = vld [vmem:[#allocation8 + $0x3a8] ss:$16 sps:$4 sm:$0xff]  }
 0x17a   :  { %v868_v19 = vpack.c.bf16 %v736_v16, %v736_v16  ;;  %v5582_v2 = vld [vmem:[#allocation8 + $0x18c] ss:$16 sps:$4 sm:$0xff]   ;;  %v5580_v47 = vld [vmem:[#allocation8 + $0x188] ss:$16 sps:$4 sm:$0xff]  }
 0x17b   :  { %1541 = vmatprep.mubr.bf16.mxu0 %v866_v17  ;;  %v5585_v3 = vld [vmem:[#allocation8 + $0x38c] ss:$16 sps:$4 sm:$0xff]   ;;  %v5583_v4 = vld [vmem:[#allocation8 + $0x388] ss:$16 sps:$4 sm:$0xff]  }
 0x17c   :  { %1582 = vmatprep.mubr.bf16.mxu1 %v868_v19  ;;  %1542 = vmatmul.mubr.bf16.vlgmr.msra.gmra.mxu0 %v6421_v7  ;;  %v5588_v5 = vld [vmem:[#allocation8 + $0x16c] ss:$16 sps:$4 sm:$0xff]   ;;  %v5586_v9 = vld [vmem:[#allocation8 + $0x168] ss:$16 sps:$4 sm:$0xff]  }
 0x17d   :  { %1583 = vmatmul.mubr.bf16.vlgmr.msra.gmra.mxu1 %v6423_v21  ;;  %1592 = vmatpush1.bf16.msra.mxu0 %v5514_v18  ;;  %v5591_v8 = vld [vmem:[#allocation8 + $0x36c] ss:$16 sps:$4 sm:$0xff]   ;;  %v5589_v10 = vld [vmem:[#allocation8 + $0x368] ss:$16 sps:$4 sm:$0xff]  }
 0x17e   :  { %1633 = vmatpush1.bf16.msra.mxu1 %v5517_v20  ;;  %1623 = vmatprep.mubr.bf16.mxu0 %v866_v17  ;;  %v5594_v11 = vld [vmem:[#allocation8 + $0x14c] ss:$16 sps:$4 sm:$0xff]   ;;  %v5592_v6 = vld [vmem:[#allocation8 + $0x148] ss:$16 sps:$4 sm:$0xff]  }
 0x17f   :  { %1664 = vmatprep.mubr.bf16.mxu1 %v868_v19  ;;  %1593 = vmatprep.subr.bf16.mxu0 %v5522_v12  ;;  %v5597_v14 = vld [vmem:[#allocation8 + $0x34c] ss:$16 sps:$4 sm:$0xff]   ;;  %v5595_v15 = vld [vmem:[#allocation8 + $0x348] ss:$16 sps:$4 sm:$0xff]  }
 0x180   :  { %1634 = vmatprep.subr.bf16.mxu1 %v5525_v13  ;;  %v5600_v16 = vld [vmem:[#allocation8 + $0x12c] ss:$16 sps:$4 sm:$0xff]   ;;  %v5598_v18 = vld [vmem:[#allocation8 + $0x128] ss:$16 sps:$4 sm:$0xff]  }
 0x181   :  { %1594 = vmatpush1.bf16.msra.mxu0 %v5520_v22  ;;  %v5603_v17 = vld [vmem:[#allocation8 + $0x32c] ss:$16 sps:$4 sm:$0xff]   ;;  %v5601_v19 = vld [vmem:[#allocation8 + $0x328] ss:$16 sps:$4 sm:$0xff]  }
 0x182   :  { %1635 = vmatpush1.bf16.msra.mxu1 %v5523_v23  ;;  %1595 = vmatprep.subr.bf16.mxu0 %v5528_v24  ;;  %v5606_v20 = vld [vmem:[#allocation8 + $0x10c] ss:$16 sps:$4 sm:$0xff]   ;;  %v5604_v13 = vld [vmem:[#allocation8 + $0x108] ss:$16 sps:$4 sm:$0xff]  }
 0x183   :  { %1636 = vmatprep.subr.bf16.mxu1 %v5531_v25  ;;  %v5609_v12 = vld [vmem:[#allocation8 + $0x30c] ss:$16 sps:$4 sm:$0xff]   ;;  %v5607_v22 = vld [vmem:[#allocation8 + $0x308] ss:$16 sps:$4 sm:$0xff]  }
 0x184   :  { %v5612_v23 = vld [vmem:[#allocation10 + $0x74] ss:$8 sps:$4 sm:$0xff]   ;;  %v5610_v24 = vld [vmem:[#allocation10 + $0x70] ss:$8 sps:$4 sm:$0xff]   ;;  %v5615_v25 = vld [vmem:[#allocation10 + $0x64] ss:$8 sps:$4 sm:$0xff]  }
 0x185   :  { %1596 = vmatpush1.bf16.msra.mxu0 %v5526_v26  ;;  %v5613_v26 = vld [vmem:[#allocation10 + $0x60] ss:$8 sps:$4 sm:$0xff]  }
 0x186   :  { %1637 = vmatpush1.bf16.msra.mxu1 %v5529_v27  ;;  %1597 = vmatprep.subr.bf16.mxu0 %v5534_v28  ;;  %v5618_v27 = vld [vmem:[#allocation10 + $0x54] ss:$8 sps:$4 sm:$0xff]   ;;  %v5616_v28 = vld [vmem:[#allocation10 + $0x50] ss:$8 sps:$4 sm:$0xff]  }
 0x187   :  { %1638 = vmatprep.subr.bf16.mxu1 %v5537_v29  ;;  %v5621_v29 = vld [vmem:[#allocation10 + $0x44] ss:$8 sps:$4 sm:$0xff]  }
 0x189   :  { %1598 = vmatpush1.bf16.msra.mxu0 %v5532_v30  ;;  %v5619_v30 = vld [vmem:[#allocation10 + $0x40] ss:$8 sps:$4 sm:$0xff]  }
 0x18a   :  { %1639 = vmatpush1.bf16.msra.mxu1 %v5535_v34  ;;  %1599 = vmatprep.subr.bf16.mxu0 %v5540_v36  ;;  %v5624_v34 = vld [vmem:[#allocation10 + $0x34] ss:$8 sps:$4 sm:$0xff]   ;;  %v5625_v36 = vld [vmem:[#allocation10 + $0x20] ss:$8 sps:$4 sm:$0xff]  }
 0x18b   :  { %1640 = vmatprep.subr.bf16.mxu1 %v5543_v37  ;;  %v5630_v37 = vld [vmem:[#allocation10 + $0x14] ss:$8 sps:$4 sm:$0xff]  }
 0x18d   :  { %1600 = vmatpush1.bf16.msra.mxu0 %v5538_v38  ;;  %v5628_v38 = vld [vmem:[#allocation10 + $0x10] ss:$8 sps:$4 sm:$0xff]  }
 0x18e   :  { %1641 = vmatpush1.bf16.msra.mxu1 %v5541_v42  ;;  %1601 = vmatprep.subr.bf16.mxu0 %v5546_v43  ;;  %v5633_v42 = vld [vmem:[#allocation10 + $0x4] ss:$8 sps:$4 sm:$0xff]   ;;  %v5631_v43 = vld [vmem:[#allocation10] ss:$8 sps:$4 sm:$0xff]  }
 0x18f   :  { %1642 = vmatprep.subr.bf16.mxu1 %v5549_v44  ;;  %v5636_v44 = vld [vmem:[#allocation10 + $0xf4] ss:$8 sps:$4 sm:$0xff]  }
 0x191   :  { %1602 = vmatpush1.bf16.msra.mxu0 %v5544_v45  ;;  %v5634_v45 = vld [vmem:[#allocation10 + $0xf0] ss:$8 sps:$4 sm:$0xff]  }
 0x192   :  { %1643 = vmatpush1.bf16.msra.mxu1 %v5547_v48  ;;  %1603 = vmatprep.subr.bf16.mxu0 %v5552_v49  ;;  %v5639_v48 = vld [vmem:[#allocation10 + $0xe4] ss:$8 sps:$4 sm:$0xff]   ;;  %v5637_v49 = vld [vmem:[#allocation10 + $0xe0] ss:$8 sps:$4 sm:$0xff]  }
 0x193   :  { %1644 = vmatprep.subr.bf16.mxu1 %v5555_v50  ;;  %v5642_v50 = vld [vmem:[#allocation10 + $0xd4] ss:$8 sps:$4 sm:$0xff]  }
 0x195   :  { %1604 = vmatpush1.bf16.msra.mxu0 %v5550_v51  ;;  %v5640_v51 = vld [vmem:[#allocation10 + $0xd0] ss:$8 sps:$4 sm:$0xff]  }
 0x196   :  { %1645 = vmatpush1.bf16.msra.mxu1 %v5553_v52  ;;  %1605 = vmatprep.subr.bf16.mxu0 %v5558_v53  ;;  %v5645_v52 = vld [vmem:[#allocation10 + $0xc4] ss:$8 sps:$4 sm:$0xff]   ;;  %v5643_v53 = vld [vmem:[#allocation10 + $0xc0] ss:$8 sps:$4 sm:$0xff]  }
 0x197   :  { %1646 = vmatprep.subr.bf16.mxu1 %v5561_v54  ;;  %v5648_v54 = vld [vmem:[#allocation10 + $0xb4] ss:$8 sps:$4 sm:$0xff]  }
 0x199   :  { %1606 = vmatpush1.bf16.msra.mxu0 %v5556_v55  ;;  %v5646_v55 = vld [vmem:[#allocation10 + $0xb0] ss:$8 sps:$4 sm:$0xff]  }
 0x19a   :  { %1647 = vmatpush1.bf16.msra.mxu1 %v5559_v56  ;;  %1607 = vmatprep.subr.bf16.mxu0 %v5564_v57  ;;  %v5651_v56 = vld [vmem:[#allocation10 + $0xa4] ss:$8 sps:$4 sm:$0xff]   ;;  %v5649_v57 = vld [vmem:[#allocation10 + $0xa0] ss:$8 sps:$4 sm:$0xff]  }
 0x19b   :  { %1648 = vmatprep.subr.bf16.mxu1 %v5567_v58  ;;  %v5654_v58 = vld [vmem:[#allocation10 + $0x94] ss:$8 sps:$4 sm:$0xff]  }
 0x19d   :  { %1608 = vmatpush2.bf16.msra.mxu0 %v5562_v59  ;;  %v5652_v59 = vld [vmem:[#allocation10 + $0x90] ss:$8 sps:$4 sm:$0xff]  }
 0x19e   :  { %1649 = vmatpush2.bf16.msra.mxu1 %v5565_v40  ;;  %1609 = vmatprep.subr.bf16.mxu0 %v5570_v60  ;;  %v5657_v40 = vld [vmem:[#allocation10 + $0x84] ss:$8 sps:$4 sm:$0xff]   ;;  %v5655_v60 = vld [vmem:[#allocation10 + $0x80] ss:$8 sps:$4 sm:$0xff]  }
 0x19f   :  { %1650 = vmatprep.subr.bf16.mxu1 %v5573_v61  ;;  %v5660_v61 = vld [vmem:[#allocation10 + $0x174] ss:$8 sps:$4 sm:$0xff]  }
 0x1a1   :  { %1610 = vmatpush2.bf16.msra.mxu0 %v5568_v41  ;;  %v5658_v41 = vld [vmem:[#allocation10 + $0x170] ss:$8 sps:$4 sm:$0xff]  }
 0x1a2   :  { %1651 = vmatpush2.bf16.msra.mxu1 %v5571_v62  ;;  %1611 = vmatprep.subr.bf16.mxu0 %v5576_v63  ;;  %v5663_v62 = vld [vmem:[#allocation10 + $0x164] ss:$8 sps:$4 sm:$0xff]   ;;  %v5661_v63 = vld [vmem:[#allocation10 + $0x160] ss:$8 sps:$4 sm:$0xff]  }
 0x1a3   :  { %1652 = vmatprep.subr.bf16.mxu1 %v5579_v0  ;;  %v5666_v0 = vld [vmem:[#allocation10 + $0x154] ss:$8 sps:$4 sm:$0xff]  }
 0x1a5   :  { %1612 = vmatpush2.bf16.msra.mxu0 %v5574_v1  ;;  %v5664_v1 = vld [vmem:[#allocation10 + $0x150] ss:$8 sps:$4 sm:$0xff]  }
 0x1a6   :  { %1653 = vmatpush2.bf16.msra.mxu1 %v5577_v46  ;;  %1613 = vmatprep.subr.bf16.mxu0 %v5582_v2  ;;  %v5669_v46 = vld [vmem:[#allocation10 + $0x144] ss:$8 sps:$4 sm:$0xff]   ;;  %v5667_v2 = vld [vmem:[#allocation10 + $0x140] ss:$8 sps:$4 sm:$0xff]  }
 0x1a7   :  { %1654 = vmatprep.subr.bf16.mxu1 %v5585_v3  ;;  %v5672_v3 = vld [vmem:[#allocation10 + $0x134] ss:$8 sps:$4 sm:$0xff]  }
 0x1a9   :  { %1614 = vmatpush2.bf16.msra.mxu0 %v5580_v47  ;;  %v5670_v47 = vld [vmem:[#allocation10 + $0x130] ss:$8 sps:$4 sm:$0xff]  }
 0x1aa   :  { %1655 = vmatpush2.bf16.msra.mxu1 %v5583_v4  ;;  %1615 = vmatprep.subr.bf16.mxu0 %v5588_v5  ;;  %v5675_v4 = vld [vmem:[#allocation10 + $0x124] ss:$8 sps:$4 sm:$0xff]   ;;  %v5673_v5 = vld [vmem:[#allocation10 + $0x120] ss:$8 sps:$4 sm:$0xff]  }
 0x1ab   :  { %1656 = vmatprep.subr.bf16.mxu1 %v5591_v8  ;;  %v5678_v8 = vld [vmem:[#allocation10 + $0x114] ss:$8 sps:$4 sm:$0xff]  }
 0x1ad   :  { %1616 = vmatpush2.bf16.msra.mxu0 %v5586_v9  ;;  %v5676_v9 = vld [vmem:[#allocation10 + $0x110] ss:$8 sps:$4 sm:$0xff]  }
 0x1ae   :  { %1657 = vmatpush2.bf16.msra.mxu1 %v5589_v10  ;;  %1617 = vmatprep.subr.bf16.mxu0 %v5594_v11  ;;  %v5681_v10 = vld [vmem:[#allocation10 + $0x104] ss:$8 sps:$4 sm:$0xff]   ;;  %v5679_v11 = vld [vmem:[#allocation10 + $0x100] ss:$8 sps:$4 sm:$0xff]  }
 0x1af   :  { %1658 = vmatprep.subr.bf16.mxu1 %v5597_v14  ;;  %v5684_v14 = vld [vmem:[#allocation10 + $0x1f4] ss:$8 sps:$4 sm:$0xff]  }
 0x1b1   :  { %1618 = vmatpush2.bf16.msra.mxu0 %v5592_v6  ;;  %v5682_v6 = vld [vmem:[#allocation10 + $0x1f0] ss:$8 sps:$4 sm:$0xff]  }
 0x1b2   :  { %1659 = vmatpush2.bf16.msra.mxu1 %v5595_v15  ;;  %1619 = vmatprep.subr.bf16.mxu0 %v5600_v16  ;;  %v5687_v15 = vld [vmem:[#allocation10 + $0x1e4] ss:$8 sps:$4 sm:$0xff]   ;;  %v5685_v16 = vld [vmem:[#allocation10 + $0x1e0] ss:$8 sps:$4 sm:$0xff]  }
 0x1b3   :  { %1660 = vmatprep.subr.bf16.mxu1 %v5603_v17  ;;  %v5690_v17 = vld [vmem:[#allocation10 + $0x1d4] ss:$8 sps:$4 sm:$0xff]  }
 0x1b5   :  { %1620 = vmatpush2.bf16.msra.mxu0 %v5598_v18  ;;  %v5688_v18 = vld [vmem:[#allocation10 + $0x1d0] ss:$8 sps:$4 sm:$0xff]  }
 0x1b6   :  { %1661 = vmatpush2.bf16.msra.mxu1 %v5601_v19  ;;  %1621 = vmatprep.subr.bf16.mxu0 %v5606_v20  ;;  %v5693_v19 = vld [vmem:[#allocation10 + $0x1c4] ss:$8 sps:$4 sm:$0xff]   ;;  %v5691_v20 = vld [vmem:[#allocation10 + $0x1c0] ss:$8 sps:$4 sm:$0xff]  }
 0x1b7   :  { %1662 = vmatprep.subr.bf16.mxu1 %v5609_v12  ;;  %v5696_v12 = vld [vmem:[#allocation10 + $0x1b4] ss:$8 sps:$4 sm:$0xff]  }
 0x1b9   :  { %1622 = vmatpush2.bf16.msra.mxu0 %v5604_v13  ;;  %v5694_v13 = vld [vmem:[#allocation10 + $0x1b0] ss:$8 sps:$4 sm:$0xff]  }
 0x1ba   :  { %1663 = vmatpush2.bf16.msra.mxu1 %v5607_v22  ;;  %2209 = vmatprep.subr.bf16.mxu0 %v5612_v23  ;;  %v5699_v22 = vld [vmem:[#allocation10 + $0x1a4] ss:$8 sps:$4 sm:$0xff]   ;;  %v5697_v23 = vld [vmem:[#allocation10 + $0x1a0] ss:$8 sps:$4 sm:$0xff]  }
 0x1bb   :  { %2250 = vmatprep.subr.bf16.mxu1 %v5660_v61 }
 0x1bc   :  { %1624 = vmatmul.mubr.bf16.vlgmr.msra.gmra.mxu0 %v6421_v7  ;;  %v5622_v7 = vld [vmem:[#allocation10 + $0x30] ss:$8 sps:$4 sm:$0xff]  }
 0x1bd   :  { %1665 = vmatmul.mubr.bf16.vlgmr.msra.gmra.mxu1 %v6423_v21  ;;  %2210 = vmatpush1.bf16.msra.mxu0 %v5610_v24  ;;  %v5627_v21 = vld [vmem:[#allocation10 + $0x24] ss:$8 sps:$4 sm:$0xff]   ;;  %v5702_v24 = vld [vmem:[#allocation10 + $0x194] ss:$8 sps:$4 sm:$0xff]  }
 0x1be   :  { %2211 = vmatprep.subr.bf16.mxu0 %v5615_v25  ;;  %2251 = vmatpush1.bf16.msra.mxu1 %v5658_v41 }
 0x1bf   :  { %2252 = vmatprep.subr.bf16.mxu1 %v5663_v62 }
 0x1c1   :  { %2212 = vmatpush1.bf16.msra.mxu0 %v5613_v26  ;;  %v5700_v26 = vld [vmem:[#allocation10 + $0x190] ss:$8 sps:$4 sm:$0xff]  }
 0x1c2   :  { %2213 = vmatprep.subr.bf16.mxu0 %v5618_v27  ;;  %2253 = vmatpush1.bf16.msra.mxu1 %v5661_v63 }
 0x1c3   :  { %2254 = vmatprep.subr.bf16.mxu1 %v5666_v0 }
 0x1c5   :  { %2214 = vmatpush1.bf16.msra.mxu0 %v5616_v28 }
 0x1c6   :  { %2215 = vmatprep.subr.bf16.mxu0 %v5621_v29  ;;  %2255 = vmatpush1.bf16.msra.mxu1 %v5664_v1 }
 0x1c7   :  { %2256 = vmatprep.subr.bf16.mxu1 %v5669_v46 }
 0x1c9   :  { %2216 = vmatpush1.bf16.msra.mxu0 %v5619_v30  ;;  %v5703_v30 = vld [vmem:[#allocation10 + $0x180] ss:$8 sps:$4 sm:$0xff]  }
 0x1ca   :  { %2217 = vmatprep.subr.bf16.mxu0 %v5624_v34  ;;  %2257 = vmatpush1.bf16.msra.mxu1 %v5667_v2  ;;  %v5705_v34 = vld [vmem:[#allocation10 + $0x184] ss:$8 sps:$4 sm:$0xff]  }
 0x1cb   :  { %2258 = vmatprep.subr.bf16.mxu1 %v5672_v3 }
 0x1cd   :  { %2218 = vmatpush1.bf16.msra.mxu0 %v5622_v7 }
 0x1ce   :  { %2219 = vmatprep.subr.bf16.mxu0 %v5627_v21  ;;  %2259 = vmatpush1.bf16.msra.mxu1 %v5670_v47 }
 0x1cf   :  { %2260 = vmatprep.subr.bf16.mxu1 %v5675_v4 }
 0x1d1   :  { %2220 = vmatpush1.bf16.msra.mxu0 %v5625_v36 }
 0x1d2   :  { %2221 = vmatprep.subr.bf16.mxu0 %v5630_v37  ;;  %2261 = vmatpush1.bf16.msra.mxu1 %v5673_v5 }
 0x1d3   :  { %2262 = vmatprep.subr.bf16.mxu1 %v5678_v8 }
 0x1d5   :  { %2222 = vmatpush1.bf16.msra.mxu0 %v5628_v38 }
 0x1d6   :  { %2223 = vmatprep.subr.bf16.mxu0 %v5633_v42  ;;  %2263 = vmatpush1.bf16.msra.mxu1 %v5676_v9 }
 0x1d7   :  { %2264 = vmatprep.subr.bf16.mxu1 %v5681_v10 }
 0x1d9   :  { %2224 = vmatpush1.bf16.msra.mxu0 %v5631_v43 }
 0x1da   :  { %2225 = vmatprep.subr.bf16.mxu0 %v5636_v44  ;;  %2265 = vmatpush1.bf16.msra.mxu1 %v5679_v11 }
 0x1db   :  { %2266 = vmatprep.subr.bf16.mxu1 %v5684_v14 }
 0x1dd   :  { %2226 = vmatpush2.bf16.msra.mxu0 %v5634_v45 }
 0x1de   :  { %2227 = vmatprep.subr.bf16.mxu0 %v5639_v48  ;;  %2267 = vmatpush2.bf16.msra.mxu1 %v5682_v6 }
 0x1df   :  { %2268 = vmatprep.subr.bf16.mxu1 %v5687_v15 }
 0x1e1   :  { %2228 = vmatpush2.bf16.msra.mxu0 %v5637_v49 }
 0x1e2   :  { %2229 = vmatprep.subr.bf16.mxu0 %v5642_v50  ;;  %2269 = vmatpush2.bf16.msra.mxu1 %v5685_v16 }
 0x1e3   :  { %2270 = vmatprep.subr.bf16.mxu1 %v5690_v17 }
 0x1e5   :  { %2230 = vmatpush2.bf16.msra.mxu0 %v5640_v51 }
 0x1e6   :  { %2231 = vmatprep.subr.bf16.mxu0 %v5645_v52  ;;  %2271 = vmatpush2.bf16.msra.mxu1 %v5688_v18 }
 0x1e7   :  { %2272 = vmatprep.subr.bf16.mxu1 %v5693_v19 }
 0x1e9   :  { %2232 = vmatpush2.bf16.msra.mxu0 %v5643_v53 }
 0x1ea   :  { %2233 = vmatprep.subr.bf16.mxu0 %v5648_v54  ;;  %2273 = vmatpush2.bf16.msra.mxu1 %v5691_v20  ;;  %v6443_v20 = vsub.s32 2, %v6381_v31 }
 0x1eb   :  { %2274 = vmatprep.subr.bf16.mxu1 %v5696_v12 }
 0x1ed   :  { %2234 = vmatpush2.bf16.msra.mxu0 %v5646_v55 }
 0x1ee   :  { %2235 = vmatprep.subr.bf16.mxu0 %v5651_v56  ;;  %2275 = vmatpush2.bf16.msra.mxu1 %v5694_v13 }
 0x1ef   :  { %2276 = vmatprep.subr.bf16.mxu1 %v5699_v22 }
 0x1f1   :  { %2236 = vmatpush2.bf16.msra.mxu0 %v5649_v57 }
 0x1f2   :  { %2237 = vmatprep.subr.bf16.mxu0 %v5654_v58  ;;  %2277 = vmatpush2.bf16.msra.mxu1 %v5697_v23 }
 0x1f3   :  { %2278 = vmatprep.subr.bf16.mxu1 %v5702_v24 }
 0x1f5   :  { %2238 = vmatpush2.bf16.msra.mxu0 %v5652_v59 }
 0x1f6   :  { %2239 = vmatprep.subr.bf16.mxu0 %v5657_v40  ;;  %2279 = vmatpush2.bf16.msra.mxu1 %v5700_v26 }
 0x1f7   :  { %2280 = vmatprep.subr.bf16.mxu1 %v5705_v34 }
 0x1f9   :  { %2240 = vmatpush2.bf16.msra.mxu0 %v5655_v60 }
 0x1fa   :  { %2281 = vmatpush2.bf16.msra.mxu1 %v5703_v30 }
 0x23c   :  { %v1543_v25 = vpop.f32.mrf.mxu0 }
 0x23d   :  { %v1584_v27 = vpop.f32.mrf.mxu1 }
 0x23e   :  { %v6429_v28 = vadd.f32 %v1584_v27, %v1543_v25  ;;  %v1545_v29 = vpop.f32.mrf.mxu0  ;;  %v6448_v25 = vsub.s32 3, %v6381_v31 }
 0x23f   :  { %v1586_v7 = vpop.f32.mrf.mxu1 }
 0x240   :  { %v1673_v21 = vsel %vm587_vm0, %v6429_v28, 0.0  ;;  %v6433_v36 = vadd.f32 %v1586_v7, %v1545_v29  ;;  %v1547_v37 = vpop.f32.mrf.mxu0 }
 0x241   :  { %v1674_v38 = vrot.slane %v1673_v21, 4  ;;  %v1588_v42 = vpop.f32.mrf.mxu1 }
 0x242   :  { %v1680_v43 = vsel %vm587_vm0, %v6433_v36, 0.0  ;;  %v1548_v44 = vpop.f32.mrf.mxu0 }
 0x243   :  { %v1675_v45 = vadd.f32 %v1674_v38, %v1673_v21  ;;  %v1681_v48 = vrot.slane %v1680_v43, 4  ;;  %v1589_v49 = vpop.f32.mrf.mxu1 }
 0x245   :  { %v1676_v50 = vrot.slane %v1675_v45, 2  ;;  %v1682_v51 = vadd.f32 %v1681_v48, %v1680_v43 }
 0x247   :  { %v1677_v52 = vadd.f32 %v1676_v50, %v1675_v45  ;;  %v1683_v53 = vrot.slane %v1682_v51, 2 }
 0x249   :  { %v1678_v54 = vrot.slane %v1677_v52, 1  ;;  %v1684_v55 = vadd.f32 %v1683_v53, %v1682_v51 }
 0x24b   :  { %v1679_v56 = vadd.f32 %v1678_v54, %v1677_v52  ;;  %v1685_v57 = vrot.slane %v1684_v55, 1 }
 0x24d   :  { %v1701_v58 = vmul.f32 0.25, %v1679_v56  ;;  %v1686_v59 = vadd.f32 %v1685_v57, %v1684_v55 }
 0x24f   :  { %v1705_v40 = vsub.f32 %v6429_v28, %v1701_v58  ;;  %v1702_v60 = vmul.f32 0.25, %v1686_v59 }
 0x251   :  { %v1709_v61 = vmul.f32 %v1705_v40, %v1705_v40  ;;  %v1706_v41 = vsub.f32 %v6433_v36, %v1702_v60 }
 0x253   :  { %v1713_v62 = vsel %vm587_vm0, %v1709_v61, 0.0  ;;  %v1710_v63 = vmul.f32 %v1706_v41, %v1706_v41 }
 0x254   :  { %v1714_v0 = vrot.slane %v1713_v62, 4 }
 0x255   :  { %v1720_v1 = vsel %vm587_vm0, %v1710_v63, 0.0 }
 0x256   :  { %v1715_v46 = vadd.f32 %v1714_v0, %v1713_v62  ;;  %v1721_v2 = vrot.slane %v1720_v1, 4 }
 0x258   :  { %v1716_v3 = vrot.slane %v1715_v46, 2  ;;  %v1722_v47 = vadd.f32 %v1721_v2, %v1720_v1 }
 0x25a   :  { %v1717_v4 = vadd.f32 %v1716_v3, %v1715_v46  ;;  %v1723_v5 = vrot.slane %v1722_v47, 2 }
 0x25c   :  { %v1718_v8 = vrot.slane %v1717_v4, 1  ;;  %v1724_v9 = vadd.f32 %v1723_v5, %v1722_v47 }
 0x25e   :  { %v1719_v10 = vadd.f32 %v1718_v8, %v1717_v4  ;;  %v1725_v11 = vrot.slane %v1724_v9, 1 }
 0x260   :  { %v1741_v14 = vmul.f32 0.25, %v1719_v10  ;;  %v1726_v6 = vadd.f32 %v1725_v11, %v1724_v9 }
 0x262   :  { %v1745_v15 = vadd.f32 1e-05, %v1741_v14  ;;  %v1742_v16 = vmul.f32 0.25, %v1726_v6 }
 0x264   :  { %5770 = vrsqrt.f32 %v1745_v15  ;;  %v1746_v17 = vadd.f32 1e-05, %v1742_v16 }
 0x266   :  { %5772 = vrsqrt.f32 %v1746_v17 }
 0x271   :  { %v5771_v18 = vpop.eup %5770 }
 0x272   :  { %v1753_v19 = vmul.f32 %v5771_v18, %v6386_v32 }
 0x273   :  { %v5773_v12 = vpop.eup %5772 }
 0x274   :  { %v1757_v13 = vmul.f32 %v1753_v19, %v1701_v58  ;;  %v1754_v22 = vmul.f32 %v5773_v12, %v6396_v35  ;;  %v1780_v24 = vrot.slane %v1753_v19, %v6443_v20 }
 0x276   :  { %v1765_v23 = vrot.slane %v1757_v13, 7  ;;  %v1758_v26 = vmul.f32 %v1754_v22, %v1702_v60  ;;  %v1784_v30 = vrot.slane %v1754_v22, %v6443_v20  ;;  %v1793_v34 = vmul.f32 %v1780_v24, %v6429_v28 }
 0x278   :  { %v1773_v27 = vsub.f32 %v6386_v32, %v1765_v23  ;;  %v1766_v29 = vrot.slane %v1758_v26, 7  ;;  %v1794_v38 = vmul.f32 %v1784_v30, %v6433_v36 }
 0x27a   :  { %v1800_v7 = vrot.slane %v1773_v27, %v6448_v25  ;;  %v1774_v21 = vsub.f32 %v6396_v35, %v1766_v29 }
 0x27c   :  { %v1813_v37 = vadd.f32 %v1800_v7, %v1793_v34  ;;  %v1625_v42 = vpop.f32.mrf.mxu0  ;;  %v1804_v43 = vrot.slane %v1774_v21, %v6448_v25 }
 0x27d   :  { %v1666_v44 = vpop.f32.mrf.mxu1 }
 0x27e   :  { %v6457_v45 = vadd.f32 %v1666_v44, %v1625_v42  ;;  %v1627_v48 = vpop.f32.mrf.mxu0  ;;  %v1814_v49 = vadd.f32 %v1804_v43, %v1794_v38  ;;  %v1817_v50 = vmax.f32 %v1813_v37, 0.0 }
 0x27f   :  { %v1668_v51 = vpop.f32.mrf.mxu1 }
 0x280   :  { %v1687_v28 = vsel %vm587_vm0, %v6457_v45, 0.0  ;;  %v6461_v52 = vadd.f32 %v1668_v51, %v1627_v48  ;;  %v1629_v53 = vpop.f32.mrf.mxu0  ;;  %v1818_v54 = vmax.f32 %v1814_v49, 0.0  ;;  %v1885_v61 = vpack.c.bf16 %v1817_v50, %v1817_v50 }
 0x281   :  { %v1688_v55 = vrot.slane %v1687_v28, 4  ;;  %v1670_v56 = vpop.f32.mrf.mxu1 }
 0x282   :  { %v1694_v36 = vsel %vm587_vm0, %v6461_v52, 0.0  ;;  %v1630_v57 = vpop.f32.mrf.mxu0  ;;  %v1886_v58 = vpack.c.bf16 %v1818_v54, %v1818_v54 }
 0x283   :  { %v1689_v59 = vadd.f32 %v1688_v55, %v1687_v28  ;;  %v1695_v40 = vrot.slane %v1694_v36, 4  ;;  %v1671_v60 = vpop.f32.mrf.mxu1 }
 0x284   :  { %2241 = vmatprep.mubr.bf16.mxu0 %v1886_v58 }
 0x285   :  { %v1690_v41 = vrot.slane %v1689_v59, 2  ;;  %v1696_v62 = vadd.f32 %v1695_v40, %v1694_v36  ;;  %2242 = vmatmul.mubr.bf16.vlgmr.msra.gmra.mxu0 %v1885_v61 }
 0x287   :  { %v1691_v63 = vadd.f32 %v1690_v41, %v1689_v59  ;;  %v1697_v0 = vrot.slane %v1696_v62, 2  ;;  %v5706_v41 = vld [vmem:[#allocation11 + $0x118] ss:$20 sps:$4 sm:$0xff]  }
 0x289   :  { %v1692_v1 = vrot.slane %v1691_v63, 1  ;;  %v1698_v46 = vadd.f32 %v1697_v0, %v1696_v62  ;;  %v5709_v62 = vld [vmem:[#allocation11 + $0x120] ss:$20 sps:$4 sm:$0xff]   ;;  %v5717_v0 = vld [vmem:[#allocation11 + $0xfc] ss:$20 sps:$4 sm:$0xff]  }
 0x28b   :  { %v1693_v2 = vadd.f32 %v1692_v1, %v1691_v63  ;;  %v1699_v3 = vrot.slane %v1698_v46, 1  ;;  %v5714_v63 = vld [vmem:[#allocation11 + $0xf4] ss:$20 sps:$4 sm:$0xff]   ;;  %v5712_v1 = vld [vmem:[#allocation11 + $0xf0] ss:$20 sps:$4 sm:$0xff]  }
 0x28d   :  { %v1703_v47 = vmul.f32 0.25, %v1693_v2  ;;  %v1700_v4 = vadd.f32 %v1699_v3, %v1698_v46  ;;  %v5723_v46 = vld [vmem:[#allocation11 + $0xd4] ss:$20 sps:$4 sm:$0xff]   ;;  %v5721_v3 = vld [vmem:[#allocation11 + $0xd0] ss:$20 sps:$4 sm:$0xff]  }
 0x28e   :  { %v5718_v2 = vld [vmem:[#allocation11 + $0xc8] ss:$20 sps:$4 sm:$0xff]  }
 0x28f   :  { %v1707_v5 = vsub.f32 %v6457_v45, %v1703_v47  ;;  %v1704_v8 = vmul.f32 0.25, %v1700_v4  ;;  %v5729_v4 = vld [vmem:[#allocation11 + $0xac] ss:$20 sps:$4 sm:$0xff]  }
 0x291   :  { %v1711_v9 = vmul.f32 %v1707_v5, %v1707_v5  ;;  %v1708_v10 = vsub.f32 %v6461_v52, %v1704_v8  ;;  %v5724_v5 = vld [vmem:[#allocation11 + $0xa0] ss:$20 sps:$4 sm:$0xff]  }
 0x293   :  { %v1727_v11 = vsel %vm587_vm0, %v1711_v9, 0.0  ;;  %v1712_v14 = vmul.f32 %v1708_v10, %v1708_v10  ;;  %v5732_v9 = vld [vmem:[#allocation11 + $0x7c] ss:$20 sps:$4 sm:$0xff]   ;;  %v5735_v10 = vld [vmem:[#allocation11 + $0x84] ss:$20 sps:$4 sm:$0xff]  }
 0x294   :  { %v1728_v6 = vrot.slane %v1727_v11, 4 }
 0x295   :  { %v1734_v15 = vsel %vm587_vm0, %v1712_v14, 0.0  ;;  %v5733_v14 = vld [vmem:[#allocation11 + $0x80] ss:$20 sps:$4 sm:$0xff]  }
 0x296   :  { %v1729_v16 = vadd.f32 %v1728_v6, %v1727_v11  ;;  %v1735_v17 = vrot.slane %v1734_v15, 4  ;;  %v5730_v11 = vld [vmem:[#allocation11 + $0x78] ss:$20 sps:$4 sm:$0xff]   ;;  %v5738_v6 = vld [vmem:[#allocation11 + $0x54] ss:$20 sps:$4 sm:$0xff]  }
 0x298   :  { %v1730_v18 = vrot.slane %v1729_v16, 2  ;;  %v1736_v19 = vadd.f32 %v1735_v17, %v1734_v15  ;;  %v5736_v15 = vld [vmem:[#allocation11 + $0x50] ss:$20 sps:$4 sm:$0xff]   ;;  %v5739_v17 = vld [vmem:[#allocation11 + $0x58] ss:$20 sps:$4 sm:$0xff]  }
 0x29a   :  { %v1731_v12 = vadd.f32 %v1730_v18, %v1729_v16  ;;  %v1737_v13 = vrot.slane %v1736_v19, 2  ;;  %v5741_v16 = vld [vmem:[#allocation11 + $0x5c] ss:$20 sps:$4 sm:$0xff]   ;;  %v5744_v18 = vld [vmem:[#allocation11 + $0x2c] ss:$20 sps:$4 sm:$0xff]  }
 0x29c   :  { %v1732_v22 = vrot.slane %v1731_v12, 1  ;;  %v1738_v23 = vadd.f32 %v1737_v13, %v1736_v19  ;;  %v5742_v19 = vld [vmem:[#allocation11 + $0x28] ss:$20 sps:$4 sm:$0xff]   ;;  %v5745_v13 = vld [vmem:[#allocation11 + $0x30] ss:$20 sps:$4 sm:$0xff]  }
 0x29e   :  { %v1733_v24 = vadd.f32 %v1732_v22, %v1731_v12  ;;  %v1739_v26 = vrot.slane %v1738_v23, 1  ;;  %v5747_v12 = vld [vmem:[#allocation11 + $0x34] ss:$20 sps:$4 sm:$0xff]   ;;  %v5750_v22 = vld [vmem:[#allocation11 + $0x4] ss:$20 sps:$4 sm:$0xff]  }
 0x2a0   :  { %v1743_v27 = vmul.f32 0.25, %v1733_v24  ;;  %v1740_v29 = vadd.f32 %v1739_v26, %v1738_v23  ;;  %v5748_v23 = vld [vmem:[#allocation11] ss:$20 sps:$4 sm:$0xff]   ;;  %v5751_v24 = vld [vmem:[#allocation11 + $0x8] ss:$20 sps:$4 sm:$0xff]  }
 0x2a1   :  { %v5753_v26 = vld [vmem:[#allocation11 + $0xc] ss:$20 sps:$4 sm:$0xff]  }
 0x2a2   :  { %v1747_v30 = vadd.f32 1e-05, %v1743_v27  ;;  %v1744_v34 = vmul.f32 0.25, %v1740_v29  ;;  %v6264_v27 = vmov 0   ;;  %v6265_v29 = vmov 0.0  }
 0x2a3   :  { %2594 = vmatprep.mubr.bf16.mxu0 %v6264_v27 }
 0x2a4   :  { %5774 = vrsqrt.f32 %v1747_v30  ;;  %v1748_v7 = vadd.f32 1e-05, %v1744_v34 }
 0x2a6   :  { %5776 = vrsqrt.f32 %v1748_v7 }
 0x2b1   :  { %v5775_v21 = vpop.eup %5774 }
 0x2b2   :  { %v1755_v37 = vmul.f32 %v5775_v21, %v6391_v33 }
 0x2b3   :  { %v5777_v38 = vpop.eup %5776 }
 0x2b4   :  { %v1759_v42 = vmul.f32 %v1755_v37, %v1703_v47  ;;  %v1756_v43 = vmul.f32 %v5777_v38, %v6403_v39  ;;  %v1788_v48 = vrot.slane %v1755_v37, %v6443_v20  ;;  %v5726_v47 = vld [vmem:[#allocation11 + $0xa4] ss:$20 sps:$4 sm:$0xff]  }
 0x2b6   :  { %v1767_v44 = vrot.slane %v1759_v42, 7  ;;  %v1760_v49 = vmul.f32 %v1756_v43, %v1704_v8  ;;  %v1792_v28 = vrot.slane %v1756_v43, %v6443_v20  ;;  %v1795_v53 = vmul.f32 %v1788_v48, %v6457_v45  ;;  %v5708_v20 = vld [vmem:[#allocation11 + $0x11c] ss:$20 sps:$4 sm:$0xff]   ;;  %v5711_v45 = vld [vmem:[#allocation11 + $0x124] ss:$20 sps:$4 sm:$0xff]  }
 0x2b7   :  { %2562 = vmatprep.subr.bf16.mxu0 %v5708_v20  ;;  %2603 = vmatprep.subr.bf16.mxu1 %v5711_v45  ;;  %v5727_v8 = vld [vmem:[#allocation11 + $0xa8] ss:$20 sps:$4 sm:$0xff]   ;;  %v5761_v20 = vld [vmem:[#allocation11 + $0x10] ss:$20 sps:$4 sm:$0xff]  }
 0x2b8   :  { %v1775_v50 = vsub.f32 %v6391_v33, %v1767_v44  ;;  %v1768_v51 = vrot.slane %v1760_v49, 7  ;;  %v1796_v36 = vmul.f32 %v1792_v28, %v6461_v52  ;;  %2563 = vmatpush1.bf16.msra.mxu0 %v5706_v41  ;;  %v5720_v52 = vld [vmem:[#allocation11 + $0xcc] ss:$20 sps:$4 sm:$0xff]  }
 0x2b9   :  { %2564 = vmatprep.subr.bf16.mxu0 %v5714_v63  ;;  %v5760_v41 = vld [vmem:[#allocation11 + $0x38] ss:$20 sps:$4 sm:$0xff]  }
 0x2ba   :  { %v1808_v54 = vrot.slane %v1775_v50, %v6448_v25  ;;  %v1776_v55 = vsub.f32 %v6403_v39, %v1768_v51  ;;  %v2302_v51 = vld [vmem:[%s6767_s5] sm:$0xff]  ;;  %s6267_s5 = smov [#allocation2]  }
 0x2bc   :  { %v1815_v56 = vadd.f32 %v1808_v54, %v1795_v53  ;;  %v1812_v57 = vrot.slane %v1776_v55, %v6448_v25  ;;  %v5715_v25 = vld [vmem:[#allocation11 + $0xf8] ss:$20 sps:$4 sm:$0xff]   ;;  %2565 = vmatpush1.bf16.msra.mxu0 %v5712_v1 }
 0x2bd   :  { %2566 = vmatprep.subr.bf16.mxu0 %v5720_v52 }
 0x2be   :  { %v1816_v58 = vadd.f32 %v1812_v57, %v1796_v36  ;;  %v1819_v59 = vmax.f32 %v1815_v56, 0.0  ;;  %v5754_v36 = vld [vmem:[#allocation11 + $0x128] ss:$20 sps:$4 sm:$0xff]  }
 0x2c0   :  { %v1820_v40 = vmax.f32 %v1816_v58, 0.0  ;;  %v1887_v61 = vpack.c.bf16 %v1819_v59, %v1819_v59  ;;  %2567 = vmatpush1.bf16.msra.mxu0 %v5718_v2  ;;  %v5755_v58 = vld [vmem:[#allocation11 + $0x100] ss:$20 sps:$4 sm:$0xff]   ;;  %v5756_v59 = vld [vmem:[#allocation11 + $0xd8] ss:$20 sps:$4 sm:$0xff]  }
 0x2c1   :  { %2568 = vmatprep.subr.bf16.mxu0 %v5726_v47 }
 0x2c2   :  { %v1888_v60 = vpack.c.bf16 %v1820_v40, %v1820_v40  ;;  %v5757_v40 = vld [vmem:[#allocation11 + $0xb0] ss:$20 sps:$4 sm:$0xff]  }
 0x2c4   :  { %2282 = vmatprep.mubr.bf16.mxu1 %v1888_v60  ;;  %2569 = vmatpush1.bf16.msra.mxu0 %v5724_v5  ;;  %v5758_v60 = vld [vmem:[#allocation11 + $0x88] ss:$20 sps:$4 sm:$0xff]  }
 0x2c5   :  { %2283 = vmatmul.mubr.bf16.vlgmr.msra.gmra.mxu1 %v1887_v61  ;;  %2570 = vmatprep.subr.bf16.mxu0 %v5732_v9  ;;  %v5759_v61 = vld [vmem:[#allocation11 + $0x60] ss:$20 sps:$4 sm:$0xff]  }
 0x2c6   :  { %2604 = vmatpush1.bf16.msra.mxu1 %v5709_v62  ;;  %2635 = vmatprep.mubr.bf16.mxu1 %v6264_v27 }
 0x2c7   :  { %2605 = vmatprep.subr.bf16.mxu1 %v5717_v0 }
 0x2c8   :  { %2571 = vmatpush1.bf16.msra.mxu0 %v5730_v11 }
 0x2c9   :  { %2572 = vmatprep.subr.bf16.mxu0 %v5738_v6 }
 0x2ca   :  { %2606 = vmatpush1.bf16.msra.mxu1 %v5715_v25 }
 0x2cb   :  { %2607 = vmatprep.subr.bf16.mxu1 %v5723_v46 }
 0x2cc   :  { %2573 = vmatpush1.bf16.msra.mxu0 %v5736_v15 }
 0x2cd   :  { %2574 = vmatprep.subr.bf16.mxu0 %v5744_v18 }
 0x2ce   :  { %2608 = vmatpush1.bf16.msra.mxu1 %v5721_v3 }
 0x2cf   :  { %2609 = vmatprep.subr.bf16.mxu1 %v5729_v4 }
 0x2d0   :  { %2575 = vmatpush1.bf16.msra.mxu0 %v5742_v19 }
 0x2d1   :  { %2576 = vmatprep.subr.bf16.mxu0 %v5750_v22 }
 0x2d2   :  { %2610 = vmatpush1.bf16.msra.mxu1 %v5727_v8 }
 0x2d3   :  { %2611 = vmatprep.subr.bf16.mxu1 %v5735_v10 }
 0x2d4   :  { %2577 = vmatpush1.bf16.msra.mxu0 %v5748_v23 }
 0x2d5   :  { %5285 = vmatprep.subr.bf16.mxu0 %v6265_v29 }
 0x2d6   :  { %2612 = vmatpush1.bf16.msra.mxu1 %v5733_v14 }
 0x2d7   :  { %2613 = vmatprep.subr.bf16.mxu1 %v5741_v16 }
 0x2da   :  { %2614 = vmatpush1.bf16.msra.mxu1 %v5739_v17 }
 0x2db   :  { %2615 = vmatprep.subr.bf16.mxu1 %v5747_v12 }
 0x2de   :  { %2616 = vmatpush1.bf16.msra.mxu1 %v5745_v13 }
 0x2df   :  { %2617 = vmatprep.subr.bf16.mxu1 %v5753_v26 }
 0x2e2   :  { %2618 = vmatpush1.bf16.msra.mxu1 %v5751_v24 }
 0x345   :  { %v2243_v30 = vpop.f32.mrf.mxu0 }
 0x347   :  { %v2245_v34 = vpop.f32.mrf.mxu0 }
 0x349   :  { %v2247_v7 = vpop.f32.mrf.mxu0 }
 0x34b   :  { %v2248_v21 = vpop.f32.mrf.mxu0 }
 0x385   :  { %v2284_v37 = vpop.f32.mrf.mxu1 }
 0x386   :  { %v2285_v38 = vadd.f32 %v2284_v37, %v2243_v30 }
 0x387   :  { %v2286_v42 = vpop.f32.mrf.mxu1 }
 0x388   :  { %v2287_v43 = vadd.f32 %v2286_v42, %v2245_v34  ;;  %v2296_v48 = vrot.slane %v2285_v38, 4 }
 0x389   :  { %v2288_v44 = vpop.f32.mrf.mxu1 }
 0x38a   :  { %v2293_v49 = vcombine.low %v2285_v38, %v2287_v43  ;;  %v2299_v50 = vrot.slane %v2287_v43, 4  ;;  %v2298_v55 = vsel %vm587_vm0, %v2285_v38, %v2296_v48 }
 0x38b   :  { %v2289_v28 = vpop.f32.mrf.mxu1 }
 0x38c   :  { %2295 = vst [vmem:[%s6771_s9] sm:$0xff] %v2293_v49  ;;  %v2301_v53 = vsel %vm587_vm0, %v2287_v43, %v2299_v50  ;;  %s95_s9 = sshll.u32 %s6267_s5, 4  ;;  %s96_s9 = int_to_ptr.vmem [resolvable:$true] %s95_s9 }
 0x38d   :  { %v2303_v54 = vmul.f32 %v2302_v51, %v2301_v53  ;;  %s6190_s15 = scalar_lea.vmem %s96_s9, 16384  ;;  %p6195_p7 = scmp.lt.s32.totalorder %s96_s9, %s96_s9 }
 0x38e   :  { %p6191_p6 = scmp.ne.s32.totalorder %s96_s9, %s6190_s15  ;;  %p6196_p8 = scmp.lt.s32.totalorder %s6190_s15, %s6190_s15 }
 0x38f   :  { %v2304_v56 = vadd.f32 %v2303_v54, %v2298_v55 }
 0x390   :  { %p6197_p9 = por %p6196_p8, %p6195_p7 }
 0x391   :  { %v2353_v57 = vpack.c.bf16 %v2304_v56, %v2304_v56 }
 0x392   :  { %p6198_p10 = pnand %p6197_p9, %p6191_p6 }
 0x393   :  { %2595 = vmatmul.mubr.bf16.vlgmr.msra.gmra.mxu0 %v2353_v57  ;;  %2636 = vmatmul.mubr.bf16.vlgmr.msra.gmra.mxu1 %v2353_v57 }
 0x394   :  { %5286 = vmatpush3.bf16.msra.mxu0 %v5754_v36  ;;  %5301 = vmatprep.mubr.msk.bf16.mxu0 %vm6266_vm1, %v6265_v29 }
 0x395   :  { %5287 = vmatprep.subr.bf16.mxu0 %v6265_v29 }
 0x398   :  { %5288 = vmatpush3.bf16.msra.mxu0 %v5755_v58 }
 0x399   :  { %5289 = vmatprep.subr.bf16.mxu0 %v6265_v29 }
 0x39c   :  { %5290 = vmatpush3.bf16.msra.mxu0 %v5756_v59 }
 0x39d   :  { %5291 = vmatprep.subr.bf16.mxu0 %v6265_v29 }
 0x3a0   :  { %5292 = vmatpush3.bf16.msra.mxu0 %v5757_v40 }
 0x3a1   :  { %5293 = vmatprep.subr.bf16.mxu0 %v6265_v29 }
 0x3a4   :  { %5294 = vmatpush3.bf16.msra.mxu0 %v5758_v60 }
 0x3a5   :  { %5295 = vmatprep.subr.bf16.mxu0 %v6265_v29 }
 0x3a8   :  { %5296 = vmatpush3.bf16.msra.mxu0 %v5759_v61 }
 0x3a9   :  { %5297 = vmatprep.subr.bf16.mxu0 %v6265_v29 }
 0x3ac   :  { %5298 = vmatpush3.bf16.msra.mxu0 %v5760_v41 }
 0x3ad   :  { %5299 = vmatprep.subr.bf16.mxu0 %v6265_v29 }
 0x3b0   :  { %5300 = vmatpush3.bf16.msra.mxu0 %v5761_v20 }
 0x3b3   :  { %5302 = vmatmul.mubr.bf16.vlgmr.msra.gmra.mxu0 %v2353_v57 }
 0x3b4   :  { %6201 = shalt.err (!%p6198_p10)  }
 0x3b5   :  { %98 = dma.hbm_to_vmem [thread:$0]  %s6769_s7, 16384, %s96_s9, [#allocation4] }
 0x3b6   :  { %s6210_s1 = scalar_lea.vmem %s108_s14, 8192  ;;  %p6215_p12 = scmp.lt.s32.totalorder %s108_s14, %s108_s14 }
 0x3b7   :  { %p6211_p11 = scmp.ne.s32.totalorder %s108_s14, %s6210_s1  ;;  %p6216_p13 = scmp.lt.s32.totalorder %s6210_s1, %s6210_s1 }
 0x3b9   :  { %p6217_p0 = por %p6216_p13, %p6215_p12 }
 0x3bb   :  { %p6218_p1 = pnand %p6217_p0, %p6211_p11 }
 0x3bd   :  { %6221 = shalt.err (!%p6218_p1)  }
 0x3be   :  { %110 = dma.hbm_to_vmem [thread:$0]  %s6770_s8, 8192, %s108_s14, [#allocation4 + $0x1] }
 0x453   :  { %v6493_v62 = vpop.f32.mrf.mxu0  ;;  %v6495_v45 = vpop.f32.mrf.mxu1 }
 0x454   :  { %v2685_v63 = vsel %vm587_vm0, %v6493_v62, 0.0  ;;  %v2837_v0 = vrot.slane %v6493_v62, 4  ;;  %v2699_v1 = vsel %vm587_vm0, %v6495_v45, 0.0  ;;  %v2839_v25 = vrot.slane %v6495_v45, 4 }
 0x455   :  { %v2686_v52 = vrot.slane %v2685_v63, 4  ;;  %v2700_v46 = vrot.slane %v2699_v1, 4  ;;  %v6503_v2 = vpop.f32.mrf.mxu0  ;;  %v6505_v3 = vpop.f32.mrf.mxu1 }
 0x456   :  { %v2845_v47 = vsel %vm587_vm0, %v2837_v0, 0.0  ;;  %v2859_v4 = vsel %vm587_vm0, %v2839_v25, 0.0  ;;  %v2692_v5 = vsel %vm587_vm0, %v6503_v2, 0.0  ;;  %v2838_v8 = vrot.slane %v6503_v2, 4 }
 0x457   :  { %v2687_v9 = vadd.f32 %v2686_v52, %v2685_v63  ;;  %v2846_v10 = vrot.slane %v2845_v47, 4  ;;  %v2701_v11 = vadd.f32 %v2700_v46, %v2699_v1  ;;  %v2860_v14 = vrot.slane %v2859_v4, 4  ;;  %v2600_v6 = vpop.f32.mrf.mxu0  ;;  %v2641_v15 = vpop.f32.mrf.mxu1 }
 0x458   :  { %v2693_v16 = vrot.slane %v2692_v5, 4  ;;  %v2852_v17 = vsel %vm587_vm0, %v2838_v8, 0.0  ;;  %v2706_v18 = vsel %vm587_vm0, %v6505_v3, 0.0  ;;  %v2840_v19 = vrot.slane %v6505_v3, 4 }
 0x459   :  { %v2688_v12 = vrot.slane %v2687_v9, 2  ;;  %v2847_v13 = vadd.f32 %v2846_v10, %v2845_v47  ;;  %v2702_v22 = vrot.slane %v2701_v11, 2  ;;  %v2861_v23 = vadd.f32 %v2860_v14, %v2859_v4  ;;  %v2601_v24 = vpop.f32.mrf.mxu0  ;;  %v2642_v26 = vpop.f32.mrf.mxu1 }
 0x45a   :  { %v2694_v27 = vadd.f32 %v2693_v16, %v2692_v5  ;;  %v2853_v29 = vrot.slane %v2852_v17, 4  ;;  %v2707_v30 = vrot.slane %v2706_v18, 4  ;;  %v2866_v34 = vsel %vm587_vm0, %v2840_v19, 0.0 }
 0x45b   :  { %v2689_v7 = vadd.f32 %v2688_v12, %v2687_v9  ;;  %v2848_v21 = vrot.slane %v2847_v13, 2  ;;  %v2703_v37 = vadd.f32 %v2702_v22, %v2701_v11  ;;  %v2862_v38 = vrot.slane %v2861_v23, 2 }
 0x45c   :  { %v2695_v42 = vrot.slane %v2694_v27, 2  ;;  %v2854_v43 = vadd.f32 %v2853_v29, %v2852_v17  ;;  %v2708_v44 = vadd.f32 %v2707_v30, %v2706_v18  ;;  %v2867_v48 = vrot.slane %v2866_v34, 4 }
 0x45d   :  { %v2690_v49 = vrot.slane %v2689_v7, 1  ;;  %v2849_v50 = vadd.f32 %v2848_v21, %v2847_v13  ;;  %v2704_v51 = vrot.slane %v2703_v37, 1  ;;  %v2863_v28 = vadd.f32 %v2862_v38, %v2861_v23 }
 0x45e   :  { %v2696_v53 = vadd.f32 %v2695_v42, %v2694_v27  ;;  %v2855_v54 = vrot.slane %v2854_v43, 2  ;;  %v2709_v55 = vrot.slane %v2708_v44, 2  ;;  %v2868_v56 = vadd.f32 %v2867_v48, %v2866_v34 }
 0x45f   :  { %v2691_v36 = vadd.f32 %v2690_v49, %v2689_v7  ;;  %v2850_v57 = vrot.slane %v2849_v50, 1  ;;  %v2705_v58 = vadd.f32 %v2704_v51, %v2703_v37  ;;  %v2864_v59 = vrot.slane %v2863_v28, 1 }
 0x460   :  { %v2697_v40 = vrot.slane %v2696_v53, 1  ;;  %v2856_v60 = vadd.f32 %v2855_v54, %v2854_v43  ;;  %v2710_v61 = vadd.f32 %v2709_v55, %v2708_v44  ;;  %v2869_v41 = vrot.slane %v2868_v56, 2 }
 0x461   :  { %v6517_v20 = vmul.f32 0.25, %v2691_v36  ;;  %v2851_v63 = vadd.f32 %v2850_v57, %v2849_v50  ;;  %v6519_v0 = vmul.f32 0.25, %v2705_v58  ;;  %v2865_v1 = vadd.f32 %v2864_v59, %v2863_v28 }
 0x462   :  { %v2698_v25 = vadd.f32 %v2697_v40, %v2696_v53  ;;  %v2857_v52 = vrot.slane %v2856_v60, 1  ;;  %v2711_v46 = vrot.slane %v2710_v61, 1  ;;  %v2870_v47 = vadd.f32 %v2869_v41, %v2868_v56 }
 0x463   :  { %v2717_v4 = vsub.f32 %v6493_v62, %v6517_v20  ;;  %v6523_v5 = vmul.f32 0.25, %v2851_v63  ;;  %v2719_v8 = vsub.f32 %v6495_v45, %v6519_v0  ;;  %v6527_v9 = vmul.f32 0.25, %v2865_v1 }
 0x464   :  { %v6529_v10 = vmul.f32 0.25, %v2698_v25  ;;  %v2858_v11 = vadd.f32 %v2857_v52, %v2856_v60  ;;  %v2712_v14 = vadd.f32 %v2711_v46, %v2710_v61  ;;  %v2871_v6 = vrot.slane %v2870_v47, 1 }
 0x465   :  { %v2721_v15 = vmul.f32 %v2717_v4, %v2717_v4  ;;  %v2877_v16 = vsub.f32 %v6493_v62, %v6523_v5  ;;  %v2723_v17 = vmul.f32 %v2719_v8, %v2719_v8  ;;  %v2879_v18 = vsub.f32 %v6495_v45, %v6527_v9 }
 0x466   :  { %v2718_v19 = vsub.f32 %v6503_v2, %v6529_v10  ;;  %v6537_v12 = vmul.f32 0.25, %v2858_v11  ;;  %v6539_v13 = vmul.f32 0.25, %v2712_v14  ;;  %v2872_v22 = vadd.f32 %v2871_v6, %v2870_v47 }
 0x467   :  { %v2725_v23 = vsel %vm587_vm0, %v2721_v15, 0.0  ;;  %v2881_v24 = vmul.f32 %v2877_v16, %v2877_v16  ;;  %v2739_v26 = vsel %vm587_vm0, %v2723_v17, 0.0  ;;  %v2883_v27 = vmul.f32 %v2879_v18, %v2879_v18 }
 0x468   :  { %v2726_v29 = vrot.slane %v2725_v23, 4  ;;  %v2740_v30 = vrot.slane %v2739_v26, 4  ;;  %v2722_v34 = vmul.f32 %v2718_v19, %v2718_v19  ;;  %v2878_v7 = vsub.f32 %v6503_v2, %v6537_v12 }
 0x469   :  { %v2889_v21 = vrot.slane %v2881_v24, 4  ;;  %v2891_v37 = vrot.slane %v2883_v27, 4  ;;  %v2720_v38 = vsub.f32 %v6505_v3, %v6539_v13  ;;  %v6547_v42 = vmul.f32 0.25, %v2872_v22 }
 0x46a   :  { %v2727_v43 = vadd.f32 %v2726_v29, %v2725_v23  ;;  %v2741_v44 = vadd.f32 %v2740_v30, %v2739_v26  ;;  %v2732_v48 = vsel %vm587_vm0, %v2722_v34, 0.0  ;;  %v2882_v49 = vmul.f32 %v2878_v7, %v2878_v7 }
 0x46b   :  { %v2897_v50 = vsel %vm587_vm0, %v2889_v21, 0.0  ;;  %v2911_v51 = vsel %vm587_vm0, %v2891_v37, 0.0  ;;  %v2733_v28 = vrot.slane %v2732_v48, 4  ;;  %v2724_v53 = vmul.f32 %v2720_v38, %v2720_v38 }
 0x46c   :  { %v2728_v54 = vrot.slane %v2727_v43, 2  ;;  %v2898_v55 = vrot.slane %v2897_v50, 4  ;;  %v2742_v56 = vrot.slane %v2741_v44, 2  ;;  %v2912_v36 = vrot.slane %v2911_v51, 4 }
 0x46d   :  { %v2734_v57 = vadd.f32 %v2733_v28, %v2732_v48  ;;  %v2890_v58 = vrot.slane %v2882_v49, 4  ;;  %v2746_v59 = vsel %vm587_vm0, %v2724_v53, 0.0  ;;  %v2880_v40 = vsub.f32 %v6505_v3, %v6547_v42 }
 0x46e   :  { %v2729_v60 = vadd.f32 %v2728_v54, %v2727_v43  ;;  %v2899_v61 = vadd.f32 %v2898_v55, %v2897_v50  ;;  %v2743_v41 = vadd.f32 %v2742_v56, %v2741_v44  ;;  %v2913_v63 = vadd.f32 %v2912_v36, %v2911_v51 }
 0x46f   :  { %v2735_v1 = vrot.slane %v2734_v57, 2  ;;  %v2904_v25 = vsel %vm587_vm0, %v2890_v58, 0.0  ;;  %v2747_v52 = vrot.slane %v2746_v59, 4  ;;  %v2884_v46 = vmul.f32 %v2880_v40, %v2880_v40 }
 0x470   :  { %v2730_v47 = vrot.slane %v2729_v60, 1  ;;  %v2900_v4 = vrot.slane %v2899_v61, 2  ;;  %v2744_v8 = vrot.slane %v2743_v41, 1  ;;  %v2914_v11 = vrot.slane %v2913_v63, 2 }
 0x471   :  { %v2736_v14 = vadd.f32 %v2735_v1, %v2734_v57  ;;  %v2905_v6 = vrot.slane %v2904_v25, 4  ;;  %v2748_v15 = vadd.f32 %v2747_v52, %v2746_v59  ;;  %v2892_v16 = vrot.slane %v2884_v46, 4 }
 0x472   :  { %v2731_v17 = vadd.f32 %v2730_v47, %v2729_v60  ;;  %v2901_v18 = vadd.f32 %v2900_v4, %v2899_v61  ;;  %v2745_v19 = vadd.f32 %v2744_v8, %v2743_v41  ;;  %v2915_v22 = vadd.f32 %v2914_v11, %v2913_v63 }
 0x473   :  { %v2737_v23 = vrot.slane %v2736_v14, 1  ;;  %v2906_v24 = vadd.f32 %v2905_v6, %v2904_v25  ;;  %v2749_v26 = vrot.slane %v2748_v15, 2  ;;  %v2918_v27 = vsel %vm587_vm0, %v2892_v16, 0.0  ;;  %v2678_v29 = vpop.f32.mrf.mxu0 }
 0x474   :  { %v2753_v30 = vmul.f32 0.25, %v2731_v17  ;;  %v2902_v34 = vrot.slane %v2901_v18, 1  ;;  %v2755_v7 = vmul.f32 0.25, %v2745_v19  ;;  %v2916_v21 = vrot.slane %v2915_v22, 1  ;;  %2684 = vst [vmem:[#allocation13] sm:$0xff] %v2678_v29 }
 0x475   :  { %v2738_v37 = vadd.f32 %v2737_v23, %v2736_v14  ;;  %v2907_v38 = vrot.slane %v2906_v24, 2  ;;  %v2750_v43 = vadd.f32 %v2749_v26, %v2748_v15  ;;  %v2919_v44 = vrot.slane %v2918_v27, 4  ;;  %v5303_v48 = vpop.f32.mrf.mxu0  ;;  %v5795_v23 = vld [vmem:[%s6764_s2 + $0x10] sm:$0xff] }
 0x476   :  { %v2757_v49 = vadd.f32 1e-05, %v2753_v30  ;;  %v2903_v50 = vadd.f32 %v2902_v34, %v2901_v18  ;;  %v2759_v51 = vadd.f32 1e-05, %v2755_v7  ;;  %v2917_v28 = vadd.f32 %v2916_v21, %v2915_v22  ;;  %v5794_v18 = vld [vmem:[%s6764_s2] sm:$0xff]  ;;  %v5796_v34 = vld [vmem:[%s6764_s2 + $0x8] sm:$0xff] }
 0x477   :  { %v2754_v53 = vmul.f32 0.25, %v2738_v37  ;;  %v2908_v54 = vadd.f32 %v2907_v38, %v2906_v24  ;;  %v2751_v55 = vrot.slane %v2750_v43, 1  ;;  %v2920_v56 = vadd.f32 %v2919_v44, %v2918_v27  ;;  %v2681_v36 = vpop.f32.mrf.mxu0 }
 0x478   :  { %5778 = vrsqrt.f32 %v2757_v49  ;;  %v2925_v57 = vmul.f32 0.25, %v2903_v50  ;;  %v2927_v58 = vmul.f32 0.25, %v2917_v28  ;;  %v6561_v22 = vsub.s32 4, %v6381_v31 }
 0x479   :  { %5780 = vrsqrt.f32 %v2759_v51  ;;  %v2758_v59 = vadd.f32 1e-05, %v2754_v53  ;;  %v2909_v40 = vrot.slane %v2908_v54, 1  ;;  %v2752_v60 = vadd.f32 %v2751_v55, %v2750_v43  ;;  %v5304_v61 = vpop.f32.mrf.mxu0 }
 0x47a   :  { %v2929_v41 = vadd.f32 1e-05, %v2925_v57  ;;  %v2931_v63 = vadd.f32 1e-05, %v2927_v58  ;;  %v2921_v1 = vrot.slane %v2920_v56, 2  ;;  %v6573_v43 = vsub.s32 5, %v6381_v31 }
 0x47b   :  { %5782 = vrsqrt.f32 %v2758_v59  ;;  %v2910_v25 = vadd.f32 %v2909_v40, %v2908_v54  ;;  %v2756_v52 = vmul.f32 0.25, %v2752_v60 }
 0x47c   :  { %5784 = vrsqrt.f32 %v2929_v41  ;;  %v2922_v46 = vadd.f32 %v2921_v1, %v2920_v56 }
 0x47d   :  { %5786 = vrsqrt.f32 %v2931_v63  ;;  %v2926_v47 = vmul.f32 0.25, %v2910_v25  ;;  %v2760_v4 = vadd.f32 1e-05, %v2756_v52 }
 0x47e   :  { %v2923_v8 = vrot.slane %v2922_v46, 1 }
 0x47f   :  { %v2930_v11 = vadd.f32 1e-05, %v2926_v47  ;;  %5788 = vrsqrt.f32 %v2760_v4 }
 0x480   :  { %v2924_v14 = vadd.f32 %v2923_v8, %v2922_v46 }
 0x481   :  { %5790 = vrsqrt.f32 %v2930_v11 }
 0x482   :  { %v2928_v6 = vmul.f32 0.25, %v2924_v14 }
 0x484   :  { %v2932_v15 = vadd.f32 1e-05, %v2928_v6 }
 0x485   :  { %v5779_v16 = vpop.eup %5778 }
 0x486   :  { %v5781_v17 = vpop.eup %5780  ;;  %v2765_v19 = vmul.f32 %v5794_v18, %v5779_v16  ;;  %5792 = vrsqrt.f32 %v2932_v15 }
 0x487   :  { %v2767_v24 = vmul.f32 %v5795_v23, %v5781_v17 }
 0x488   :  { %v5783_v26 = vpop.eup %5782  ;;  %v2769_v27 = vmul.f32 %v2765_v19, %v6517_v20  ;;  %v2792_v38 = vrot.slane %v2765_v19, %v6561_v22 }
 0x489   :  { %v5785_v29 = vpop.eup %5784  ;;  %v2771_v30 = vmul.f32 %v2767_v24, %v6519_v0  ;;  %v2766_v7 = vmul.f32 %v5796_v34, %v5783_v26  ;;  %v2800_v49 = vrot.slane %v2767_v24, %v6561_v22 }
 0x48a   :  { %v5787_v21 = vpop.eup %5786  ;;  %v2777_v37 = vrot.slane %v2769_v27, 7  ;;  %v2937_v44 = vmul.f32 %v5794_v18, %v5785_v29  ;;  %v2805_v57 = vmul.f32 %v2792_v38, %v6493_v62 }
 0x48b   :  { %v2779_v48 = vrot.slane %v2771_v30, 7  ;;  %v2939_v20 = vmul.f32 %v5795_v23, %v5787_v21  ;;  %v2770_v50 = vmul.f32 %v2766_v7, %v6529_v10  ;;  %v2807_v40 = vmul.f32 %v2800_v49, %v6495_v45 }
 0x48c   :  { %v2785_v0 = vsub.f32 %v5794_v18, %v2777_v37  ;;  %v2941_v51 = vmul.f32 %v2937_v44, %v6523_v5  ;;  %v5789_v28 = vpop.eup %5788  ;;  %v2964_v53 = vrot.slane %v2937_v44, %v6561_v22  ;;  %v2796_v46 = vrot.slane %v2766_v7, %v6561_v22 }
 0x48d   :  { %v2787_v54 = vsub.f32 %v5795_v23, %v2779_v48  ;;  %v2943_v55 = vmul.f32 %v2939_v20, %v6527_v9  ;;  %v2778_v56 = vrot.slane %v2770_v50, 7  ;;  %v2972_v5 = vrot.slane %v2939_v20, %v6561_v22  ;;  %v5797_v9 = vld [vmem:[%s6764_s2 + $0x18] sm:$0xff] }
 0x48e   :  { %v5791_v36 = vpop.eup %5790  ;;  %v2812_v58 = vrot.slane %v2785_v0, %v6573_v43  ;;  %v2949_v59 = vrot.slane %v2941_v51, 7  ;;  %v2768_v1 = vmul.f32 %v5797_v9, %v5789_v28  ;;  %v2977_v25 = vmul.f32 %v2964_v53, %v6493_v62 }
 0x48f   :  { %v2820_v10 = vrot.slane %v2787_v54, %v6573_v43  ;;  %v2951_v60 = vrot.slane %v2943_v55, 7  ;;  %v2786_v41 = vsub.f32 %v5796_v34, %v2778_v56  ;;  %v2938_v63 = vmul.f32 %v5796_v34, %v5791_v36 }
 0x490   :  { %v2957_v61 = vsub.f32 %v5794_v18, %v2949_v59  ;;  %v2825_v47 = vadd.f32 %v2812_v58, %v2805_v57  ;;  %v2979_v6 = vmul.f32 %v2972_v5, %v6495_v45  ;;  %v2772_v16 = vmul.f32 %v2768_v1, %v6539_v13 }
 0x491   :  { %v2959_v52 = vsub.f32 %v5795_v23, %v2951_v60  ;;  %v2827_v8 = vadd.f32 %v2820_v10, %v2807_v40  ;;  %v2942_v11 = vmul.f32 %v2938_v63, %v6537_v12  ;;  %v2816_v18 = vrot.slane %v2786_v41, %v6573_v43 }
 0x492   :  { %v2984_v4 = vrot.slane %v2957_v61, %v6573_v43  ;;  %v2968_v19 = vrot.slane %v2938_v63, %v6561_v22  ;;  %v2806_v24 = vmul.f32 %v2796_v46, %v6503_v2  ;;  %v2780_v26 = vrot.slane %v2772_v16, 7 }
 0x493   :  { %v5793_v14 = vpop.eup %5792  ;;  %v2992_v15 = vrot.slane %v2959_v52, %v6573_v43  ;;  %v2950_v62 = vrot.slane %v2942_v11, 7  ;;  %v2829_v29 = vmax.f32 %v2825_v47, 0.0  ;;  %v2831_v30 = vmax.f32 %v2827_v8, 0.0 }
 0x494   :  { %v2997_v17 = vadd.f32 %v2984_v4, %v2977_v25  ;;  %v2940_v27 = vmul.f32 %v5797_v9, %v5793_v14  ;;  %v2788_v21 = vsub.f32 %v5797_v9, %v2780_v26  ;;  %v2804_v37 = vrot.slane %v2768_v1, %v6561_v22 }
 0x495   :  { %v2999_v23 = vadd.f32 %v2992_v15, %v2979_v6  ;;  %v2958_v7 = vsub.f32 %v5796_v34, %v2950_v62  ;;  %v2826_v44 = vadd.f32 %v2816_v18, %v2806_v24  ;;  %v2978_v48 = vmul.f32 %v2968_v19, %v6503_v2 }
 0x496   :  { %v3001_v12 = vmax.f32 %v2997_v17, 0.0  ;;  %v2944_v13 = vmul.f32 %v2940_v27, %v6547_v42  ;;  %v2824_v50 = vrot.slane %v2788_v21, %v6573_v43  ;;  %v2976_v0 = vrot.slane %v2940_v27, %v6561_v22 }
 0x497   :  { %v3003_v45 = vmax.f32 %v2999_v23, 0.0  ;;  %v2988_v49 = vrot.slane %v2958_v7, %v6573_v43  ;;  %v2808_v28 = vmul.f32 %v2804_v37, %v6505_v3  ;;  %v2830_v53 = vmax.f32 %v2826_v44, 0.0 }
 0x498   :  { %v6601_v38 = vsel %vm587_vm0, %v2829_v29, %v3001_v12  ;;  %v2952_v34 = vrot.slane %v2944_v13, 7  ;;  %v2980_v56 = vmul.f32 %v2976_v0, %v6505_v3 }
 0x499   :  { %v6606_v20 = vsel %vm587_vm0, %v2831_v30, %v3003_v45  ;;  %v2998_v51 = vadd.f32 %v2988_v49, %v2978_v48  ;;  %v2828_v55 = vadd.f32 %v2824_v50, %v2808_v28 }
 0x49a   :  { %v2960_v42 = vsub.f32 %v5797_v9, %v2952_v34 }
 0x49b   :  { %v3002_v54 = vmax.f32 %v2998_v51, 0.0  ;;  %v2832_v58 = vmax.f32 %v2828_v55, 0.0 }
 0x49c   :  { %v2996_v2 = vrot.slane %v2960_v42, %v6573_v43 }
 0x49d   :  { %v3006_v36 = vsel %vm587_vm0, %v2830_v53, %v3002_v54 }
 0x49e   :  { %v3000_v57 = vadd.f32 %v2996_v2, %v2980_v56 }
 0x4a0   :  { %v3004_v59 = vmax.f32 %v3000_v57, 0.0 }
 0x4a2   :  { %v3008_v40 = vsel %vm587_vm0, %v2832_v58, %v3004_v59 }
 0x4a3   :  { %6248 = dma.done.wait [#allocation4], 16384 }
 0x4a4   :  { %6249 = vsyncadd [#allocation4], 4294950912  ;;  %v6615_v22 = vpack.c.bf16 %v3006_v36, %v3006_v36  ;;  %v6617_v10 = vpack.c.bf16 %v3008_v40, %v3008_v40  ;;  %v5798_v3 = vld [vmem:[#allocation2 + $0xe4] ss:$16 sps:$4 sm:$0xff]   ;;  %v5802_v43 = vld [vmem:[#allocation2 + $0xe0] ss:$16 sps:$4 sm:$0xff]  }
 0x4a5   :  { %v5800_v60 = vld [vmem:[#allocation2 + $0x2e4] ss:$16 sps:$4 sm:$0xff]   ;;  %3785 = vmatprep.subr.bf16.mxu1 %v5798_v3  ;;  %v5803_v5 = vld [vmem:[#allocation2 + $0x2e0] ss:$16 sps:$4 sm:$0xff]  }
 0x4a6   :  { %3817 = vmatprep.mubr.bf16.mxu1 %v6615_v22  ;;  %3858 = vmatprep.mubr.bf16.mxu0 %v6617_v10  ;;  %v5804_v61 = vld [vmem:[#allocation2 + $0xc4] ss:$16 sps:$4 sm:$0xff]   ;;  %v5808_v63 = vld [vmem:[#allocation2 + $0xc0] ss:$16 sps:$4 sm:$0xff]  }
 0x4a7   :  { %3826 = vmatprep.subr.bf16.mxu0 %v5800_v60  ;;  %3786 = vmatpush1.bf16.msra.mxu1 %v5802_v43  ;;  %v5806_v41 = vld [vmem:[#allocation2 + $0x2c4] ss:$16 sps:$4 sm:$0xff]   ;;  %v5809_v9 = vld [vmem:[#allocation2 + $0x2c0] ss:$16 sps:$4 sm:$0xff]  }
 0x4a8   :  { %3827 = vmatpush1.bf16.msra.mxu0 %v5803_v5  ;;  %3787 = vmatprep.subr.bf16.mxu1 %v5804_v61  ;;  %v5810_v1 = vld [vmem:[#allocation2 + $0xa4] ss:$16 sps:$4 sm:$0xff]   ;;  %v5814_v52 = vld [vmem:[#allocation2 + $0xa0] ss:$16 sps:$4 sm:$0xff]  }
 0x4a9   :  { %3828 = vmatprep.subr.bf16.mxu0 %v5806_v41  ;;  %v5812_v25 = vld [vmem:[#allocation2 + $0x2a4] ss:$16 sps:$4 sm:$0xff]   ;;  %v5815_v46 = vld [vmem:[#allocation2 + $0x2a0] ss:$16 sps:$4 sm:$0xff]  }
 0x4aa   :  { %v5816_v47 = vld [vmem:[#allocation2 + $0x84] ss:$16 sps:$4 sm:$0xff]   ;;  %v5820_v8 = vld [vmem:[#allocation2 + $0x80] ss:$16 sps:$4 sm:$0xff]  }
 0x4ab   :  { %3788 = vmatpush1.bf16.msra.mxu1 %v5808_v63  ;;  %v5818_v4 = vld [vmem:[#allocation2 + $0x284] ss:$16 sps:$4 sm:$0xff]   ;;  %v5821_v11 = vld [vmem:[#allocation2 + $0x280] ss:$16 sps:$4 sm:$0xff]  }
 0x4ac   :  { %3829 = vmatpush1.bf16.msra.mxu0 %v5809_v9  ;;  %3789 = vmatprep.subr.bf16.mxu1 %v5810_v1  ;;  %v5822_v14 = vld [vmem:[#allocation2 + $0x64] ss:$16 sps:$4 sm:$0xff]   ;;  %v5826_v15 = vld [vmem:[#allocation2 + $0x60] ss:$16 sps:$4 sm:$0xff]  }
 0x4ad   :  { %3830 = vmatprep.subr.bf16.mxu0 %v5812_v25  ;;  %v5824_v6 = vld [vmem:[#allocation2 + $0x264] ss:$16 sps:$4 sm:$0xff]   ;;  %v5827_v16 = vld [vmem:[#allocation2 + $0x260] ss:$16 sps:$4 sm:$0xff]   ;;  %v5896_v25 = vld [vmem:[#allocation2 + $0xec] ss:$16 sps:$4 sm:$0xff]  }
 0x4ae   :  { %v5828_v17 = vld [vmem:[#allocation2 + $0x44] ss:$16 sps:$4 sm:$0xff]   ;;  %v5832_v62 = vld [vmem:[#allocation2 + $0x40] ss:$16 sps:$4 sm:$0xff]  }
 0x4af   :  { %3790 = vmatpush1.bf16.msra.mxu1 %v5814_v52  ;;  %v5830_v18 = vld [vmem:[#allocation2 + $0x244] ss:$16 sps:$4 sm:$0xff]   ;;  %v5833_v19 = vld [vmem:[#allocation2 + $0x240] ss:$16 sps:$4 sm:$0xff]   ;;  %v5899_v52 = vld [vmem:[#allocation2 + $0x2ec] ss:$16 sps:$4 sm:$0xff]  }
 0x4b0   :  { %3831 = vmatpush1.bf16.msra.mxu0 %v5815_v46  ;;  %3791 = vmatprep.subr.bf16.mxu1 %v5816_v47  ;;  %v5834_v23 = vld [vmem:[#allocation2 + $0x24] ss:$16 sps:$4 sm:$0xff]   ;;  %v5838_v26 = vld [vmem:[#allocation2 + $0x20] ss:$16 sps:$4 sm:$0xff]   ;;  %v6623_v46 = vpack.c.bf16 %v6601_v38, %v6601_v38  ;;  %v6627_v47 = vpack.c.bf16 %v6606_v20, %v6606_v20  ;;  %v5908_v38 = vld [vmem:[#allocation2 + $0xac] ss:$16 sps:$4 sm:$0xff]  }
 0x4b1   :  { %3832 = vmatprep.subr.bf16.mxu0 %v5818_v4  ;;  %v5836_v24 = vld [vmem:[#allocation2 + $0x224] ss:$16 sps:$4 sm:$0xff]   ;;  %v5839_v27 = vld [vmem:[#allocation2 + $0x220] ss:$16 sps:$4 sm:$0xff]   ;;  %v5894_v4 = vld [vmem:[#allocation2 + $0xe8] ss:$16 sps:$4 sm:$0xff]  }
 0x4b2   :  { %v5840_v29 = vld [vmem:[#allocation2 + $0x4] ss:$16 sps:$4 sm:$0xff]   ;;  %v5844_v30 = vld [vmem:[#allocation2] ss:$16 sps:$4 sm:$0xff]   ;;  %v5911_v20 = vld [vmem:[#allocation2 + $0x2ac] ss:$16 sps:$4 sm:$0xff]  }
 0x4b3   :  { %3792 = vmatpush1.bf16.msra.mxu1 %v5820_v8  ;;  %v5842_v12 = vld [vmem:[#allocation2 + $0x204] ss:$16 sps:$4 sm:$0xff]   ;;  %v5845_v7 = vld [vmem:[#allocation2 + $0x200] ss:$16 sps:$4 sm:$0xff]   ;;  %v5897_v8 = vld [vmem:[#allocation2 + $0x2e8] ss:$16 sps:$4 sm:$0xff]  }
 0x4b4   :  { %3833 = vmatpush1.bf16.msra.mxu0 %v5821_v11  ;;  %3793 = vmatprep.subr.bf16.mxu1 %v5822_v14  ;;  %v5846_v45 = vld [vmem:[#allocation2 + $0x1e4] ss:$16 sps:$4 sm:$0xff]   ;;  %v5850_v37 = vld [vmem:[#allocation2 + $0x1e0] ss:$16 sps:$4 sm:$0xff]   ;;  %v5902_v11 = vld [vmem:[#allocation2 + $0xcc] ss:$16 sps:$4 sm:$0xff]  }
 0x4b5   :  { %3834 = vmatprep.subr.bf16.mxu0 %v5824_v6  ;;  %v5848_v21 = vld [vmem:[#allocation2 + $0x3e4] ss:$16 sps:$4 sm:$0xff]   ;;  %v5851_v13 = vld [vmem:[#allocation2 + $0x3e0] ss:$16 sps:$4 sm:$0xff]   ;;  %v5905_v14 = vld [vmem:[#allocation2 + $0x2cc] ss:$16 sps:$4 sm:$0xff]  }
 0x4b6   :  { %v5852_v44 = vld [vmem:[#allocation2 + $0x1c4] ss:$16 sps:$4 sm:$0xff]   ;;  %v5856_v49 = vld [vmem:[#allocation2 + $0x1c0] ss:$16 sps:$4 sm:$0xff]   ;;  %v5900_v6 = vld [vmem:[#allocation2 + $0xc8] ss:$16 sps:$4 sm:$0xff]  }
 0x4b7   :  { %3794 = vmatpush1.bf16.msra.mxu1 %v5826_v15  ;;  %v5854_v48 = vld [vmem:[#allocation2 + $0x3c4] ss:$16 sps:$4 sm:$0xff]   ;;  %v5857_v50 = vld [vmem:[#allocation2 + $0x3c0] ss:$16 sps:$4 sm:$0xff]   ;;  %v5903_v15 = vld [vmem:[#allocation2 + $0x2c8] ss:$16 sps:$4 sm:$0xff]  }
 0x4b8   :  { %3835 = vmatpush1.bf16.msra.mxu0 %v5827_v16  ;;  %3795 = vmatprep.subr.bf16.mxu1 %v5828_v17  ;;  %v5858_v34 = vld [vmem:[#allocation2 + $0x1a4] ss:$16 sps:$4 sm:$0xff]   ;;  %v5862_v51 = vld [vmem:[#allocation2 + $0x1a0] ss:$16 sps:$4 sm:$0xff]   ;;  %v5906_v16 = vld [vmem:[#allocation2 + $0xa8] ss:$16 sps:$4 sm:$0xff]  }
 0x4b9   :  { %3836 = vmatprep.subr.bf16.mxu0 %v5830_v18  ;;  %v5860_v0 = vld [vmem:[#allocation2 + $0x3a4] ss:$16 sps:$4 sm:$0xff]   ;;  %v5863_v28 = vld [vmem:[#allocation2 + $0x3a0] ss:$16 sps:$4 sm:$0xff]   ;;  %v5909_v17 = vld [vmem:[#allocation2 + $0x2a8] ss:$16 sps:$4 sm:$0xff]  }
 0x4ba   :  { %v5864_v42 = vld [vmem:[#allocation2 + $0x184] ss:$16 sps:$4 sm:$0xff]   ;;  %v5868_v54 = vld [vmem:[#allocation2 + $0x180] ss:$16 sps:$4 sm:$0xff]   ;;  %v5914_v18 = vld [vmem:[#allocation2 + $0x8c] ss:$16 sps:$4 sm:$0xff]  }
 0x4bb   :  { %3796 = vmatpush1.bf16.msra.mxu1 %v5832_v62  ;;  %v5866_v53 = vld [vmem:[#allocation2 + $0x384] ss:$16 sps:$4 sm:$0xff]   ;;  %v5869_v55 = vld [vmem:[#allocation2 + $0x380] ss:$16 sps:$4 sm:$0xff]   ;;  %v5917_v62 = vld [vmem:[#allocation2 + $0x28c] ss:$16 sps:$4 sm:$0xff]  }
 0x4bc   :  { %3837 = vmatpush1.bf16.msra.mxu0 %v5833_v19  ;;  %3797 = vmatprep.subr.bf16.mxu1 %v5834_v23  ;;  %v5870_v56 = vld [vmem:[#allocation2 + $0x164] ss:$16 sps:$4 sm:$0xff]   ;;  %v5874_v36 = vld [vmem:[#allocation2 + $0x160] ss:$16 sps:$4 sm:$0xff]   ;;  %v5912_v19 = vld [vmem:[#allocation2 + $0x88] ss:$16 sps:$4 sm:$0xff]  }
 0x4bd   :  { %3838 = vmatprep.subr.bf16.mxu0 %v5836_v24  ;;  %v5872_v2 = vld [vmem:[#allocation2 + $0x364] ss:$16 sps:$4 sm:$0xff]   ;;  %v5875_v57 = vld [vmem:[#allocation2 + $0x360] ss:$16 sps:$4 sm:$0xff]   ;;  %v5915_v23 = vld [vmem:[#allocation2 + $0x288] ss:$16 sps:$4 sm:$0xff]  }
 0x4be   :  { %v5876_v58 = vld [vmem:[#allocation2 + $0x144] ss:$16 sps:$4 sm:$0xff]   ;;  %v5880_v40 = vld [vmem:[#allocation2 + $0x140] ss:$16 sps:$4 sm:$0xff]   ;;  %v5920_v24 = vld [vmem:[#allocation2 + $0x6c] ss:$16 sps:$4 sm:$0xff]  }
 0x4bf   :  { %3798 = vmatpush1.bf16.msra.mxu1 %v5838_v26  ;;  %v5878_v59 = vld [vmem:[#allocation2 + $0x344] ss:$16 sps:$4 sm:$0xff]   ;;  %v5881_v3 = vld [vmem:[#allocation2 + $0x340] ss:$16 sps:$4 sm:$0xff]   ;;  %v5923_v26 = vld [vmem:[#allocation2 + $0x26c] ss:$16 sps:$4 sm:$0xff]  }
 0x4c0   :  { %3839 = vmatpush1.bf16.msra.mxu0 %v5839_v27  ;;  %3799 = vmatprep.subr.bf16.mxu1 %v5840_v29  ;;  %v5882_v60 = vld [vmem:[#allocation2 + $0x124] ss:$16 sps:$4 sm:$0xff]   ;;  %v5886_v5 = vld [vmem:[#allocation2 + $0x120] ss:$16 sps:$4 sm:$0xff]   ;;  %v5918_v27 = vld [vmem:[#allocation2 + $0x68] ss:$16 sps:$4 sm:$0xff]  }
 0x4c1   :  { %3840 = vmatprep.subr.bf16.mxu0 %v5842_v12  ;;  %v5884_v43 = vld [vmem:[#allocation2 + $0x324] ss:$16 sps:$4 sm:$0xff]   ;;  %v5887_v61 = vld [vmem:[#allocation2 + $0x320] ss:$16 sps:$4 sm:$0xff]   ;;  %v5929_v29 = vld [vmem:[#allocation2 + $0x24c] ss:$16 sps:$4 sm:$0xff]  }
 0x4c2   :  { %v5888_v41 = vld [vmem:[#allocation2 + $0x104] ss:$16 sps:$4 sm:$0xff]   ;;  %v5892_v9 = vld [vmem:[#allocation2 + $0x100] ss:$16 sps:$4 sm:$0xff]   ;;  %v5924_v12 = vld [vmem:[#allocation2 + $0x48] ss:$16 sps:$4 sm:$0xff]  }
 0x4c3   :  { %3800 = vmatpush1.bf16.msra.mxu1 %v5844_v30  ;;  %v5890_v63 = vld [vmem:[#allocation2 + $0x304] ss:$16 sps:$4 sm:$0xff]   ;;  %v5893_v1 = vld [vmem:[#allocation2 + $0x300] ss:$16 sps:$4 sm:$0xff]   ;;  %v5927_v30 = vld [vmem:[#allocation2 + $0x248] ss:$16 sps:$4 sm:$0xff]  }
 0x4c4   :  { %3841 = vmatpush1.bf16.msra.mxu0 %v5845_v7  ;;  %3801 = vmatprep.subr.bf16.mxu1 %v5846_v45  ;;  %v5932_v7 = vld [vmem:[#allocation2 + $0x2c] ss:$16 sps:$4 sm:$0xff]  }
 0x4c5   :  { %3842 = vmatprep.subr.bf16.mxu0 %v5848_v21  ;;  %v5935_v45 = vld [vmem:[#allocation2 + $0x22c] ss:$16 sps:$4 sm:$0xff]   ;;  %v5930_v21 = vld [vmem:[#allocation2 + $0x28] ss:$16 sps:$4 sm:$0xff]  }
 0x4c7   :  { %3802 = vmatpush2.bf16.msra.mxu1 %v5850_v37  ;;  %v5933_v37 = vld [vmem:[#allocation2 + $0x228] ss:$16 sps:$4 sm:$0xff]  }
 0x4c8   :  { %3843 = vmatpush2.bf16.msra.mxu0 %v5851_v13  ;;  %3803 = vmatprep.subr.bf16.mxu1 %v5852_v44  ;;  %v5938_v13 = vld [vmem:[#allocation2 + $0xc] ss:$16 sps:$4 sm:$0xff]  }
 0x4c9   :  { %3844 = vmatprep.subr.bf16.mxu0 %v5854_v48  ;;  %v5941_v44 = vld [vmem:[#allocation2 + $0x20c] ss:$16 sps:$4 sm:$0xff]   ;;  %v5936_v48 = vld [vmem:[#allocation2 + $0x8] ss:$16 sps:$4 sm:$0xff]  }
 0x4cb   :  { %3804 = vmatpush2.bf16.msra.mxu1 %v5856_v49  ;;  %v5939_v49 = vld [vmem:[#allocation2 + $0x208] ss:$16 sps:$4 sm:$0xff]  }
 0x4cc   :  { %3845 = vmatpush2.bf16.msra.mxu0 %v5857_v50  ;;  %3805 = vmatprep.subr.bf16.mxu1 %v5858_v34  ;;  %v5944_v50 = vld [vmem:[#allocation2 + $0x1ec] ss:$16 sps:$4 sm:$0xff]  }
 0x4cd   :  { %3846 = vmatprep.subr.bf16.mxu0 %v5860_v0  ;;  %v5947_v34 = vld [vmem:[#allocation2 + $0x3ec] ss:$16 sps:$4 sm:$0xff]   ;;  %v5942_v0 = vld [vmem:[#allocation2 + $0x1e8] ss:$16 sps:$4 sm:$0xff]  }
 0x4cf   :  { %3806 = vmatpush2.bf16.msra.mxu1 %v5862_v51  ;;  %v5945_v51 = vld [vmem:[#allocation2 + $0x3e8] ss:$16 sps:$4 sm:$0xff]  }
 0x4d0   :  { %3847 = vmatpush2.bf16.msra.mxu0 %v5863_v28  ;;  %3807 = vmatprep.subr.bf16.mxu1 %v5864_v42  ;;  %v5950_v28 = vld [vmem:[#allocation2 + $0x1cc] ss:$16 sps:$4 sm:$0xff]  }
 0x4d1   :  { %3848 = vmatprep.subr.bf16.mxu0 %v5866_v53  ;;  %v5953_v42 = vld [vmem:[#allocation2 + $0x3cc] ss:$16 sps:$4 sm:$0xff]   ;;  %v5948_v53 = vld [vmem:[#allocation2 + $0x1c8] ss:$16 sps:$4 sm:$0xff]  }
 0x4d3   :  { %3808 = vmatpush2.bf16.msra.mxu1 %v5868_v54  ;;  %v5951_v54 = vld [vmem:[#allocation2 + $0x3c8] ss:$16 sps:$4 sm:$0xff]  }
 0x4d4   :  { %3849 = vmatpush2.bf16.msra.mxu0 %v5869_v55  ;;  %3809 = vmatprep.subr.bf16.mxu1 %v5870_v56  ;;  %v5956_v55 = vld [vmem:[#allocation2 + $0x1ac] ss:$16 sps:$4 sm:$0xff]  }
 0x4d5   :  { %3850 = vmatprep.subr.bf16.mxu0 %v5872_v2  ;;  %v5959_v56 = vld [vmem:[#allocation2 + $0x3ac] ss:$16 sps:$4 sm:$0xff]   ;;  %v5954_v2 = vld [vmem:[#allocation2 + $0x1a8] ss:$16 sps:$4 sm:$0xff]  }
 0x4d7   :  { %3810 = vmatpush2.bf16.msra.mxu1 %v5874_v36  ;;  %v5957_v36 = vld [vmem:[#allocation2 + $0x3a8] ss:$16 sps:$4 sm:$0xff]  }
 0x4d8   :  { %3851 = vmatpush2.bf16.msra.mxu0 %v5875_v57  ;;  %3811 = vmatprep.subr.bf16.mxu1 %v5876_v58  ;;  %v5962_v57 = vld [vmem:[#allocation2 + $0x18c] ss:$16 sps:$4 sm:$0xff]  }
 0x4d9   :  { %3852 = vmatprep.subr.bf16.mxu0 %v5878_v59  ;;  %v5965_v58 = vld [vmem:[#allocation2 + $0x38c] ss:$16 sps:$4 sm:$0xff]   ;;  %v5960_v59 = vld [vmem:[#allocation2 + $0x188] ss:$16 sps:$4 sm:$0xff]  }
 0x4db   :  { %3812 = vmatpush2.bf16.msra.mxu1 %v5880_v40  ;;  %v5963_v40 = vld [vmem:[#allocation2 + $0x388] ss:$16 sps:$4 sm:$0xff]  }
 0x4dc   :  { %3853 = vmatpush2.bf16.msra.mxu0 %v5881_v3  ;;  %3813 = vmatprep.subr.bf16.mxu1 %v5882_v60  ;;  %v5968_v3 = vld [vmem:[#allocation2 + $0x16c] ss:$16 sps:$4 sm:$0xff]  }
 0x4dd   :  { %3854 = vmatprep.subr.bf16.mxu0 %v5884_v43  ;;  %v5971_v60 = vld [vmem:[#allocation2 + $0x36c] ss:$16 sps:$4 sm:$0xff]   ;;  %v5966_v43 = vld [vmem:[#allocation2 + $0x168] ss:$16 sps:$4 sm:$0xff]  }
 0x4df   :  { %3814 = vmatpush2.bf16.msra.mxu1 %v5886_v5  ;;  %v5969_v5 = vld [vmem:[#allocation2 + $0x368] ss:$16 sps:$4 sm:$0xff]  }
 0x4e0   :  { %3855 = vmatpush2.bf16.msra.mxu0 %v5887_v61  ;;  %3815 = vmatprep.subr.bf16.mxu1 %v5888_v41  ;;  %v5974_v61 = vld [vmem:[#allocation2 + $0x14c] ss:$16 sps:$4 sm:$0xff]  }
 0x4e1   :  { %3856 = vmatprep.subr.bf16.mxu0 %v5890_v63  ;;  %v5977_v41 = vld [vmem:[#allocation2 + $0x34c] ss:$16 sps:$4 sm:$0xff]   ;;  %v5972_v63 = vld [vmem:[#allocation2 + $0x148] ss:$16 sps:$4 sm:$0xff]  }
 0x4e3   :  { %3816 = vmatpush2.bf16.msra.mxu1 %v5892_v9  ;;  %v5975_v9 = vld [vmem:[#allocation2 + $0x348] ss:$16 sps:$4 sm:$0xff]  }
 0x4e4   :  { %3857 = vmatpush2.bf16.msra.mxu0 %v5893_v1  ;;  %3867 = vmatprep.subr.bf16.mxu1 %v5896_v25  ;;  %v5980_v1 = vld [vmem:[#allocation2 + $0x12c] ss:$16 sps:$4 sm:$0xff]  }
 0x4e5   :  { %3908 = vmatprep.subr.bf16.mxu0 %v5899_v52  ;;  %v5983_v25 = vld [vmem:[#allocation2 + $0x32c] ss:$16 sps:$4 sm:$0xff]   ;;  %v5978_v52 = vld [vmem:[#allocation2 + $0x128] ss:$16 sps:$4 sm:$0xff]  }
 0x4e6   :  { %3818 = vmatmul.mubr.bf16.vlgmr.msra.gmra.mxu1 %v6623_v46 }
 0x4e7   :  { %3859 = vmatmul.mubr.bf16.vlgmr.msra.gmra.mxu0 %v6627_v47  ;;  %3868 = vmatpush1.bf16.msra.mxu1 %v5894_v4  ;;  %v5981_v4 = vld [vmem:[#allocation2 + $0x328] ss:$16 sps:$4 sm:$0xff]  }
 0x4e8   :  { %3909 = vmatpush1.bf16.msra.mxu0 %v5897_v8  ;;  %3869 = vmatprep.subr.bf16.mxu1 %v5902_v11  ;;  %v5986_v8 = vld [vmem:[#allocation2 + $0x10c] ss:$16 sps:$4 sm:$0xff]  }
 0x4e9   :  { %3910 = vmatprep.subr.bf16.mxu0 %v5905_v14  ;;  %3899 = vmatprep.mubr.bf16.mxu1 %v6615_v22  ;;  %v5921_v22 = vld [vmem:[#allocation2 + $0x268] ss:$16 sps:$4 sm:$0xff]   ;;  %v5989_v11 = vld [vmem:[#allocation2 + $0x30c] ss:$16 sps:$4 sm:$0xff]  }
 0x4ea   :  { %3940 = vmatprep.mubr.bf16.mxu0 %v6617_v10  ;;  %v5926_v10 = vld [vmem:[#allocation2 + $0x4c] ss:$16 sps:$4 sm:$0xff]   ;;  %v5984_v14 = vld [vmem:[#allocation2 + $0x108] ss:$16 sps:$4 sm:$0xff]  }
 0x4eb   :  { %3870 = vmatpush1.bf16.msra.mxu1 %v5900_v6  ;;  %v5987_v6 = vld [vmem:[#allocation2 + $0x308] ss:$16 sps:$4 sm:$0xff]  }
 0x4ec   :  { %3911 = vmatpush1.bf16.msra.mxu0 %v5903_v15  ;;  %3871 = vmatprep.subr.bf16.mxu1 %v5908_v38 }
 0x4ed   :  { %3912 = vmatprep.subr.bf16.mxu0 %v5911_v20 }
 0x4ef   :  { %3872 = vmatpush1.bf16.msra.mxu1 %v5906_v16 }
 0x4f0   :  { %3913 = vmatpush1.bf16.msra.mxu0 %v5909_v17  ;;  %3873 = vmatprep.subr.bf16.mxu1 %v5914_v18 }
 0x4f1   :  { %3914 = vmatprep.subr.bf16.mxu0 %v5917_v62 }
 0x4f3   :  { %3874 = vmatpush1.bf16.msra.mxu1 %v5912_v19 }
 0x4f4   :  { %3915 = vmatpush1.bf16.msra.mxu0 %v5915_v23  ;;  %3875 = vmatprep.subr.bf16.mxu1 %v5920_v24 }
 0x4f5   :  { %3916 = vmatprep.subr.bf16.mxu0 %v5923_v26 }
 0x4f7   :  { %3876 = vmatpush1.bf16.msra.mxu1 %v5918_v27 }
 0x4f8   :  { %3917 = vmatpush1.bf16.msra.mxu0 %v5921_v22  ;;  %3877 = vmatprep.subr.bf16.mxu1 %v5926_v10 }
 0x4f9   :  { %3918 = vmatprep.subr.bf16.mxu0 %v5929_v29 }
 0x4fb   :  { %3878 = vmatpush1.bf16.msra.mxu1 %v5924_v12 }
 0x4fc   :  { %3919 = vmatpush1.bf16.msra.mxu0 %v5927_v30  ;;  %3879 = vmatprep.subr.bf16.mxu1 %v5932_v7 }
 0x4fd   :  { %3920 = vmatprep.subr.bf16.mxu0 %v5935_v45 }
 0x4ff   :  { %3880 = vmatpush1.bf16.msra.mxu1 %v5930_v21 }
 0x500   :  { %3921 = vmatpush1.bf16.msra.mxu0 %v5933_v37  ;;  %3881 = vmatprep.subr.bf16.mxu1 %v5938_v13 }
 0x501   :  { %3922 = vmatprep.subr.bf16.mxu0 %v5941_v44 }
 0x503   :  { %3882 = vmatpush1.bf16.msra.mxu1 %v5936_v48 }
 0x504   :  { %3923 = vmatpush1.bf16.msra.mxu0 %v5939_v49  ;;  %3883 = vmatprep.subr.bf16.mxu1 %v5944_v50 }
 0x505   :  { %3924 = vmatprep.subr.bf16.mxu0 %v5947_v34 }
 0x507   :  { %3884 = vmatpush2.bf16.msra.mxu1 %v5942_v0 }
 0x508   :  { %3925 = vmatpush2.bf16.msra.mxu0 %v5945_v51  ;;  %3885 = vmatprep.subr.bf16.mxu1 %v5950_v28 }
 0x509   :  { %3926 = vmatprep.subr.bf16.mxu0 %v5953_v42 }
 0x50b   :  { %3886 = vmatpush2.bf16.msra.mxu1 %v5948_v53 }
 0x50c   :  { %3927 = vmatpush2.bf16.msra.mxu0 %v5951_v54  ;;  %3887 = vmatprep.subr.bf16.mxu1 %v5956_v55 }
 0x50d   :  { %3928 = vmatprep.subr.bf16.mxu0 %v5959_v56 }
 0x50f   :  { %3888 = vmatpush2.bf16.msra.mxu1 %v5954_v2 }
 0x510   :  { %3929 = vmatpush2.bf16.msra.mxu0 %v5957_v36  ;;  %3889 = vmatprep.subr.bf16.mxu1 %v5962_v57 }
 0x511   :  { %3930 = vmatprep.subr.bf16.mxu0 %v5965_v58 }
 0x513   :  { %3890 = vmatpush2.bf16.msra.mxu1 %v5960_v59 }
 0x514   :  { %3931 = vmatpush2.bf16.msra.mxu0 %v5963_v40  ;;  %3891 = vmatprep.subr.bf16.mxu1 %v5968_v3 }
 0x515   :  { %3932 = vmatprep.subr.bf16.mxu0 %v5971_v60 }
 0x517   :  { %3892 = vmatpush2.bf16.msra.mxu1 %v5966_v43 }
 0x518   :  { %3933 = vmatpush2.bf16.msra.mxu0 %v5969_v5  ;;  %3893 = vmatprep.subr.bf16.mxu1 %v5974_v61 }
 0x519   :  { %3934 = vmatprep.subr.bf16.mxu0 %v5977_v41 }
 0x51b   :  { %3894 = vmatpush2.bf16.msra.mxu1 %v5972_v63 }
 0x51c   :  { %3935 = vmatpush2.bf16.msra.mxu0 %v5975_v9  ;;  %3895 = vmatprep.subr.bf16.mxu1 %v5980_v1 }
 0x51d   :  { %3936 = vmatprep.subr.bf16.mxu0 %v5983_v25 }
 0x51f   :  { %3896 = vmatpush2.bf16.msra.mxu1 %v5978_v52 }
 0x520   :  { %3937 = vmatpush2.bf16.msra.mxu0 %v5981_v4  ;;  %3897 = vmatprep.subr.bf16.mxu1 %v5986_v8 }
 0x521   :  { %3938 = vmatprep.subr.bf16.mxu0 %v5989_v11 }
 0x523   :  { %3898 = vmatpush2.bf16.msra.mxu1 %v5984_v14 }
 0x524   :  { %3939 = vmatpush2.bf16.msra.mxu0 %v5987_v6 }
 0x526   :  { %3900 = vmatmul.mubr.bf16.vlgmr.msra.gmra.mxu1 %v6623_v46 }
 0x527   :  { %3941 = vmatmul.mubr.bf16.vlgmr.msra.gmra.mxu0 %v6627_v47 }
 0x5a6   :  { %v3819_v15 = vpop.f32.mrf.mxu1 }
 0x5a7   :  { %v3860_v38 = vpop.f32.mrf.mxu0 }
 0x5a8   :  { %v6635_v20 = vadd.f32 %v3860_v38, %v3819_v15  ;;  %v3821_v16 = vpop.f32.mrf.mxu1 }
 0x5a9   :  { %v3862_v17 = vpop.f32.mrf.mxu0 }
 0x5aa   :  { %v3949_v18 = vsel %vm587_vm0, %v6635_v20, 0.0  ;;  %v4101_v62 = vrot.slane %v6635_v20, 4  ;;  %v6640_v19 = vadd.f32 %v3862_v17, %v3821_v16  ;;  %v3823_v24 = vpop.f32.mrf.mxu1 }
 0x5ab   :  { %v3950_v23 = vrot.slane %v3949_v18, 4  ;;  %v3864_v26 = vpop.f32.mrf.mxu0 }
 0x5ac   :  { %v4109_v46 = vsel %vm587_vm0, %v4101_v62, 0.0  ;;  %v3956_v47 = vsel %vm587_vm0, %v6640_v19, 0.0  ;;  %v4102_v27 = vrot.slane %v6640_v19, 4  ;;  %v3824_v12 = vpop.f32.mrf.mxu1 }
 0x5ad   :  { %v3951_v22 = vadd.f32 %v3950_v23, %v3949_v18  ;;  %v4110_v10 = vrot.slane %v4109_v46, 4  ;;  %v3957_v29 = vrot.slane %v3956_v47, 4  ;;  %v3865_v30 = vpop.f32.mrf.mxu0 }
 0x5ae   :  { %v4116_v7 = vsel %vm587_vm0, %v4102_v27, 0.0 }
 0x5af   :  { %v3952_v45 = vrot.slane %v3951_v22, 2  ;;  %v4111_v21 = vadd.f32 %v4110_v10, %v4109_v46  ;;  %v3958_v37 = vadd.f32 %v3957_v29, %v3956_v47  ;;  %v4117_v13 = vrot.slane %v4116_v7, 4 }
 0x5b1   :  { %v3953_v44 = vadd.f32 %v3952_v45, %v3951_v22  ;;  %v4112_v48 = vrot.slane %v4111_v21, 2  ;;  %v3959_v49 = vrot.slane %v3958_v37, 2  ;;  %v4118_v50 = vadd.f32 %v4117_v13, %v4116_v7 }
 0x5b3   :  { %v3954_v34 = vrot.slane %v3953_v44, 1  ;;  %v4113_v0 = vadd.f32 %v4112_v48, %v4111_v21  ;;  %v3960_v51 = vadd.f32 %v3959_v49, %v3958_v37  ;;  %v4119_v28 = vrot.slane %v4118_v50, 2 }
 0x5b5   :  { %v3955_v42 = vadd.f32 %v3954_v34, %v3953_v44  ;;  %v4114_v53 = vrot.slane %v4113_v0, 1  ;;  %v3961_v54 = vrot.slane %v3960_v51, 1  ;;  %v4120_v55 = vadd.f32 %v4119_v28, %v4118_v50 }
 0x5b7   :  { %v3977_v56 = vmul.f32 0.25, %v3955_v42  ;;  %v4115_v2 = vadd.f32 %v4114_v53, %v4113_v0  ;;  %v3962_v36 = vadd.f32 %v3961_v54, %v3960_v51  ;;  %v4121_v57 = vrot.slane %v4120_v55, 1 }
 0x5b9   :  { %v3981_v58 = vsub.f32 %v6635_v20, %v3977_v56  ;;  %v6648_v59 = vmul.f32 0.25, %v4115_v2  ;;  %v3978_v40 = vmul.f32 0.25, %v3962_v36  ;;  %v4122_v3 = vadd.f32 %v4121_v57, %v4120_v55 }
 0x5ba   :  { %v6663_v36 = vsub.s32 6, %v6381_v31 }
 0x5bb   :  { %v3985_v60 = vmul.f32 %v3981_v58, %v3981_v58  ;;  %v4141_v43 = vsub.f32 %v6635_v20, %v6648_v59  ;;  %v3982_v5 = vsub.f32 %v6640_v19, %v3978_v40  ;;  %v6653_v61 = vmul.f32 0.25, %v4122_v3 }
 0x5bd   :  { %v3989_v41 = vsel %vm587_vm0, %v3985_v60, 0.0  ;;  %v4145_v63 = vmul.f32 %v4141_v43, %v4141_v43  ;;  %v3986_v9 = vmul.f32 %v3982_v5, %v3982_v5  ;;  %v4142_v1 = vsub.f32 %v6640_v19, %v6653_v61 }
 0x5be   :  { %v3990_v25 = vrot.slane %v3989_v41, 4  ;;  %v6667_v60 = vsub.s32 7, %v6381_v31 }
 0x5bf   :  { %v4153_v52 = vrot.slane %v4145_v63, 4  ;;  %v3996_v4 = vsel %vm587_vm0, %v3986_v9, 0.0  ;;  %v4146_v8 = vmul.f32 %v4142_v1, %v4142_v1 }
 0x5c0   :  { %v3991_v11 = vadd.f32 %v3990_v25, %v3989_v41  ;;  %v3997_v14 = vrot.slane %v3996_v4, 4 }
 0x5c1   :  { %v4161_v6 = vsel %vm587_vm0, %v4153_v52, 0.0  ;;  %v4154_v15 = vrot.slane %v4146_v8, 4 }
 0x5c2   :  { %v3992_v38 = vrot.slane %v3991_v11, 2  ;;  %v4162_v16 = vrot.slane %v4161_v6, 4  ;;  %v3998_v17 = vadd.f32 %v3997_v14, %v3996_v4 }
 0x5c3   :  { %v4168_v18 = vsel %vm587_vm0, %v4154_v15, 0.0 }
 0x5c4   :  { %v3993_v62 = vadd.f32 %v3992_v38, %v3991_v11  ;;  %v4163_v23 = vadd.f32 %v4162_v16, %v4161_v6  ;;  %v3999_v24 = vrot.slane %v3998_v17, 2  ;;  %v4169_v26 = vrot.slane %v4168_v18, 4 }
 0x5c6   :  { %v3994_v46 = vrot.slane %v3993_v62, 1  ;;  %v4164_v47 = vrot.slane %v4163_v23, 2  ;;  %v4000_v27 = vadd.f32 %v3999_v24, %v3998_v17  ;;  %v4170_v22 = vadd.f32 %v4169_v26, %v4168_v18 }
 0x5c8   :  { %v3995_v10 = vadd.f32 %v3994_v46, %v3993_v62  ;;  %v4165_v29 = vadd.f32 %v4164_v47, %v4163_v23  ;;  %v4001_v12 = vrot.slane %v4000_v27, 1  ;;  %v4171_v30 = vrot.slane %v4170_v22, 2 }
 0x5ca   :  { %v4017_v7 = vmul.f32 0.25, %v3995_v10  ;;  %v4166_v45 = vrot.slane %v4165_v29, 1  ;;  %v4002_v21 = vadd.f32 %v4001_v12, %v4000_v27  ;;  %v4172_v37 = vadd.f32 %v4171_v30, %v4170_v22 }
 0x5cc   :  { %v4021_v13 = vadd.f32 1e-05, %v4017_v7  ;;  %v4167_v44 = vadd.f32 %v4166_v45, %v4165_v29  ;;  %v4018_v48 = vmul.f32 0.25, %v4002_v21  ;;  %v4173_v49 = vrot.slane %v4172_v37, 1 }
 0x5ce   :  { %5990 = vrsqrt.f32 %v4021_v13  ;;  %v4189_v50 = vmul.f32 0.25, %v4167_v44  ;;  %v4022_v34 = vadd.f32 1e-05, %v4018_v48  ;;  %v4174_v0 = vadd.f32 %v4173_v49, %v4172_v37 }
 0x5d0   :  { %v4193_v51 = vadd.f32 1e-05, %v4189_v50  ;;  %5992 = vrsqrt.f32 %v4022_v34  ;;  %v4190_v28 = vmul.f32 0.25, %v4174_v0 }
 0x5d2   :  { %5994 = vrsqrt.f32 %v4193_v51  ;;  %v4194_v42 = vadd.f32 1e-05, %v4190_v28 }
 0x5d4   :  { %5996 = vrsqrt.f32 %v4194_v42 }
 0x5db   :  { %v5991_v53 = vpop.eup %5990 }
 0x5dc   :  { %v4029_v54 = vmul.f32 %v5991_v53, %v6386_v32 }
 0x5dd   :  { %v5993_v55 = vpop.eup %5992 }
 0x5de   :  { %v4033_v2 = vmul.f32 %v4029_v54, %v3977_v56  ;;  %v4030_v57 = vmul.f32 %v5993_v55, %v6396_v35  ;;  %v4056_v9 = vrot.slane %v4029_v54, %v6663_v36 }
 0x5df   :  { %v5995_v58 = vpop.eup %5994 }
 0x5e0   :  { %v4041_v3 = vrot.slane %v4033_v2, 7  ;;  %v4201_v43 = vmul.f32 %v5995_v58, %v6386_v32  ;;  %v4034_v5 = vmul.f32 %v4030_v57, %v3978_v40  ;;  %v4060_v11 = vrot.slane %v4030_v57, %v6663_v36 }
 0x5e1   :  { %v5997_v41 = vpop.eup %5996  ;;  %v4069_v14 = vmul.f32 %v4056_v9, %v6635_v20 }
 0x5e2   :  { %v4049_v63 = vsub.f32 %v6386_v32, %v4041_v3  ;;  %v4205_v56 = vmul.f32 %v4201_v43, %v6648_v59  ;;  %v4042_v1 = vrot.slane %v4034_v5, 7  ;;  %v4202_v25 = vmul.f32 %v5997_v41, %v6396_v35 }
 0x5e3   :  { %v4228_v8 = vrot.slane %v4201_v43, %v6663_v36 }
 0x5e4   :  { %v4076_v52 = vrot.slane %v4049_v63, %v6667_v60  ;;  %v4213_v4 = vrot.slane %v4205_v56, 7  ;;  %v4050_v31 = vsub.f32 %v6396_v35, %v4042_v1  ;;  %v4206_v40 = vmul.f32 %v4202_v25, %v6653_v61 }
 0x5e5   :  { %v4232_v59 = vrot.slane %v4202_v25, %v6663_v36  ;;  %v4241_v62 = vmul.f32 %v4228_v8, %v6635_v20  ;;  %v4070_v61 = vmul.f32 %v4060_v11, %v6640_v19 }
 0x5e6   :  { %v4221_v6 = vsub.f32 %v6386_v32, %v4213_v4  ;;  %v4080_v15 = vrot.slane %v4050_v31, %v6667_v60  ;;  %v4214_v38 = vrot.slane %v4206_v40, 7  ;;  %v3901_v16 = vpop.f32.mrf.mxu1  ;;  %v4089_v18 = vadd.f32 %v4076_v52, %v4069_v14 }
 0x5e7   :  { %v3942_v17 = vpop.f32.mrf.mxu0  ;;  %v4242_v27 = vmul.f32 %v4232_v59, %v6640_v19 }
 0x5e8   :  { %v4248_v23 = vrot.slane %v4221_v6, %v6667_v60  ;;  %v6685_v24 = vadd.f32 %v3942_v17, %v3901_v16  ;;  %v4222_v26 = vsub.f32 %v6396_v35, %v4214_v38  ;;  %v3903_v46 = vpop.f32.mrf.mxu1  ;;  %v4090_v29 = vadd.f32 %v4080_v15, %v4070_v61 }
 0x5e9   :  { %v3944_v32 = vpop.f32.mrf.mxu0  ;;  %v4093_v21 = vmax.f32 %v4089_v18, 0.0 }
 0x5ea   :  { %v4261_v47 = vadd.f32 %v4248_v23, %v4241_v62  ;;  %v3963_v22 = vsel %vm587_vm0, %v6685_v24, 0.0  ;;  %v4103_v10 = vrot.slane %v6685_v24, 4  ;;  %v4252_v20 = vrot.slane %v4222_v26, %v6667_v60  ;;  %v3905_v7 = vpop.f32.mrf.mxu1 }
 0x5eb   :  { %v3964_v12 = vrot.slane %v3963_v22, 4  ;;  %v6694_v30 = vadd.f32 %v3944_v32, %v3903_v46  ;;  %v3946_v45 = vpop.f32.mrf.mxu0  ;;  %v4094_v28 = vmax.f32 %v4090_v29, 0.0 }
 0x5ec   :  { %v4265_v35 = vmax.f32 %v4261_v47, 0.0  ;;  %v4123_v37 = vsel %vm587_vm0, %v4103_v10, 0.0  ;;  %v4262_v13 = vadd.f32 %v4252_v20, %v4242_v27  ;;  %v3906_v49 = vpop.f32.mrf.mxu1 }
 0x5ed   :  { %v3965_v44 = vadd.f32 %v3964_v12, %v3963_v22  ;;  %v4124_v19 = vrot.slane %v4123_v37, 4  ;;  %v3970_v48 = vsel %vm587_vm0, %v6694_v30, 0.0  ;;  %v3947_v50 = vpop.f32.mrf.mxu0  ;;  %v4104_v51 = vrot.slane %v6694_v30, 4 }
 0x5ee   :  { %v6700_v34 = vsel %vm587_vm0, %v4093_v21, %v4265_v35  ;;  %v3971_v0 = vrot.slane %v3970_v48, 4  ;;  %v4266_v42 = vmax.f32 %v4262_v13, 0.0 }
 0x5ef   :  { %v3966_v53 = vrot.slane %v3965_v44, 2  ;;  %v4125_v54 = vadd.f32 %v4124_v19, %v4123_v37  ;;  %v4130_v2 = vsel %vm587_vm0, %v4104_v51, 0.0 }
 0x5f0   :  { %v3972_v55 = vadd.f32 %v3971_v0, %v3970_v48  ;;  %v6705_v57 = vsel %vm587_vm0, %v4094_v28, %v4266_v42  ;;  %v4131_v43 = vrot.slane %v4130_v2, 4 }
 0x5f1   :  { %v3967_v58 = vadd.f32 %v3966_v53, %v3965_v44  ;;  %v4126_v3 = vrot.slane %v4125_v54, 2 }
 0x5f2   :  { %v3973_v5 = vrot.slane %v3972_v55, 2  ;;  %v4132_v9 = vadd.f32 %v4131_v43, %v4130_v2 }
 0x5f3   :  { %v3968_v41 = vrot.slane %v3967_v58, 1  ;;  %v4127_v63 = vadd.f32 %v4126_v3, %v4125_v54 }
 0x5f4   :  { %v3974_v56 = vadd.f32 %v3973_v5, %v3972_v55  ;;  %v4133_v52 = vrot.slane %v4132_v9, 2 }
 0x5f5   :  { %v3969_v1 = vadd.f32 %v3968_v41, %v3967_v58  ;;  %v4128_v25 = vrot.slane %v4127_v63, 1 }
 0x5f6   :  { %v3975_v4 = vrot.slane %v3974_v56, 1  ;;  %v4134_v11 = vadd.f32 %v4133_v52, %v4132_v9 }
 0x5f7   :  { %v3979_v8 = vmul.f32 0.25, %v3969_v1  ;;  %v4129_v31 = vadd.f32 %v4128_v25, %v4127_v63 }
 0x5f8   :  { %v3976_v40 = vadd.f32 %v3975_v4, %v3974_v56  ;;  %v4135_v59 = vrot.slane %v4134_v11, 1 }
 0x5f9   :  { %v3983_v14 = vsub.f32 %v6685_v24, %v3979_v8  ;;  %v6708_v6 = vmul.f32 0.25, %v4129_v31 }
 0x5fa   :  { %v3980_v15 = vmul.f32 0.25, %v3976_v40  ;;  %v4136_v17 = vadd.f32 %v4135_v59, %v4134_v11 }
 0x5fb   :  { %v3987_v38 = vmul.f32 %v3983_v14, %v3983_v14  ;;  %v4143_v16 = vsub.f32 %v6685_v24, %v6708_v6 }
 0x5fc   :  { %v3984_v18 = vsub.f32 %v6694_v30, %v3980_v15  ;;  %v6714_v61 = vmul.f32 0.25, %v4136_v17 }
 0x5fd   :  { %v4003_v62 = vsel %vm587_vm0, %v3987_v38, 0.0  ;;  %v4147_v23 = vmul.f32 %v4143_v16, %v4143_v16 }
 0x5fe   :  { %v4004_v26 = vrot.slane %v4003_v62, 4  ;;  %v3988_v46 = vmul.f32 %v3984_v18, %v3984_v18  ;;  %v4144_v47 = vsub.f32 %v6694_v30, %v6714_v61 }
 0x5ff   :  { %v4155_v32 = vrot.slane %v4147_v23, 4 }
 0x600   :  { %v4005_v27 = vadd.f32 %v4004_v26, %v4003_v62  ;;  %v4010_v22 = vsel %vm587_vm0, %v3988_v46, 0.0  ;;  %v4148_v20 = vmul.f32 %v4144_v47, %v4144_v47 }
 0x601   :  { %v4175_v10 = vsel %vm587_vm0, %v4155_v32, 0.0  ;;  %v4011_v29 = vrot.slane %v4010_v22, 4 }
 0x602   :  { %v4006_v12 = vrot.slane %v4005_v27, 2  ;;  %v4176_v7 = vrot.slane %v4175_v10, 4  ;;  %v4156_v21 = vrot.slane %v4148_v20, 4 }
 0x603   :  { %v4012_v45 = vadd.f32 %v4011_v29, %v4010_v22 }
 0x604   :  { %v4007_v35 = vadd.f32 %v4006_v12, %v4005_v27  ;;  %v4177_v37 = vadd.f32 %v4176_v7, %v4175_v10  ;;  %v4182_v44 = vsel %vm587_vm0, %v4156_v21, 0.0 }
 0x605   :  { %v4013_v13 = vrot.slane %v4012_v45, 2  ;;  %v4183_v49 = vrot.slane %v4182_v44, 4 }
 0x606   :  { %v4008_v19 = vrot.slane %v4007_v35, 1  ;;  %v4178_v48 = vrot.slane %v4177_v37, 2 }
 0x607   :  { %v4014_v50 = vadd.f32 %v4013_v13, %v4012_v45  ;;  %v4184_v28 = vadd.f32 %v4183_v49, %v4182_v44 }
 0x608   :  { %v4009_v0 = vadd.f32 %v4008_v19, %v4007_v35  ;;  %v4179_v51 = vadd.f32 %v4178_v48, %v4177_v37 }
 0x609   :  { %v4015_v42 = vrot.slane %v4014_v50, 1  ;;  %v4185_v55 = vrot.slane %v4184_v28, 2 }
 0x60a   :  { %v4019_v53 = vmul.f32 0.25, %v4009_v0  ;;  %v4180_v54 = vrot.slane %v4179_v51, 1 }
 0x60b   :  { %v4016_v2 = vadd.f32 %v4015_v42, %v4014_v50  ;;  %v4186_v43 = vadd.f32 %v4185_v55, %v4184_v28 }
 0x60c   :  { %v4023_v58 = vadd.f32 1e-05, %v4019_v53  ;;  %v4181_v3 = vadd.f32 %v4180_v54, %v4179_v51 }
 0x60d   :  { %v4020_v5 = vmul.f32 0.25, %v4016_v2  ;;  %v4187_v63 = vrot.slane %v4186_v43, 1 }
 0x60e   :  { %5998 = vrsqrt.f32 %v4023_v58  ;;  %v4191_v41 = vmul.f32 0.25, %v4181_v3 }
 0x60f   :  { %v4024_v9 = vadd.f32 1e-05, %v4020_v5  ;;  %v4188_v1 = vadd.f32 %v4187_v63, %v4186_v43 }
 0x610   :  { %v4195_v56 = vadd.f32 1e-05, %v4191_v41 }
 0x611   :  { %6000 = vrsqrt.f32 %v4024_v9  ;;  %v4192_v25 = vmul.f32 0.25, %v4188_v1 }
 0x612   :  { %6002 = vrsqrt.f32 %v4195_v56 }
 0x613   :  { %v4196_v52 = vadd.f32 1e-05, %v4192_v25 }
 0x615   :  { %6004 = vrsqrt.f32 %v4196_v52 }
 0x61b   :  { %v5999_v4 = vpop.eup %5998 }
 0x61c   :  { %v4031_v31 = vmul.f32 %v5999_v4, %v6391_v33 }
 0x61e   :  { %v6001_v11 = vpop.eup %6000  ;;  %v4035_v40 = vmul.f32 %v4031_v31, %v3979_v8  ;;  %v4064_v17 = vrot.slane %v4031_v31, %v6663_v36 }
 0x61f   :  { %v6003_v14 = vpop.eup %6002  ;;  %v4032_v59 = vmul.f32 %v6001_v11, %v6403_v39 }
 0x620   :  { %v4043_v38 = vrot.slane %v4035_v40, 7  ;;  %v4203_v16 = vmul.f32 %v6003_v14, %v6391_v33  ;;  %v4071_v22 = vmul.f32 %v4064_v17, %v6685_v24 }
 0x621   :  { %v4036_v18 = vmul.f32 %v4032_v59, %v3980_v15  ;;  %v4068_v15 = vrot.slane %v4032_v59, %v6663_v36 }
 0x622   :  { %v4051_v62 = vsub.f32 %v6391_v33, %v4043_v38  ;;  %v4207_v23 = vmul.f32 %v4203_v16, %v6708_v6  ;;  %v6005_v26 = vpop.eup %6004  ;;  %v4236_v46 = vrot.slane %v4203_v16, %v6663_v36 }
 0x623   :  { %v4044_v32 = vrot.slane %v4036_v18, 7  ;;  %v4204_v27 = vmul.f32 %v6005_v26, %v6403_v39  ;;  %v4072_v13 = vmul.f32 %v4068_v15, %v6694_v30 }
 0x624   :  { %v4084_v47 = vrot.slane %v4051_v62, %v6667_v60  ;;  %v4215_v8 = vrot.slane %v4207_v23, 7  ;;  %v4243_v12 = vmul.f32 %v4236_v46, %v6685_v24 }
 0x625   :  { %v4052_v10 = vsub.f32 %v6403_v39, %v4044_v32  ;;  %v4208_v20 = vmul.f32 %v4204_v27, %v6714_v61  ;;  %v4240_v35 = vrot.slane %v4204_v27, %v6663_v36 }
 0x626   :  { %v4223_v29 = vsub.f32 %v6391_v33, %v4215_v8  ;;  %v4091_v6 = vadd.f32 %v4084_v47, %v4071_v22 }
 0x627   :  { %v4088_v45 = vrot.slane %v4052_v10, %v6667_v60  ;;  %v4216_v21 = vrot.slane %v4208_v20, 7  ;;  %v4244_v61 = vmul.f32 %v4240_v35, %v6694_v30 }
 0x628   :  { %v4256_v7 = vrot.slane %v4223_v29, %v6667_v60  ;;  %v4095_v33 = vmax.f32 %v4091_v6, 0.0 }
 0x629   :  { %v4224_v44 = vsub.f32 %v6403_v39, %v4216_v21  ;;  %v4092_v48 = vadd.f32 %v4088_v45, %v4072_v13 }
 0x62a   :  { %v4263_v37 = vadd.f32 %v4256_v7, %v4243_v12 }
 0x62b   :  { %v4260_v49 = vrot.slane %v4224_v44, %v6667_v60  ;;  %v4096_v0 = vmax.f32 %v4092_v48, 0.0 }
 0x62c   :  { %v4267_v19 = vmax.f32 %v4263_v37, 0.0 }
 0x62d   :  { %v4264_v50 = vadd.f32 %v4260_v49, %v4244_v61 }
 0x62e   :  { %v6744_v24 = vsel %vm587_vm0, %v4095_v33, %v4267_v19 }
 0x62f   :  { %v4268_v51 = vmax.f32 %v4264_v50, 0.0 }
 0x631   :  { %v4272_v36 = vsel %vm587_vm0, %v4096_v0, %v4268_v51 }
 0x632   :  { %6250 = dma.done.wait [#allocation4 + $0x1], 8192 }
 0x633   :  { %6251 = vsyncadd [#allocation4 + $0x1], 4294959104  ;;  %v4341_v39 = vpack.c.bf16 %v6705_v57, %v6705_v57  ;;  %v4343_v28 = vpack.c.bf16 %v4272_v36, %v4272_v36  ;;  %v6006_v42 = vld [vmem:[#allocation3 + $0x74] ss:$8 sps:$4 sm:$0xff]   ;;  %v6010_v60 = vld [vmem:[#allocation3 + $0x70] ss:$8 sps:$4 sm:$0xff]  }
 0x634   :  { %v6008_v30 = vld [vmem:[#allocation3 + $0x174] ss:$8 sps:$4 sm:$0xff]   ;;  %4664 = vmatprep.subr.bf16.mxu1 %v6006_v42  ;;  %v6011_v53 = vld [vmem:[#allocation3 + $0x170] ss:$8 sps:$4 sm:$0xff]   ;;  %v6012_v54 = vld [vmem:[#allocation3 + $0x64] ss:$8 sps:$4 sm:$0xff]  }
 0x635   :  { %4696 = vmatprep.mubr.bf16.mxu1 %v4341_v39  ;;  %4737 = vmatprep.mubr.bf16.mxu0 %v4343_v28  ;;  %v6014_v55 = vld [vmem:[#allocation3 + $0x164] ss:$8 sps:$4 sm:$0xff]   ;;  %v6016_v2 = vld [vmem:[#allocation3 + $0x60] ss:$8 sps:$4 sm:$0xff]   ;;  %v6018_v3 = vld [vmem:[#allocation3 + $0x54] ss:$8 sps:$4 sm:$0xff]  }
 0x636   :  { %4705 = vmatprep.subr.bf16.mxu0 %v6008_v30  ;;  %4665 = vmatpush1.bf16.msra.mxu1 %v6010_v60  ;;  %v6017_v58 = vld [vmem:[#allocation3 + $0x160] ss:$8 sps:$4 sm:$0xff]   ;;  %v6020_v43 = vld [vmem:[#allocation3 + $0x154] ss:$8 sps:$4 sm:$0xff]   ;;  %v6022_v57 = vld [vmem:[#allocation3 + $0x50] ss:$8 sps:$4 sm:$0xff]   ;;  %v4340_v60 = vpack.c.bf16 %v6700_v34, %v6700_v34 }
 0x637   :  { %4706 = vmatpush1.bf16.msra.mxu0 %v6011_v53  ;;  %4666 = vmatprep.subr.bf16.mxu1 %v6012_v54  ;;  %v6023_v5 = vld [vmem:[#allocation3 + $0x150] ss:$8 sps:$4 sm:$0xff]   ;;  %v6024_v41 = vld [vmem:[#allocation3 + $0x44] ss:$8 sps:$4 sm:$0xff]   ;;  %v6028_v9 = vld [vmem:[#allocation3 + $0x40] ss:$8 sps:$4 sm:$0xff]   ;;  %v4342_v53 = vpack.c.bf16 %v6744_v24, %v6744_v24 }
 0x638   :  { %4707 = vmatprep.subr.bf16.mxu0 %v6014_v55  ;;  %v6026_v63 = vld [vmem:[#allocation3 + $0x144] ss:$8 sps:$4 sm:$0xff]   ;;  %v6029_v56 = vld [vmem:[#allocation3 + $0x140] ss:$8 sps:$4 sm:$0xff]   ;;  %v6030_v1 = vld [vmem:[#allocation3 + $0x34] ss:$8 sps:$4 sm:$0xff]  }
 0x639   :  { %v6032_v25 = vld [vmem:[#allocation3 + $0x134] ss:$8 sps:$4 sm:$0xff]   ;;  %v6034_v52 = vld [vmem:[#allocation3 + $0x30] ss:$8 sps:$4 sm:$0xff]   ;;  %v6036_v31 = vld [vmem:[#allocation3 + $0x24] ss:$8 sps:$4 sm:$0xff]  }
 0x63a   :  { %4667 = vmatpush1.bf16.msra.mxu1 %v6016_v2  ;;  %v6035_v4 = vld [vmem:[#allocation3 + $0x130] ss:$8 sps:$4 sm:$0xff]   ;;  %v6038_v11 = vld [vmem:[#allocation3 + $0x124] ss:$8 sps:$4 sm:$0xff]   ;;  %v6040_v40 = vld [vmem:[#allocation3 + $0x20] ss:$8 sps:$4 sm:$0xff]  }
 0x63b   :  { %4708 = vmatpush1.bf16.msra.mxu0 %v6017_v58  ;;  %4668 = vmatprep.subr.bf16.mxu1 %v6018_v3  ;;  %v6041_v14 = vld [vmem:[#allocation3 + $0x120] ss:$8 sps:$4 sm:$0xff]   ;;  %v6042_v59 = vld [vmem:[#allocation3 + $0x14] ss:$8 sps:$4 sm:$0xff]   ;;  %v6046_v16 = vld [vmem:[#allocation3 + $0x10] ss:$8 sps:$4 sm:$0xff]  }
 0x63c   :  { %4709 = vmatprep.subr.bf16.mxu0 %v6020_v43  ;;  %v6044_v38 = vld [vmem:[#allocation3 + $0x114] ss:$8 sps:$4 sm:$0xff]   ;;  %v6047_v17 = vld [vmem:[#allocation3 + $0x110] ss:$8 sps:$4 sm:$0xff]   ;;  %v6048_v18 = vld [vmem:[#allocation3 + $0x4] ss:$8 sps:$4 sm:$0xff]  }
 0x63d   :  { %v6050_v62 = vld [vmem:[#allocation3 + $0x104] ss:$8 sps:$4 sm:$0xff]   ;;  %v6052_v23 = vld [vmem:[#allocation3] ss:$8 sps:$4 sm:$0xff]   ;;  %v6054_v46 = vld [vmem:[#allocation3 + $0xf4] ss:$8 sps:$4 sm:$0xff]  }
 0x63e   :  { %4669 = vmatpush1.bf16.msra.mxu1 %v6022_v57  ;;  %v6053_v26 = vld [vmem:[#allocation3 + $0x100] ss:$8 sps:$4 sm:$0xff]   ;;  %v6056_v32 = vld [vmem:[#allocation3 + $0x1f4] ss:$8 sps:$4 sm:$0xff]   ;;  %v6058_v47 = vld [vmem:[#allocation3 + $0xf0] ss:$8 sps:$4 sm:$0xff]  }
 0x63f   :  { %4710 = vmatpush1.bf16.msra.mxu0 %v6023_v5  ;;  %4670 = vmatprep.subr.bf16.mxu1 %v6024_v41  ;;  %v6059_v8 = vld [vmem:[#allocation3 + $0x1f0] ss:$8 sps:$4 sm:$0xff]   ;;  %v6060_v27 = vld [vmem:[#allocation3 + $0xe4] ss:$8 sps:$4 sm:$0xff]   ;;  %v6064_v10 = vld [vmem:[#allocation3 + $0xe0] ss:$8 sps:$4 sm:$0xff]  }
 0x640   :  { %4711 = vmatprep.subr.bf16.mxu0 %v6026_v63  ;;  %v6062_v22 = vld [vmem:[#allocation3 + $0x1e4] ss:$8 sps:$4 sm:$0xff]   ;;  %v6065_v29 = vld [vmem:[#allocation3 + $0x1e0] ss:$8 sps:$4 sm:$0xff]   ;;  %v6066_v15 = vld [vmem:[#allocation3 + $0xd4] ss:$8 sps:$4 sm:$0xff]  }
 0x641   :  { %v6068_v20 = vld [vmem:[#allocation3 + $0x1d4] ss:$8 sps:$4 sm:$0xff]   ;;  %v6070_v6 = vld [vmem:[#allocation3 + $0xd0] ss:$8 sps:$4 sm:$0xff]   ;;  %v6072_v7 = vld [vmem:[#allocation3 + $0xc4] ss:$8 sps:$4 sm:$0xff]  }
 0x642   :  { %4671 = vmatpush1.bf16.msra.mxu1 %v6028_v9  ;;  %v6071_v12 = vld [vmem:[#allocation3 + $0x1d0] ss:$8 sps:$4 sm:$0xff]   ;;  %v6074_v45 = vld [vmem:[#allocation3 + $0x1c4] ss:$8 sps:$4 sm:$0xff]   ;;  %v6076_v21 = vld [vmem:[#allocation3 + $0xc0] ss:$8 sps:$4 sm:$0xff]  }
 0x643   :  { %4712 = vmatpush1.bf16.msra.mxu0 %v6029_v56  ;;  %4672 = vmatprep.subr.bf16.mxu1 %v6030_v1  ;;  %v6077_v35 = vld [vmem:[#allocation3 + $0x1c0] ss:$8 sps:$4 sm:$0xff]   ;;  %v6078_v37 = vld [vmem:[#allocation3 + $0xb4] ss:$8 sps:$4 sm:$0xff]   ;;  %v6082_v44 = vld [vmem:[#allocation3 + $0xb0] ss:$8 sps:$4 sm:$0xff]  }
 0x644   :  { %4713 = vmatprep.subr.bf16.mxu0 %v6032_v25  ;;  %v6080_v13 = vld [vmem:[#allocation3 + $0x1b4] ss:$8 sps:$4 sm:$0xff]   ;;  %v6083_v33 = vld [vmem:[#allocation3 + $0x1b0] ss:$8 sps:$4 sm:$0xff]   ;;  %v6084_v19 = vld [vmem:[#allocation3 + $0xa4] ss:$8 sps:$4 sm:$0xff]  }
 0x645   :  { %v6086_v48 = vld [vmem:[#allocation3 + $0x1a4] ss:$8 sps:$4 sm:$0xff]   ;;  %v6088_v61 = vld [vmem:[#allocation3 + $0xa0] ss:$8 sps:$4 sm:$0xff]   ;;  %v6090_v50 = vld [vmem:[#allocation3 + $0x94] ss:$8 sps:$4 sm:$0xff]  }
 0x646   :  { %4673 = vmatpush1.bf16.msra.mxu1 %v6034_v52  ;;  %v6089_v49 = vld [vmem:[#allocation3 + $0x1a0] ss:$8 sps:$4 sm:$0xff]   ;;  %v6092_v0 = vld [vmem:[#allocation3 + $0x194] ss:$8 sps:$4 sm:$0xff]   ;;  %v6094_v51 = vld [vmem:[#allocation3 + $0x90] ss:$8 sps:$4 sm:$0xff]  }
 0x647   :  { %4714 = vmatpush1.bf16.msra.mxu0 %v6035_v4  ;;  %4674 = vmatprep.subr.bf16.mxu1 %v6036_v31  ;;  %v6095_v36 = vld [vmem:[#allocation3 + $0x190] ss:$8 sps:$4 sm:$0xff]   ;;  %v6096_v39 = vld [vmem:[#allocation3 + $0x84] ss:$8 sps:$4 sm:$0xff]   ;;  %v6100_v42 = vld [vmem:[#allocation3 + $0x80] ss:$8 sps:$4 sm:$0xff]  }
 0x648   :  { %4715 = vmatprep.subr.bf16.mxu0 %v6038_v11  ;;  %v6098_v28 = vld [vmem:[#allocation3 + $0x184] ss:$8 sps:$4 sm:$0xff]   ;;  %v6101_v30 = vld [vmem:[#allocation3 + $0x180] ss:$8 sps:$4 sm:$0xff]   ;;  %s6269_s2 = smov [#allocation13]  }
 0x649   :  { %s4756_s23 = sshll.u32 %s6269_s2, 4  ;;  %s4757_s23 = int_to_ptr.vmem [resolvable:$true] %s4756_s23 }
 0x64a   :  { %4675 = vmatpush1.bf16.msra.mxu1 %v6040_v40  ;;  %s6222_s24 = scalar_lea.vmem %s4757_s23, 128  ;;  %p6227_p3 = scmp.lt.s32.totalorder %s4757_s23, %s4757_s23 }
 0x64b   :  { %4716 = vmatpush1.bf16.msra.mxu0 %v6041_v14  ;;  %4676 = vmatprep.subr.bf16.mxu1 %v6042_v59  ;;  %p6223_p2 = scmp.ne.s32.totalorder %s4757_s23, %s6222_s24  ;;  %p6228_p4 = scmp.lt.s32.totalorder %s6222_s24, %s6222_s24 }
 0x64c   :  { %4717 = vmatprep.subr.bf16.mxu0 %v6044_v38 }
 0x64d   :  { %p6229_p5 = por %p6228_p4, %p6227_p3 }
 0x64e   :  { %4677 = vmatpush1.bf16.msra.mxu1 %v6046_v16 }
 0x64f   :  { %4718 = vmatpush1.bf16.msra.mxu0 %v6047_v17  ;;  %4678 = vmatprep.subr.bf16.mxu1 %v6048_v18  ;;  %p6230_p6 = pnand %p6229_p5, %p6223_p2 }
 0x650   :  { %4719 = vmatprep.subr.bf16.mxu0 %v6050_v62 }
 0x652   :  { %4679 = vmatpush1.bf16.msra.mxu1 %v6052_v23 }
 0x653   :  { %4720 = vmatpush1.bf16.msra.mxu0 %v6053_v26  ;;  %4680 = vmatprep.subr.bf16.mxu1 %v6054_v46 }
 0x654   :  { %4721 = vmatprep.subr.bf16.mxu0 %v6056_v32 }
 0x656   :  { %4681 = vmatpush2.bf16.msra.mxu1 %v6058_v47 }
 0x657   :  { %4722 = vmatpush2.bf16.msra.mxu0 %v6059_v8  ;;  %4682 = vmatprep.subr.bf16.mxu1 %v6060_v27 }
 0x658   :  { %4723 = vmatprep.subr.bf16.mxu0 %v6062_v22 }
 0x65a   :  { %4683 = vmatpush2.bf16.msra.mxu1 %v6064_v10 }
 0x65b   :  { %4724 = vmatpush2.bf16.msra.mxu0 %v6065_v29  ;;  %4684 = vmatprep.subr.bf16.mxu1 %v6066_v15 }
 0x65c   :  { %4725 = vmatprep.subr.bf16.mxu0 %v6068_v20 }
 0x65e   :  { %4685 = vmatpush2.bf16.msra.mxu1 %v6070_v6 }
 0x65f   :  { %4726 = vmatpush2.bf16.msra.mxu0 %v6071_v12  ;;  %4686 = vmatprep.subr.bf16.mxu1 %v6072_v7 }
 0x660   :  { %4727 = vmatprep.subr.bf16.mxu0 %v6074_v45 }
 0x662   :  { %4687 = vmatpush2.bf16.msra.mxu1 %v6076_v21 }
 0x663   :  { %4728 = vmatpush2.bf16.msra.mxu0 %v6077_v35  ;;  %4688 = vmatprep.subr.bf16.mxu1 %v6078_v37 }
 0x664   :  { %4729 = vmatprep.subr.bf16.mxu0 %v6080_v13 }
 0x666   :  { %4689 = vmatpush2.bf16.msra.mxu1 %v6082_v44 }
 0x667   :  { %4730 = vmatpush2.bf16.msra.mxu0 %v6083_v33  ;;  %4690 = vmatprep.subr.bf16.mxu1 %v6084_v19 }
 0x668   :  { %4731 = vmatprep.subr.bf16.mxu0 %v6086_v48 }
 0x66a   :  { %4691 = vmatpush2.bf16.msra.mxu1 %v6088_v61 }
 0x66b   :  { %4732 = vmatpush2.bf16.msra.mxu0 %v6089_v49  ;;  %4692 = vmatprep.subr.bf16.mxu1 %v6090_v50 }
 0x66c   :  { %4733 = vmatprep.subr.bf16.mxu0 %v6092_v0 }
 0x66e   :  { %4693 = vmatpush2.bf16.msra.mxu1 %v6094_v51 }
 0x66f   :  { %4734 = vmatpush2.bf16.msra.mxu0 %v6095_v36  ;;  %4694 = vmatprep.subr.bf16.mxu1 %v6096_v39 }
 0x670   :  { %4735 = vmatprep.subr.bf16.mxu0 %v6098_v28 }
 0x672   :  { %4695 = vmatpush2.bf16.msra.mxu1 %v6100_v42 }
 0x673   :  { %4736 = vmatpush2.bf16.msra.mxu0 %v6101_v30 }
 0x675   :  { %4697 = vmatmul.mubr.bf16.vlgmr.msra.gmra.mxu1 %v4340_v60 }
 0x676   :  { %4738 = vmatmul.mubr.bf16.vlgmr.msra.gmra.mxu0 %v4342_v53 }
 0x677   :  { %6233 = shalt.err (!%p6230_p6)
}
 0x678   :  { %4759 = dma.vmem_to_hbm [thread:$0]  %s4757_s23, 128, %s6772_s10, [#allocation7]  }
 0x735   :  { %v4698_v34 = vpop.f32.mrf.mxu1 }
 0x736   :  { %v4739_v24 = vpop.f32.mrf.mxu0 }
 0x737   :  { %v4740_v54 = vadd.f32 %v4739_v24, %v4698_v34  ;;  %v4700_v55 = vpop.f32.mrf.mxu1 }
 0x738   :  { %v4741_v2 = vpop.f32.mrf.mxu0 }
 0x739   :  { %4746 = vst [vmem:[%s6773_s11] sm:$0xff] %v4740_v54  ;;  %v4742_v58 = vadd.f32 %v4741_v2, %v4700_v55  ;;  %v4702_v3 = vpop.f32.mrf.mxu1 }
 0x73a   :  { %v4743_v43 = vpop.f32.mrf.mxu0 }
 0x73b   :  { %4747 = vst [vmem:[%s6773_s11 + $0x8] sm:$0xff] %v4742_v58  ;;  %v4703_v57 = vpop.f32.mrf.mxu1 }
 0x73c   :  { %v4744_v5 = vpop.f32.mrf.mxu0 }
 0x73d   :  { %6252 = dma.done.wait [#allocation7], 128  }
 0x73e   :  { %6253 = vsyncadd [#allocation7], 4294967168 }
 0x73f   :  { %4769 = vsyncpa [#allocation6], 1 }
 0x740   :  { %4770 = vsyncpa [#allocation9], 1 }
 0x741   :  { %4771 = vsyncpa [#allocation12], 1 }
 0x742   :  { %4772 = vsyncpa [#allocation7], 1 }
 0x743   :  { %4773 = vsyncmov [#allocation4] }
 0x746   :  { %s4774_s10 = vpop.sfrf %4773 }
 0x747   :  { %p5274_p7 = scmp.ne.s32.totalorder %s4774_s10, 0 }
 0x749   :  { %4778 = shalt.err (%p5274_p7)  }
 0x74a   :  { %4780 = vsyncmov [#allocation4 + $0x1] }
 0x74d   :  { %s4781_s12 = vpop.sfrf %4780 }
 0x74e   :  { %p5275_p8 = scmp.ne.s32.totalorder %s4781_s12, 0 }
 0x750   :  { %4785 = shalt.err (%p5275_p8)  }

</bundles_post_ra>
